<compile_context>
chip_gen: v6e
topology: v6e:2x2x1
jax: 0.10.0
libtpu: 0.0.40
codegen_flags: <defaults>
</compile_context>

<pallas_src>
import functools
import math

import jax
import jax.numpy as jnp
from jax import lax
from jax.experimental import pallas as pl
from jax.experimental.pallas import tpu as pltpu


# ----------------------------------------------------------------------------
# Small-parameter slab layout (per attention block).  One (16, >=128) f32 slab
# holds every per-block vector (LN gammas/betas + all biases) -> one DMA
# instead of ~11 tiny ones, and no narrow trailing dims anywhere.
# ----------------------------------------------------------------------------
_R_LNQ_G, _R_LNQ_B, _R_LNKV_G, _R_LNKV_B = 0, 1, 2, 3
_R_BQ, _R_BKV, _R_BO = 4, 5, 6
_R_LN2_G, _R_LN2_B, _R_B1, _R_B2 = 7, 8, 9, 10
_N_VEC_ROWS = 11


# ----------------------------------------------------------------------------
# In-kernel helpers (f32 elementwise math; bf16 only feeds the MXU).
# ----------------------------------------------------------------------------
def _ln(x, g, b, eps=1e-5):
    mu = jnp.mean(x, axis=-1, keepdims=True)
    var = jnp.mean((x - mu) * (x - mu), axis=-1, keepdims=True)
    return (x - mu) * lax.rsqrt(var + eps) * g + b


def _gelu_tanh(x):
    # tanh-approx GELU (== jax.nn.gelu(approximate=True)); tanh -> EUP slot.
    c = 0.7978845608028654  # sqrt(2/pi)
    return 0.5 * x * (1.0 + jnp.tanh(c * (x + 0.044715 * x * x * x)))


def _attn_block(x, ctx, params, *, num_heads, head_dim, batch):
    """Pre-LN block on batch-stacked 2-D activations.

      x   : (batch*L, Dq) f32 residual stream
      ctx : (batch*S, Dk) f32 context rows (== x for latent self-attention)

    x += Wo(MHA(LNq(x), LNkv(ctx)));  x += W2(GELU(W1(LN2(x)))).
    """
    vec, wq, wkv, wo, w1, w2 = params
    bf16, f32 = jnp.bfloat16, jnp.float32
    inner = num_heads * head_dim
    q_dim, kv_dim, hidden = x.shape[-1], ctx.shape[-1], w1.shape[-1]
    L = x.shape[0] // batch
    S = ctx.shape[0] // batch

    ln_q_g = vec[_R_LNQ_G:_R_LNQ_G + 1, :q_dim]
    ln_q_b = vec[_R_LNQ_B:_R_LNQ_B + 1, :q_dim]
    ln_kv_g = vec[_R_LNKV_G:_R_LNKV_G + 1, :kv_dim]
    ln_kv_b = vec[_R_LNKV_B:_R_LNKV_B + 1, :kv_dim]
    bq = vec[_R_BQ:_R_BQ + 1, :inner]
    bkv = vec[_R_BKV:_R_BKV + 1, :2 * inner]
    bo = vec[_R_BO:_R_BO + 1, :q_dim]
    ln2_g = vec[_R_LN2_G:_R_LN2_G + 1, :q_dim]
    ln2_b = vec[_R_LN2_B:_R_LN2_B + 1, :q_dim]
    b1 = vec[_R_B1:_R_B1 + 1, :hidden]
    b2 = vec[_R_B2:_R_B2 + 1, :q_dim]

    # --- flat 2-D projections: one MXU push each (N = inner / 2*inner) ------
    xq = _ln(x, ln_q_g, ln_q_b).astype(bf16)           # (B*L, Dq)
    xkv = _ln(ctx, ln_kv_g, ln_kv_b).astype(bf16)      # (B*S, Dk)
    # 1/sqrt(head_dim) is already folded into wq / bq on the host.
    q = jnp.dot(xq, wq, preferred_element_type=f32) + bq       # (B*L, inner)
    kv = jnp.dot(xkv, wkv, preferred_element_type=f32) + bkv   # (B*S, 2*inner)

    # --- head split only for score / weighted-sum (static lane slices) ------
    def split_heads(t):   # (rows, inner) -> (H, rows, Dh)
        return jnp.stack(
            [t[:, h * head_dim:(h + 1) * head_dim] for h in range(num_heads)],
            axis=0)

    qh = split_heads(q).astype(bf16)               # (H, B*L, Dh)
    kh = split_heads(kv[:, :inner]).astype(bf16)   # (H, B*S, Dh)
    vh = split_heads(kv[:, inner:]).astype(bf16)   # (H, B*S, Dh)

    # --- attention, per batch element (batches must not attend across) ------
    outs = []
    for b in range(batch):                         # static; batch is tiny
        qb = qh[:, b * L:(b + 1) * L, :]           # (H, L, Dh)
        kb = kh[:, b * S:(b + 1) * S, :]           # (H, S, Dh)
        vb = vh[:, b * S:(b + 1) * S, :]
        s = jnp.einsum('hld,hsd->hls', qb, kb,
                       preferred_element_type=f32)             # (H, L, S)
        s = s - jnp.max(s, axis=-1, keepdims=True)
        e = jnp.exp(s)
        # approx reciprocal (EUP slot) -> rows sum to ~1; eval-only choice.
        p = e * pl.reciprocal(jnp.sum(e, axis=-1, keepdims=True), approx=True)
        o = jnp.einsum('hls,hsd->hld', p.astype(bf16), vb,
                       preferred_element_type=f32)             # (H, L, Dh)
        # concat heads -> (L, H*Dh): O-projection becomes ONE K=inner matmul.
        outs.append(jnp.concatenate([o[h] for h in range(num_heads)], axis=-1))
    o2 = jnp.concatenate(outs, axis=0)                          # (B*L, inner)

    x = x + jnp.dot(o2.astype(bf16), wo, preferred_element_type=f32) + bo

    # --- MLP (pre-LN) ---------------------------------------------------------
    x2 = _ln(x, ln2_g, ln2_b).astype(bf16)
    h1 = jnp.dot(x2, w1, preferred_element_type=f32) + b1
    h1 = _gelu_tanh(h1).astype(bf16)
    return x + jnp.dot(h1, w2, preferred_element_type=f32) + b2


def make_encoder_kernel(num_stages, num_blocks, num_heads, head_dim,
                        batch, num_latents):
    # Full unroll only for shallow weight-shared stacks; rolled otherwise to
    # bound code size / vreg live ranges.
    unroll = num_blocks <= 4
    attn = functools.partial(_attn_block, num_heads=num_heads,
                             head_dim=head_dim, batch=batch)

    def kernel(lat_ref, data_ref,
               ca_vec, ca_wq, ca_wkv, ca_wo, ca_w1, ca_w2,
               bl_vec, bl_wq, bl_wkv, bl_wo, bl_w1, bl_w2,
               out_ref):
        # Fold batch into the sublane (row) dim: (B, L, D) -> (B*L, D); the
        # whole batch runs in a single grid step (no per-step pipeline cost).
        x = jnp.concatenate([lat_ref[b] for b in range(batch)], axis=0)
        data = jnp.concatenate([data_ref[b] for b in range(batch)], axis=0)
        ca_p = (ca_vec[...], ca_wq[...], ca_wkv[...], ca_wo[...],
                ca_w1[...], ca_w2[...])
        bl_p = (bl_vec[...], bl_wq[...], bl_wkv[...], bl_wo[...],
                bl_w1[...], bl_w2[...])

        for _ in range(num_stages):
            # Cross-attention stage: queries = latents, keys/values = data.
            x = attn(x, data, ca_p)
            # Weight-shared latent transformer applied num_blocks times.
            x = lax.fori_loop(0, num_blocks,
                              lambda _, xc: attn(xc, xc, bl_p),
                              x, unroll=unroll)

        # TODO(synk): for realistic L*Dl emit a lane-dense (B, L*Dl) output
        #             (unmasked vst); at 16x32 the sublane->lane relayout costs
        #             more than the few masked stores it removes.
        for b in range(batch):
            out_ref[b] = x[b * num_latents:(b + 1) * num_latents, :].astype(
                out_ref.dtype)

    return kernel


# ----------------------------------------------------------------------------
# Host-side parameter re-layout for the fused kernel
# ----------------------------------------------------------------------------
def _prepare_block_params(p, num_heads, head_dim, maxw):
    """Flat bf16 weights (no 8-lane minor dims) + one packed f32 slab for every
    per-block vector; 1/sqrt(head_dim) folded into Wq/bq; K and V weights fused
    into a single (Dk, 2*H*Dh) matrix."""
    f32, bf16 = jnp.float32, jnp.bfloat16
    scale = 1.0 / math.sqrt(head_dim)

    wq = (p["wq"] * scale).astype(bf16)                               # (Dq, inner)
    wkv = jnp.concatenate([p["wk"], p["wv"]], axis=1).astype(bf16)    # (Dk, 2*inner)
    wo = p["wo"].astype(bf16)                                         # (inner, Dq)
    w1 = p["w1"].astype(bf16)                                         # (Dq, hidden)
    w2 = p["w2"].astype(bf16)                                         # (hidden, Dq)

    rows = [None] * _N_VEC_ROWS
    rows[_R_LNQ_G], rows[_R_LNQ_B] = p["ln_q_g"], p["ln_q_b"]
    rows[_R_LNKV_G], rows[_R_LNKV_B] = p["ln_kv_g"], p["ln_kv_b"]
    rows[_R_BQ] = p["bq"] * scale
    rows[_R_BKV] = jnp.concatenate([p["bk"], p["bv"]], axis=1)
    rows[_R_BO] = p["bo"]
    rows[_R_LN2_G], rows[_R_LN2_B] = p["ln2_g"], p["ln2_b"]
    rows[_R_B1], rows[_R_B2] = p["b1"], p["b2"]

    n_rows = ((_N_VEC_ROWS + 7) // 8) * 8
    vec = jnp.zeros((n_rows, maxw), f32)
    for i, r in enumerate(rows):
        vec = vec.at[i, : r.shape[-1]].set(r.reshape(-1).astype(f32))
    return (vec, wq, wkv, wo, w1, w2)


# ----------------------------------------------------------------------------
# PerceiverEncoder forward (single fused pallas_call, single grid step)
# ----------------------------------------------------------------------------
def perceiver_encoder_forward(data, latent_array, ca_params, blk_params,
                              num_cross_attend_stages, num_transformer_blocks,
                              num_heads, head_dim):
    # TODO(synk): input_mask (key-padding) not implemented; the reference call
    #             uses input_mask=None.
    # TODO(synk): for realistic Perceiver S (10k-50k) the data (KV) axis must
    #             be flash-tiled (online softmax over an "arbitrary" S grid
    #             axis) to fit v7x's 64 MiB VMEM; the toy S=64 block is fully
    #             resident.  At realistic S also DMA `data` as bf16 and upcast
    #             only for the LayerNorm inside the kernel.
    B, S, Dc = data.shape
    _, L, Dl = latent_array.shape
    hidden = ca_params["w1"].shape[1]
    inner = num_heads * head_dim
    maxw = max(128, Dl, Dc, hidden, 2 * inner)

    ca = _prepare_block_params(ca_params, num_heads, head_dim, maxw)
    bl = _prepare_block_params(blk_params, num_heads, head_dim, maxw)
    weights = list(ca) + list(bl)

    # grid=(1,): the whole batch is handled inside one kernel invocation.  On
    # single-TC v5e/v6e a B-step grid is pure per-step overhead, and at these
    # sizes the single-step / batch-folded form also wins on v7x.  With a
    # single grid step there is nothing to multi-buffer, so no pl.Buffered is
    # needed (it would only matter for a multi-step grid at realistic sizes).
    def full_spec(arr):
        return pl.BlockSpec(arr.shape, lambda i, nd=arr.ndim: (0,) * nd)

    kernel = make_encoder_kernel(num_cross_attend_stages,
                                 num_transformer_blocks,
                                 num_heads, head_dim, B, L)
    out = pl.pallas_call(
        kernel,
        out_shape=jax.ShapeDtypeStruct((B, L, Dl), latent_array.dtype),
        grid=(1,),
        in_specs=[full_spec(latent_array), full_spec(data)]
                 + [full_spec(w) for w in weights],
        out_specs=pl.BlockSpec((B, L, Dl), lambda i: (0, 0, 0)),
        compiler_params=pltpu.CompilerParams(
            dimension_semantics=("arbitrary",),
            vmem_limit_bytes=32 * 1024 * 1024),
    )(latent_array, data, *weights)
    return out, None   # matches (latents, None) for return_cross_attn_maps=False


# ----------------------------------------------------------------------------
# Parameter init (deterministic, synthetic; canonical f32 layout)
# ----------------------------------------------------------------------------
def init_block_params(key, q_dim, kv_dim, num_heads, head_dim, mlp_ratio):
    inner = num_heads * head_dim
    hidden = int(mlp_ratio * q_dim)
    ks = jax.random.split(key, 18)
    f32 = jnp.float32
    n = lambda k, shape, sc: jax.random.normal(k, shape, f32) * sc
    s = 0.02
    return {
        "ln_q_g": 1.0 + n(ks[0], (1, q_dim), 0.1),
        "ln_q_b": n(ks[1], (1, q_dim), 0.1),
        "ln_kv_g": 1.0 + n(ks[2], (1, kv_dim), 0.1),
        "ln_kv_b": n(ks[3], (1, kv_dim), 0.1),
        "wq": n(ks[4], (q_dim, inner), s),
        "bq": n(ks[5], (1, inner), s),
        "wk": n(ks[6], (kv_dim, inner), s),
        "bk": n(ks[7], (1, inner), s),
        "wv": n(ks[8], (kv_dim, inner), s),
        "bv": n(ks[9], (1, inner), s),
        "wo": n(ks[10], (inner, q_dim), s),
        "bo": n(ks[11], (1, q_dim), s),
        "ln2_g": 1.0 + n(ks[12], (1, q_dim), 0.1),
        "ln2_b": n(ks[13], (1, q_dim), 0.1),
        "w1": n(ks[14], (q_dim, hidden), s),
        "b1": n(ks[15], (1, hidden), s),
        "w2": n(ks[16], (hidden, q_dim), s),
        "b2": n(ks[17], (1, q_dim), s),
    }


# ----------------------------------------------------------------------------
# Pure-JAX f32 reference (numerical verification)
# ----------------------------------------------------------------------------
def _ln_ref(x, g, b, eps=1e-5):
    mu = x.mean(-1, keepdims=True)
    var = ((x - mu) ** 2).mean(-1, keepdims=True)
    return (x - mu) / jnp.sqrt(var + eps) * g + b


def attn_block_ref(x, ctx, p, H, Dh):
    xq = _ln_ref(x, p["ln_q_g"], p["ln_q_b"])
    xkv = _ln_ref(ctx, p["ln_kv_g"], p["ln_kv_b"])
    q = xq @ p["wq"] + p["bq"]
    k = xkv @ p["wk"] + p["bk"]
    v = xkv @ p["wv"] + p["bv"]
    B, L, _ = q.shape
    S = k.shape[1]
    q = q.reshape(B, L, H, Dh)
    k = k.reshape(B, S, H, Dh)
    v = v.reshape(B, S, H, Dh)
    s = jnp.einsum("blhd,bshd->bhls", q, k) / jnp.sqrt(Dh).astype(jnp.float32)
    a = jax.nn.softmax(s, axis=-1)
    o = jnp.einsum("bhls,bshd->blhd", a, v).reshape(B, L, H * Dh)
    x = x + o @ p["wo"] + p["bo"]
    x2 = _ln_ref(x, p["ln2_g"], p["ln2_b"])
    h = jax.nn.gelu(x2 @ p["w1"] + p["b1"], approximate=True)
    return x + h @ p["w2"] + p["b2"]


def encoder_ref(data, latents, ca_p, blk_p, stages, n_blocks, H, Dh):
    cur = latents
    for _ in range(stages):
        cur = attn_block_ref(cur, data, ca_p, H, Dh)
        for _ in range(n_blocks):
            cur = attn_block_ref(cur, cur, blk_p, H, Dh)
    return cur


# ----------------------------------------------------------------------------
if __name__ == "__main__":
    B = 2
    S = 64            # num_input_elements
    input_dim = 32
    num_latents = 16
    latent_dim = 32
    num_heads = 4
    head_dim = 8
    mlp_ratio = 4
    num_cross_attend_stages = 1
    num_transformer_blocks = 2   # weight-shared latent block applied twice

    key = jax.random.PRNGKey(0)
    k_data, k_lat, k_ca, k_blk = jax.random.split(key, 4)

    data = jax.random.normal(k_data, (B, S, input_dim), jnp.float32)
    latent_array = jax.random.normal(k_lat, (B, num_latents, latent_dim),
                                     jnp.float32)

    ca_params = init_block_params(k_ca, latent_dim, input_dim,
                                  num_heads, head_dim, mlp_ratio)
    blk_params = init_block_params(k_blk, latent_dim, latent_dim,
                                   num_heads, head_dim, mlp_ratio)

    fwd = functools.partial(perceiver_encoder_forward,
                            num_cross_attend_stages=num_cross_attend_stages,
                            num_transformer_blocks=num_transformer_blocks,
                            num_heads=num_heads, head_dim=head_dim)

    out, attn_maps = fwd(data, latent_array, ca_params, blk_params)
    out = jax.block_until_ready(out)

    ref = encoder_ref(data, latent_array, ca_params, blk_params,
                      num_cross_attend_stages, num_transformer_blocks,
                      num_heads, head_dim)
    ref = jax.block_until_ready(ref)

    assert out.shape == (B, num_latents, latent_dim)
    assert attn_maps is None
    # bf16 matmul operands (f32 accumulate) + approx reciprocal -> loosened tol.
    if not bool(jnp.allclose(out, ref, atol=1e-2, rtol=1e-2)):
        max_err = float(jnp.max(jnp.abs(out - ref)))
        raise AssertionError(
            f"Pallas output mismatch vs. reference (max abs err {max_err:.2e})")

    print("KERNEL_OK")
</pallas_src>

<mosaic_0001>
module attributes {stable_mosaic.version = 11 : i64} {
  func.func @kernel(%arg0: i32, %arg1: memref<2x16x32xf32, #tpu.memory_space<vmem>>, %arg2: memref<2x64x32xf32, #tpu.memory_space<vmem>>, %arg3: memref<16x128xf32, #tpu.memory_space<vmem>>, %arg4: memref<32x32xbf16, #tpu.memory_space<vmem>>, %arg5: memref<32x64xbf16, #tpu.memory_space<vmem>>, %arg6: memref<32x32xbf16, #tpu.memory_space<vmem>>, %arg7: memref<32x128xbf16, #tpu.memory_space<vmem>>, %arg8: memref<128x32xbf16, #tpu.memory_space<vmem>>, %arg9: memref<16x128xf32, #tpu.memory_space<vmem>>, %arg10: memref<32x32xbf16, #tpu.memory_space<vmem>>, %arg11: memref<32x64xbf16, #tpu.memory_space<vmem>>, %arg12: memref<32x32xbf16, #tpu.memory_space<vmem>>, %arg13: memref<32x128xbf16, #tpu.memory_space<vmem>>, %arg14: memref<128x32xbf16, #tpu.memory_space<vmem>>, %arg15: memref<2x16x32xf32, #tpu.memory_space<vmem>>) attributes {dimension_semantics = [#tpu.dimension_semantics<arbitrary>], iteration_bounds = array<i64: 1>, scalar_prefetch = 0 : i64, scratch_operands = 0 : i64, tpu.core_type = #tpu.core_type<tc>, window_params = [{pipeline_mode = #tpu.pipeline_mode<synchronous>, transform_indices = @transform_0, window_bounds = array<i64: 2, 16, 32>}, {pipeline_mode = #tpu.pipeline_mode<synchronous>, transform_indices = @transform_1, window_bounds = array<i64: 2, 64, 32>}, {pipeline_mode = #tpu.pipeline_mode<synchronous>, transform_indices = @transform_2, window_bounds = array<i64: 16, 128>}, {pipeline_mode = #tpu.pipeline_mode<synchronous>, transform_indices = @transform_3, window_bounds = array<i64: 32, 32>}, {pipeline_mode = #tpu.pipeline_mode<synchronous>, transform_indices = @transform_4, window_bounds = array<i64: 32, 64>}, {pipeline_mode = #tpu.pipeline_mode<synchronous>, transform_indices = @transform_5, window_bounds = array<i64: 32, 32>}, {pipeline_mode = #tpu.pipeline_mode<synchronous>, transform_indices = @transform_6, window_bounds = array<i64: 32, 128>}, {pipeline_mode = #tpu.pipeline_mode<synchronous>, transform_indices = @transform_7, window_bounds = array<i64: 128, 32>}, {pipeline_mode = #tpu.pipeline_mode<synchronous>, transform_indices = @transform_8, window_bounds = array<i64: 16, 128>}, {pipeline_mode = #tpu.pipeline_mode<synchronous>, transform_indices = @transform_9, window_bounds = array<i64: 32, 32>}, {pipeline_mode = #tpu.pipeline_mode<synchronous>, transform_indices = @transform_10, window_bounds = array<i64: 32, 64>}, {pipeline_mode = #tpu.pipeline_mode<synchronous>, transform_indices = @transform_11, window_bounds = array<i64: 32, 32>}, {pipeline_mode = #tpu.pipeline_mode<synchronous>, transform_indices = @transform_12, window_bounds = array<i64: 32, 128>}, {pipeline_mode = #tpu.pipeline_mode<synchronous>, transform_indices = @transform_13, window_bounds = array<i64: 128, 32>}, {pipeline_mode = #tpu.pipeline_mode<synchronous>, transform_indices = @transform_14, window_bounds = array<i64: 2, 16, 32>}]} {
    %c0 = arith.constant 0 : index
    %c0_0 = arith.constant 0 : index
    %c0_1 = arith.constant 0 : index
    %0 = vector.load %arg1[%c0, %c0_0, %c0_1] : memref<2x16x32xf32, #tpu.memory_space<vmem>>, vector<1x16x32xf32>
    %1 = vector.shape_cast %0 : vector<1x16x32xf32> to vector<16x32xf32>
    %c1 = arith.constant 1 : index
    %c0_2 = arith.constant 0 : index
    %c0_3 = arith.constant 0 : index
    %2 = vector.load %arg1[%c1, %c0_2, %c0_3] : memref<2x16x32xf32, #tpu.memory_space<vmem>>, vector<1x16x32xf32>
    %3 = vector.shape_cast %2 : vector<1x16x32xf32> to vector<16x32xf32>
    %4 = tpu.concatenate %1, %3 in 0 : vector<16x32xf32>, vector<16x32xf32> -> vector<32x32xf32>
    %c0_4 = arith.constant 0 : index
    %c0_5 = arith.constant 0 : index
    %c0_6 = arith.constant 0 : index
    %5 = vector.load %arg2[%c0_4, %c0_5, %c0_6] : memref<2x64x32xf32, #tpu.memory_space<vmem>>, vector<1x64x32xf32>
    %6 = vector.shape_cast %5 : vector<1x64x32xf32> to vector<64x32xf32>
    %c1_7 = arith.constant 1 : index
    %c0_8 = arith.constant 0 : index
    %c0_9 = arith.constant 0 : index
    %7 = vector.load %arg2[%c1_7, %c0_8, %c0_9] : memref<2x64x32xf32, #tpu.memory_space<vmem>>, vector<1x64x32xf32>
    %8 = vector.shape_cast %7 : vector<1x64x32xf32> to vector<64x32xf32>
    %9 = tpu.concatenate %6, %8 in 0 : vector<64x32xf32>, vector<64x32xf32> -> vector<128x32xf32>
    %c0_10 = arith.constant 0 : index
    %c0_11 = arith.constant 0 : index
    %10 = vector.load %arg3[%c0_10, %c0_11] : memref<16x128xf32, #tpu.memory_space<vmem>>, vector<16x128xf32>
    %c0_12 = arith.constant 0 : index
    %c0_13 = arith.constant 0 : index
    %11 = vector.load %arg4[%c0_12, %c0_13] : memref<32x32xbf16, #tpu.memory_space<vmem>>, vector<32x32xbf16>
    %c0_14 = arith.constant 0 : index
    %c0_15 = arith.constant 0 : index
    %12 = vector.load %arg5[%c0_14, %c0_15] : memref<32x64xbf16, #tpu.memory_space<vmem>>, vector<32x64xbf16>
    %c0_16 = arith.constant 0 : index
    %c0_17 = arith.constant 0 : index
    %13 = vector.load %arg6[%c0_16, %c0_17] : memref<32x32xbf16, #tpu.memory_space<vmem>>, vector<32x32xbf16>
    %c0_18 = arith.constant 0 : index
    %c0_19 = arith.constant 0 : index
    %14 = vector.load %arg7[%c0_18, %c0_19] : memref<32x128xbf16, #tpu.memory_space<vmem>>, vector<32x128xbf16>
    %c0_20 = arith.constant 0 : index
    %c0_21 = arith.constant 0 : index
    %15 = vector.load %arg8[%c0_20, %c0_21] : memref<128x32xbf16, #tpu.memory_space<vmem>>, vector<128x32xbf16>
    %c0_22 = arith.constant 0 : index
    %c0_23 = arith.constant 0 : index
    %16 = vector.load %arg9[%c0_22, %c0_23] : memref<16x128xf32, #tpu.memory_space<vmem>>, vector<16x128xf32>
    %c0_24 = arith.constant 0 : index
    %c0_25 = arith.constant 0 : index
    %17 = vector.load %arg10[%c0_24, %c0_25] : memref<32x32xbf16, #tpu.memory_space<vmem>>, vector<32x32xbf16>
    %c0_26 = arith.constant 0 : index
    %c0_27 = arith.constant 0 : index
    %18 = vector.load %arg11[%c0_26, %c0_27] : memref<32x64xbf16, #tpu.memory_space<vmem>>, vector<32x64xbf16>
    %c0_28 = arith.constant 0 : index
    %c0_29 = arith.constant 0 : index
    %19 = vector.load %arg12[%c0_28, %c0_29] : memref<32x32xbf16, #tpu.memory_space<vmem>>, vector<32x32xbf16>
    %c0_30 = arith.constant 0 : index
    %c0_31 = arith.constant 0 : index
    %20 = vector.load %arg13[%c0_30, %c0_31] : memref<32x128xbf16, #tpu.memory_space<vmem>>, vector<32x128xbf16>
    %c0_32 = arith.constant 0 : index
    %c0_33 = arith.constant 0 : index
    %21 = vector.load %arg14[%c0_32, %c0_33] : memref<128x32xbf16, #tpu.memory_space<vmem>>, vector<128x32xbf16>
    %22 = vector.extract_strided_slice %10 {offsets = [0, 0], sizes = [1, 32], strides = [1, 1]} : vector<16x128xf32> to vector<1x32xf32>
    %23 = vector.extract_strided_slice %10 {offsets = [1, 0], sizes = [1, 32], strides = [1, 1]} : vector<16x128xf32> to vector<1x32xf32>
    %24 = vector.extract_strided_slice %10 {offsets = [2, 0], sizes = [1, 32], strides = [1, 1]} : vector<16x128xf32> to vector<1x32xf32>
    %25 = vector.extract_strided_slice %10 {offsets = [3, 0], sizes = [1, 32], strides = [1, 1]} : vector<16x128xf32> to vector<1x32xf32>
    %26 = vector.extract_strided_slice %10 {offsets = [4, 0], sizes = [1, 32], strides = [1, 1]} : vector<16x128xf32> to vector<1x32xf32>
    %27 = vector.extract_strided_slice %10 {offsets = [5, 0], sizes = [1, 64], strides = [1, 1]} : vector<16x128xf32> to vector<1x64xf32>
    %28 = vector.extract_strided_slice %10 {offsets = [6, 0], sizes = [1, 32], strides = [1, 1]} : vector<16x128xf32> to vector<1x32xf32>
    %29 = vector.extract_strided_slice %10 {offsets = [7, 0], sizes = [1, 32], strides = [1, 1]} : vector<16x128xf32> to vector<1x32xf32>
    %30 = vector.extract_strided_slice %10 {offsets = [8, 0], sizes = [1, 32], strides = [1, 1]} : vector<16x128xf32> to vector<1x32xf32>
    %31 = vector.extract_strided_slice %10 {offsets = [9, 0], sizes = [1, 128], strides = [1, 1]} : vector<16x128xf32> to vector<1x128xf32>
    %32 = vector.extract_strided_slice %10 {offsets = [10, 0], sizes = [1, 32], strides = [1, 1]} : vector<16x128xf32> to vector<1x32xf32>
    %cst = arith.constant dense<0.000000e+00> : vector<32xf32>
    %33 = vector.multi_reduction <add>, %4, %cst [1] : vector<32x32xf32> to vector<32xf32>
    %34 = vector.shape_cast %33 : vector<32xf32> to vector<32x1xf32>
    %cst_34 = arith.constant 3.200000e+01 : f32
    %35 = vector.broadcast %cst_34 : f32 to vector<32x1xf32>
    %36 = arith.divf %34, %35 : vector<32x1xf32>
    %37 = vector.broadcast %36 : vector<32x1xf32> to vector<32x32xf32>
    %38 = arith.subf %4, %37 : vector<32x32xf32>
    %39 = vector.broadcast %36 : vector<32x1xf32> to vector<32x32xf32>
    %40 = arith.subf %4, %39 : vector<32x32xf32>
    %41 = arith.mulf %38, %40 : vector<32x32xf32>
    %cst_35 = arith.constant dense<0.000000e+00> : vector<32xf32>
    %42 = vector.multi_reduction <add>, %41, %cst_35 [1] : vector<32x32xf32> to vector<32xf32>
    %43 = vector.shape_cast %42 : vector<32xf32> to vector<32x1xf32>
    %cst_36 = arith.constant 3.200000e+01 : f32
    %44 = vector.broadcast %cst_36 : f32 to vector<32x1xf32>
    %45 = arith.divf %43, %44 : vector<32x1xf32>
    %46 = vector.broadcast %36 : vector<32x1xf32> to vector<32x32xf32>
    %47 = arith.subf %4, %46 : vector<32x32xf32>
    %cst_37 = arith.constant 9.99999974E-6 : f32
    %48 = vector.broadcast %cst_37 : f32 to vector<32x1xf32>
    %49 = arith.addf %45, %48 : vector<32x1xf32>
    %50 = math.rsqrt %49 : vector<32x1xf32>
    %51 = vector.broadcast %50 : vector<32x1xf32> to vector<32x32xf32>
    %52 = arith.mulf %47, %51 : vector<32x32xf32>
    %53 = vector.broadcast %22 : vector<1x32xf32> to vector<32x32xf32>
    %54 = arith.mulf %52, %53 : vector<32x32xf32>
    %55 = vector.broadcast %23 : vector<1x32xf32> to vector<32x32xf32>
    %56 = arith.addf %54, %55 : vector<32x32xf32>
    %57 = arith.truncf %56 : vector<32x32xf32> to vector<32x32xbf16>
    %cst_38 = arith.constant dense<0.000000e+00> : vector<128xf32>
    %58 = vector.multi_reduction <add>, %9, %cst_38 [1] : vector<128x32xf32> to vector<128xf32>
    %59 = vector.shape_cast %58 : vector<128xf32> to vector<128x1xf32>
    %cst_39 = arith.constant 3.200000e+01 : f32
    %60 = vector.broadcast %cst_39 : f32 to vector<128x1xf32>
    %61 = arith.divf %59, %60 : vector<128x1xf32>
    %62 = vector.broadcast %61 : vector<128x1xf32> to vector<128x32xf32>
    %63 = arith.subf %9, %62 : vector<128x32xf32>
    %64 = vector.broadcast %61 : vector<128x1xf32> to vector<128x32xf32>
    %65 = arith.subf %9, %64 : vector<128x32xf32>
    %66 = arith.mulf %63, %65 : vector<128x32xf32>
    %cst_40 = arith.constant dense<0.000000e+00> : vector<128xf32>
    %67 = vector.multi_reduction <add>, %66, %cst_40 [1] : vector<128x32xf32> to vector<128xf32>
    %68 = vector.shape_cast %67 : vector<128xf32> to vector<128x1xf32>
    %cst_41 = arith.constant 3.200000e+01 : f32
    %69 = vector.broadcast %cst_41 : f32 to vector<128x1xf32>
    %70 = arith.divf %68, %69 : vector<128x1xf32>
    %71 = vector.broadcast %61 : vector<128x1xf32> to vector<128x32xf32>
    %72 = arith.subf %9, %71 : vector<128x32xf32>
    %cst_42 = arith.constant 9.99999974E-6 : f32
    %73 = vector.broadcast %cst_42 : f32 to vector<128x1xf32>
    %74 = arith.addf %70, %73 : vector<128x1xf32>
    %75 = math.rsqrt %74 : vector<128x1xf32>
    %76 = vector.broadcast %75 : vector<128x1xf32> to vector<128x32xf32>
    %77 = arith.mulf %72, %76 : vector<128x32xf32>
    %78 = vector.broadcast %24 : vector<1x32xf32> to vector<128x32xf32>
    %79 = arith.mulf %77, %78 : vector<128x32xf32>
    %80 = vector.broadcast %25 : vector<1x32xf32> to vector<128x32xf32>
    %81 = arith.addf %79, %80 : vector<128x32xf32>
    %82 = arith.truncf %81 : vector<128x32xf32> to vector<128x32xbf16>
    %cst_43 = arith.constant dense<0.000000e+00> : vector<32x32xf32>
    %83 = tpu.matmul %57, %11, %cst_43 {dimension_numbers = #tpu.dot_dimension_numbers<[1], [0], [0], [1], [0, 0, 1, 1], [], []>} : vector<32x32xbf16>, vector<32x32xbf16>, vector<32x32xf32> -> vector<32x32xf32>
    %84 = vector.broadcast %26 : vector<1x32xf32> to vector<32x32xf32>
    %85 = arith.addf %83, %84 : vector<32x32xf32>
    %cst_44 = arith.constant dense<0.000000e+00> : vector<128x64xf32>
    %86 = tpu.matmul %82, %12, %cst_44 {dimension_numbers = #tpu.dot_dimension_numbers<[1], [0], [0], [1], [0, 0, 1, 1], [], []>} : vector<128x32xbf16>, vector<32x64xbf16>, vector<128x64xf32> -> vector<128x64xf32>
    %87 = vector.broadcast %27 : vector<1x64xf32> to vector<128x64xf32>
    %88 = arith.addf %86, %87 : vector<128x64xf32>
    %89 = vector.extract_strided_slice %85 {offsets = [0, 0], sizes = [32, 8], strides = [1, 1]} : vector<32x32xf32> to vector<32x8xf32>
    %90 = vector.extract_strided_slice %85 {offsets = [0, 8], sizes = [32, 8], strides = [1, 1]} : vector<32x32xf32> to vector<32x8xf32>
    %91 = vector.extract_strided_slice %85 {offsets = [0, 16], sizes = [32, 8], strides = [1, 1]} : vector<32x32xf32> to vector<32x8xf32>
    %92 = vector.extract_strided_slice %85 {offsets = [0, 24], sizes = [32, 8], strides = [1, 1]} : vector<32x32xf32> to vector<32x8xf32>
    %93 = vector.shape_cast %89 : vector<32x8xf32> to vector<1x32x8xf32>
    %94 = vector.shape_cast %90 : vector<32x8xf32> to vector<1x32x8xf32>
    %95 = vector.shape_cast %91 : vector<32x8xf32> to vector<1x32x8xf32>
    %96 = vector.shape_cast %92 : vector<32x8xf32> to vector<1x32x8xf32>
    %97 = tpu.concatenate %93, %94, %95, %96 in 0 : vector<1x32x8xf32>, vector<1x32x8xf32>, vector<1x32x8xf32>, vector<1x32x8xf32> -> vector<4x32x8xf32>
    %98 = arith.truncf %97 : vector<4x32x8xf32> to vector<4x32x8xbf16>
    %99 = vector.extract_strided_slice %88 {offsets = [0, 0], sizes = [128, 32], strides = [1, 1]} : vector<128x64xf32> to vector<128x32xf32>
    %100 = vector.extract_strided_slice %99 {offsets = [0, 0], sizes = [128, 8], strides = [1, 1]} : vector<128x32xf32> to vector<128x8xf32>
    %101 = vector.extract_strided_slice %99 {offsets = [0, 8], sizes = [128, 8], strides = [1, 1]} : vector<128x32xf32> to vector<128x8xf32>
    %102 = vector.extract_strided_slice %99 {offsets = [0, 16], sizes = [128, 8], strides = [1, 1]} : vector<128x32xf32> to vector<128x8xf32>
    %103 = vector.extract_strided_slice %99 {offsets = [0, 24], sizes = [128, 8], strides = [1, 1]} : vector<128x32xf32> to vector<128x8xf32>
    %104 = vector.shape_cast %100 : vector<128x8xf32> to vector<1x128x8xf32>
    %105 = vector.shape_cast %101 : vector<128x8xf32> to vector<1x128x8xf32>
    %106 = vector.shape_cast %102 : vector<128x8xf32> to vector<1x128x8xf32>
    %107 = vector.shape_cast %103 : vector<128x8xf32> to vector<1x128x8xf32>
    %108 = tpu.concatenate %104, %105, %106, %107 in 0 : vector<1x128x8xf32>, vector<1x128x8xf32>, vector<1x128x8xf32>, vector<1x128x8xf32> -> vector<4x128x8xf32>
    %109 = arith.truncf %108 : vector<4x128x8xf32> to vector<4x128x8xbf16>
    %110 = vector.extract_strided_slice %88 {offsets = [0, 32], sizes = [128, 32], strides = [1, 1]} : vector<128x64xf32> to vector<128x32xf32>
    %111 = vector.extract_strided_slice %110 {offsets = [0, 0], sizes = [128, 8], strides = [1, 1]} : vector<128x32xf32> to vector<128x8xf32>
    %112 = vector.extract_strided_slice %110 {offsets = [0, 8], sizes = [128, 8], strides = [1, 1]} : vector<128x32xf32> to vector<128x8xf32>
    %113 = vector.extract_strided_slice %110 {offsets = [0, 16], sizes = [128, 8], strides = [1, 1]} : vector<128x32xf32> to vector<128x8xf32>
    %114 = vector.extract_strided_slice %110 {offsets = [0, 24], sizes = [128, 8], strides = [1, 1]} : vector<128x32xf32> to vector<128x8xf32>
    %115 = vector.shape_cast %111 : vector<128x8xf32> to vector<1x128x8xf32>
    %116 = vector.shape_cast %112 : vector<128x8xf32> to vector<1x128x8xf32>
    %117 = vector.shape_cast %113 : vector<128x8xf32> to vector<1x128x8xf32>
    %118 = vector.shape_cast %114 : vector<128x8xf32> to vector<1x128x8xf32>
    %119 = tpu.concatenate %115, %116, %117, %118 in 0 : vector<1x128x8xf32>, vector<1x128x8xf32>, vector<1x128x8xf32>, vector<1x128x8xf32> -> vector<4x128x8xf32>
    %120 = arith.truncf %119 : vector<4x128x8xf32> to vector<4x128x8xbf16>
    %121 = vector.extract_strided_slice %98 {offsets = [0, 0, 0], sizes = [4, 16, 8], strides = [1, 1, 1]} : vector<4x32x8xbf16> to vector<4x16x8xbf16>
    %122 = vector.extract_strided_slice %109 {offsets = [0, 0, 0], sizes = [4, 64, 8], strides = [1, 1, 1]} : vector<4x128x8xbf16> to vector<4x64x8xbf16>
    %123 = vector.extract_strided_slice %120 {offsets = [0, 0, 0], sizes = [4, 64, 8], strides = [1, 1, 1]} : vector<4x128x8xbf16> to vector<4x64x8xbf16>
    "tpu.trace_start"() <{level = 10 : i32, message = "hld,hsd->hls"}> : () -> ()
    %cst_45 = arith.constant dense<0.000000e+00> : vector<4x16x64xf32>
    %124 = tpu.matmul %121, %122, %cst_45 {dimension_numbers = #tpu.dot_dimension_numbers<[2], [2], [1], [1], [0, 0, 0, 1, 1, 1], [0], [0]>} : vector<4x16x8xbf16>, vector<4x64x8xbf16>, vector<4x16x64xf32> -> vector<4x16x64xf32>
    "tpu.trace_stop"() : () -> ()
    %cst_46 = arith.constant dense<0xFF800000> : vector<4x16xf32>
    %125 = vector.multi_reduction <maximumf>, %124, %cst_46 [2] : vector<4x16x64xf32> to vector<4x16xf32>
    %126 = vector.shape_cast %125 : vector<4x16xf32> to vector<4x16x1xf32>
    %127 = vector.broadcast %126 : vector<4x16x1xf32> to vector<4x16x64xf32>
    %128 = arith.subf %124, %127 : vector<4x16x64xf32>
    %129 = math.exp %128 : vector<4x16x64xf32>
    %cst_47 = arith.constant dense<0.000000e+00> : vector<4x16xf32>
    %130 = vector.multi_reduction <add>, %129, %cst_47 [2] : vector<4x16x64xf32> to vector<4x16xf32>
    %131 = vector.shape_cast %130 : vector<4x16xf32> to vector<4x16x1xf32>
    %132 = tpu.reciprocal %131 {approx = true} : vector<4x16x1xf32> -> vector<4x16x1xf32>
    %133 = vector.broadcast %132 : vector<4x16x1xf32> to vector<4x16x64xf32>
    %134 = arith.mulf %129, %133 : vector<4x16x64xf32>
    %135 = arith.truncf %134 : vector<4x16x64xf32> to vector<4x16x64xbf16>
    "tpu.trace_start"() <{level = 10 : i32, message = "hls,hsd->hld"}> : () -> ()
    %cst_48 = arith.constant dense<0.000000e+00> : vector<4x16x8xf32>
    %136 = tpu.matmul %135, %123, %cst_48 {dimension_numbers = #tpu.dot_dimension_numbers<[2], [1], [1], [2], [0, 0, 0, 1, 1, 2], [0], [0]>} : vector<4x16x64xbf16>, vector<4x64x8xbf16>, vector<4x16x8xf32> -> vector<4x16x8xf32>
    "tpu.trace_stop"() : () -> ()
    %137 = vector.extract_strided_slice %136 {offsets = [0, 0, 0], sizes = [1, 16, 8], strides = [1, 1, 1]} : vector<4x16x8xf32> to vector<1x16x8xf32>
    %138 = vector.shape_cast %137 : vector<1x16x8xf32> to vector<16x8xf32>
    %139 = vector.extract_strided_slice %136 {offsets = [1, 0, 0], sizes = [1, 16, 8], strides = [1, 1, 1]} : vector<4x16x8xf32> to vector<1x16x8xf32>
    %140 = vector.shape_cast %139 : vector<1x16x8xf32> to vector<16x8xf32>
    %141 = vector.extract_strided_slice %136 {offsets = [2, 0, 0], sizes = [1, 16, 8], strides = [1, 1, 1]} : vector<4x16x8xf32> to vector<1x16x8xf32>
    %142 = vector.shape_cast %141 : vector<1x16x8xf32> to vector<16x8xf32>
    %143 = vector.extract_strided_slice %136 {offsets = [3, 0, 0], sizes = [1, 16, 8], strides = [1, 1, 1]} : vector<4x16x8xf32> to vector<1x16x8xf32>
    %144 = vector.shape_cast %143 : vector<1x16x8xf32> to vector<16x8xf32>
    %145 = tpu.concatenate %138, %140, %142, %144 in 1 : vector<16x8xf32>, vector<16x8xf32>, vector<16x8xf32>, vector<16x8xf32> -> vector<16x32xf32>
    %146 = vector.extract_strided_slice %98 {offsets = [0, 16, 0], sizes = [4, 16, 8], strides = [1, 1, 1]} : vector<4x32x8xbf16> to vector<4x16x8xbf16>
    %147 = vector.extract_strided_slice %109 {offsets = [0, 64, 0], sizes = [4, 64, 8], strides = [1, 1, 1]} : vector<4x128x8xbf16> to vector<4x64x8xbf16>
    %148 = vector.extract_strided_slice %120 {offsets = [0, 64, 0], sizes = [4, 64, 8], strides = [1, 1, 1]} : vector<4x128x8xbf16> to vector<4x64x8xbf16>
    "tpu.trace_start"() <{level = 10 : i32, message = "hld,hsd->hls"}> : () -> ()
    %cst_49 = arith.constant dense<0.000000e+00> : vector<4x16x64xf32>
    %149 = tpu.matmul %146, %147, %cst_49 {dimension_numbers = #tpu.dot_dimension_numbers<[2], [2], [1], [1], [0, 0, 0, 1, 1, 1], [0], [0]>} : vector<4x16x8xbf16>, vector<4x64x8xbf16>, vector<4x16x64xf32> -> vector<4x16x64xf32>
    "tpu.trace_stop"() : () -> ()
    %cst_50 = arith.constant dense<0xFF800000> : vector<4x16xf32>
    %150 = vector.multi_reduction <maximumf>, %149, %cst_50 [2] : vector<4x16x64xf32> to vector<4x16xf32>
    %151 = vector.shape_cast %150 : vector<4x16xf32> to vector<4x16x1xf32>
    %152 = vector.broadcast %151 : vector<4x16x1xf32> to vector<4x16x64xf32>
    %153 = arith.subf %149, %152 : vector<4x16x64xf32>
    %154 = math.exp %153 : vector<4x16x64xf32>
    %cst_51 = arith.constant dense<0.000000e+00> : vector<4x16xf32>
    %155 = vector.multi_reduction <add>, %154, %cst_51 [2] : vector<4x16x64xf32> to vector<4x16xf32>
    %156 = vector.shape_cast %155 : vector<4x16xf32> to vector<4x16x1xf32>
    %157 = tpu.reciprocal %156 {approx = true} : vector<4x16x1xf32> -> vector<4x16x1xf32>
    %158 = vector.broadcast %157 : vector<4x16x1xf32> to vector<4x16x64xf32>
    %159 = arith.mulf %154, %158 : vector<4x16x64xf32>
    %160 = arith.truncf %159 : vector<4x16x64xf32> to vector<4x16x64xbf16>
    "tpu.trace_start"() <{level = 10 : i32, message = "hls,hsd->hld"}> : () -> ()
    %cst_52 = arith.constant dense<0.000000e+00> : vector<4x16x8xf32>
    %161 = tpu.matmul %160, %148, %cst_52 {dimension_numbers = #tpu.dot_dimension_numbers<[2], [1], [1], [2], [0, 0, 0, 1, 1, 2], [0], [0]>} : vector<4x16x64xbf16>, vector<4x64x8xbf16>, vector<4x16x8xf32> -> vector<4x16x8xf32>
    "tpu.trace_stop"() : () -> ()
    %162 = vector.extract_strided_slice %161 {offsets = [0, 0, 0], sizes = [1, 16, 8], strides = [1, 1, 1]} : vector<4x16x8xf32> to vector<1x16x8xf32>
    %163 = vector.shape_cast %162 : vector<1x16x8xf32> to vector<16x8xf32>
    %164 = vector.extract_strided_slice %161 {offsets = [1, 0, 0], sizes = [1, 16, 8], strides = [1, 1, 1]} : vector<4x16x8xf32> to vector<1x16x8xf32>
    %165 = vector.shape_cast %164 : vector<1x16x8xf32> to vector<16x8xf32>
    %166 = vector.extract_strided_slice %161 {offsets = [2, 0, 0], sizes = [1, 16, 8], strides = [1, 1, 1]} : vector<4x16x8xf32> to vector<1x16x8xf32>
    %167 = vector.shape_cast %166 : vector<1x16x8xf32> to vector<16x8xf32>
    %168 = vector.extract_strided_slice %161 {offsets = [3, 0, 0], sizes = [1, 16, 8], strides = [1, 1, 1]} : vector<4x16x8xf32> to vector<1x16x8xf32>
    %169 = vector.shape_cast %168 : vector<1x16x8xf32> to vector<16x8xf32>
    %170 = tpu.concatenate %163, %165, %167, %169 in 1 : vector<16x8xf32>, vector<16x8xf32>, vector<16x8xf32>, vector<16x8xf32> -> vector<16x32xf32>
    %171 = tpu.concatenate %145, %170 in 0 : vector<16x32xf32>, vector<16x32xf32> -> vector<32x32xf32>
    %172 = arith.truncf %171 : vector<32x32xf32> to vector<32x32xbf16>
    %cst_53 = arith.constant dense<0.000000e+00> : vector<32x32xf32>
    %173 = tpu.matmul %172, %13, %cst_53 {dimension_numbers = #tpu.dot_dimension_numbers<[1], [0], [0], [1], [0, 0, 1, 1], [], []>} : vector<32x32xbf16>, vector<32x32xbf16>, vector<32x32xf32> -> vector<32x32xf32>
    %174 = arith.addf %4, %173 : vector<32x32xf32>
    %175 = vector.broadcast %28 : vector<1x32xf32> to vector<32x32xf32>
    %176 = arith.addf %174, %175 : vector<32x32xf32>
    %cst_54 = arith.constant dense<0.000000e+00> : vector<32xf32>
    %177 = vector.multi_reduction <add>, %176, %cst_54 [1] : vector<32x32xf32> to vector<32xf32>
    %178 = vector.shape_cast %177 : vector<32xf32> to vector<32x1xf32>
    %cst_55 = arith.constant 3.200000e+01 : f32
    %179 = vector.broadcast %cst_55 : f32 to vector<32x1xf32>
    %180 = arith.divf %178, %179 : vector<32x1xf32>
    %181 = vector.broadcast %180 : vector<32x1xf32> to vector<32x32xf32>
    %182 = arith.subf %176, %181 : vector<32x32xf32>
    %183 = vector.broadcast %180 : vector<32x1xf32> to vector<32x32xf32>
    %184 = arith.subf %176, %183 : vector<32x32xf32>
    %185 = arith.mulf %182, %184 : vector<32x32xf32>
    %cst_56 = arith.constant dense<0.000000e+00> : vector<32xf32>
    %186 = vector.multi_reduction <add>, %185, %cst_56 [1] : vector<32x32xf32> to vector<32xf32>
    %187 = vector.shape_cast %186 : vector<32xf32> to vector<32x1xf32>
    %cst_57 = arith.constant 3.200000e+01 : f32
    %188 = vector.broadcast %cst_57 : f32 to vector<32x1xf32>
    %189 = arith.divf %187, %188 : vector<32x1xf32>
    %190 = vector.broadcast %180 : vector<32x1xf32> to vector<32x32xf32>
    %191 = arith.subf %176, %190 : vector<32x32xf32>
    %cst_58 = arith.constant 9.99999974E-6 : f32
    %192 = vector.broadcast %cst_58 : f32 to vector<32x1xf32>
    %193 = arith.addf %189, %192 : vector<32x1xf32>
    %194 = math.rsqrt %193 : vector<32x1xf32>
    %195 = vector.broadcast %194 : vector<32x1xf32> to vector<32x32xf32>
    %196 = arith.mulf %191, %195 : vector<32x32xf32>
    %197 = vector.broadcast %29 : vector<1x32xf32> to vector<32x32xf32>
    %198 = arith.mulf %196, %197 : vector<32x32xf32>
    %199 = vector.broadcast %30 : vector<1x32xf32> to vector<32x32xf32>
    %200 = arith.addf %198, %199 : vector<32x32xf32>
    %201 = arith.truncf %200 : vector<32x32xf32> to vector<32x32xbf16>
    %cst_59 = arith.constant dense<0.000000e+00> : vector<32x128xf32>
    %202 = tpu.matmul %201, %14, %cst_59 {dimension_numbers = #tpu.dot_dimension_numbers<[1], [0], [0], [1], [0, 0, 1, 1], [], []>} : vector<32x32xbf16>, vector<32x128xbf16>, vector<32x128xf32> -> vector<32x128xf32>
    %203 = vector.broadcast %31 : vector<1x128xf32> to vector<32x128xf32>
    %204 = arith.addf %202, %203 : vector<32x128xf32>
    %cst_60 = arith.constant 5.000000e-01 : f32
    %205 = vector.broadcast %cst_60 : f32 to vector<32x128xf32>
    %206 = arith.mulf %205, %204 : vector<32x128xf32>
    %cst_61 = arith.constant 4.471500e-02 : f32
    %207 = vector.broadcast %cst_61 : f32 to vector<32x128xf32>
    %208 = arith.mulf %207, %204 : vector<32x128xf32>
    %209 = arith.mulf %208, %204 : vector<32x128xf32>
    %210 = arith.mulf %209, %204 : vector<32x128xf32>
    %211 = arith.addf %204, %210 : vector<32x128xf32>
    %cst_62 = arith.constant 0.797884583 : f32
    %212 = vector.broadcast %cst_62 : f32 to vector<32x128xf32>
    %213 = arith.mulf %212, %211 : vector<32x128xf32>
    %214 = math.tanh %213 : vector<32x128xf32>
    %cst_63 = arith.constant 1.000000e+00 : f32
    %215 = vector.broadcast %cst_63 : f32 to vector<32x128xf32>
    %216 = arith.addf %215, %214 : vector<32x128xf32>
    %217 = arith.mulf %206, %216 : vector<32x128xf32>
    %218 = arith.truncf %217 : vector<32x128xf32> to vector<32x128xbf16>
    %cst_64 = arith.constant dense<0.000000e+00> : vector<32x32xf32>
    %219 = tpu.matmul %218, %15, %cst_64 {dimension_numbers = #tpu.dot_dimension_numbers<[1], [0], [0], [1], [0, 0, 1, 1], [], []>} : vector<32x128xbf16>, vector<128x32xbf16>, vector<32x32xf32> -> vector<32x32xf32>
    %220 = arith.addf %176, %219 : vector<32x32xf32>
    %221 = vector.broadcast %32 : vector<1x32xf32> to vector<32x32xf32>
    %222 = arith.addf %220, %221 : vector<32x32xf32>
    %c0_i32 = arith.constant 0 : i32
    %223 = vector.extract_strided_slice %16 {offsets = [0, 0], sizes = [1, 32], strides = [1, 1]} : vector<16x128xf32> to vector<1x32xf32>
    %224 = vector.extract_strided_slice %16 {offsets = [1, 0], sizes = [1, 32], strides = [1, 1]} : vector<16x128xf32> to vector<1x32xf32>
    %225 = vector.extract_strided_slice %16 {offsets = [2, 0], sizes = [1, 32], strides = [1, 1]} : vector<16x128xf32> to vector<1x32xf32>
    %226 = vector.extract_strided_slice %16 {offsets = [3, 0], sizes = [1, 32], strides = [1, 1]} : vector<16x128xf32> to vector<1x32xf32>
    %227 = vector.extract_strided_slice %16 {offsets = [4, 0], sizes = [1, 32], strides = [1, 1]} : vector<16x128xf32> to vector<1x32xf32>
    %228 = vector.extract_strided_slice %16 {offsets = [5, 0], sizes = [1, 64], strides = [1, 1]} : vector<16x128xf32> to vector<1x64xf32>
    %229 = vector.extract_strided_slice %16 {offsets = [6, 0], sizes = [1, 32], strides = [1, 1]} : vector<16x128xf32> to vector<1x32xf32>
    %230 = vector.extract_strided_slice %16 {offsets = [7, 0], sizes = [1, 32], strides = [1, 1]} : vector<16x128xf32> to vector<1x32xf32>
    %231 = vector.extract_strided_slice %16 {offsets = [8, 0], sizes = [1, 32], strides = [1, 1]} : vector<16x128xf32> to vector<1x32xf32>
    %232 = vector.extract_strided_slice %16 {offsets = [9, 0], sizes = [1, 128], strides = [1, 1]} : vector<16x128xf32> to vector<1x128xf32>
    %233 = vector.extract_strided_slice %16 {offsets = [10, 0], sizes = [1, 32], strides = [1, 1]} : vector<16x128xf32> to vector<1x32xf32>
    %cst_65 = arith.constant dense<0.000000e+00> : vector<32xf32>
    %234 = vector.multi_reduction <add>, %222, %cst_65 [1] : vector<32x32xf32> to vector<32xf32>
    %235 = vector.shape_cast %234 : vector<32xf32> to vector<32x1xf32>
    %cst_66 = arith.constant 3.200000e+01 : f32
    %236 = vector.broadcast %cst_66 : f32 to vector<32x1xf32>
    %237 = arith.divf %235, %236 : vector<32x1xf32>
    %238 = vector.broadcast %237 : vector<32x1xf32> to vector<32x32xf32>
    %239 = arith.subf %222, %238 : vector<32x32xf32>
    %240 = vector.broadcast %237 : vector<32x1xf32> to vector<32x32xf32>
    %241 = arith.subf %222, %240 : vector<32x32xf32>
    %242 = arith.mulf %239, %241 : vector<32x32xf32>
    %cst_67 = arith.constant dense<0.000000e+00> : vector<32xf32>
    %243 = vector.multi_reduction <add>, %242, %cst_67 [1] : vector<32x32xf32> to vector<32xf32>
    %244 = vector.shape_cast %243 : vector<32xf32> to vector<32x1xf32>
    %cst_68 = arith.constant 3.200000e+01 : f32
    %245 = vector.broadcast %cst_68 : f32 to vector<32x1xf32>
    %246 = arith.divf %244, %245 : vector<32x1xf32>
    %247 = vector.broadcast %237 : vector<32x1xf32> to vector<32x32xf32>
    %248 = arith.subf %222, %247 : vector<32x32xf32>
    %cst_69 = arith.constant 9.99999974E-6 : f32
    %249 = vector.broadcast %cst_69 : f32 to vector<32x1xf32>
    %250 = arith.addf %246, %249 : vector<32x1xf32>
    %251 = math.rsqrt %250 : vector<32x1xf32>
    %252 = vector.broadcast %251 : vector<32x1xf32> to vector<32x32xf32>
    %253 = arith.mulf %248, %252 : vector<32x32xf32>
    %254 = vector.broadcast %223 : vector<1x32xf32> to vector<32x32xf32>
    %255 = arith.mulf %253, %254 : vector<32x32xf32>
    %256 = vector.broadcast %224 : vector<1x32xf32> to vector<32x32xf32>
    %257 = arith.addf %255, %256 : vector<32x32xf32>
    %258 = arith.truncf %257 : vector<32x32xf32> to vector<32x32xbf16>
    %cst_70 = arith.constant dense<0.000000e+00> : vector<32xf32>
    %259 = vector.multi_reduction <add>, %222, %cst_70 [1] : vector<32x32xf32> to vector<32xf32>
    %260 = vector.shape_cast %259 : vector<32xf32> to vector<32x1xf32>
    %cst_71 = arith.constant 3.200000e+01 : f32
    %261 = vector.broadcast %cst_71 : f32 to vector<32x1xf32>
    %262 = arith.divf %260, %261 : vector<32x1xf32>
    %263 = vector.broadcast %262 : vector<32x1xf32> to vector<32x32xf32>
    %264 = arith.subf %222, %263 : vector<32x32xf32>
    %265 = vector.broadcast %262 : vector<32x1xf32> to vector<32x32xf32>
    %266 = arith.subf %222, %265 : vector<32x32xf32>
    %267 = arith.mulf %264, %266 : vector<32x32xf32>
    %cst_72 = arith.constant dense<0.000000e+00> : vector<32xf32>
    %268 = vector.multi_reduction <add>, %267, %cst_72 [1] : vector<32x32xf32> to vector<32xf32>
    %269 = vector.shape_cast %268 : vector<32xf32> to vector<32x1xf32>
    %cst_73 = arith.constant 3.200000e+01 : f32
    %270 = vector.broadcast %cst_73 : f32 to vector<32x1xf32>
    %271 = arith.divf %269, %270 : vector<32x1xf32>
    %272 = vector.broadcast %262 : vector<32x1xf32> to vector<32x32xf32>
    %273 = arith.subf %222, %272 : vector<32x32xf32>
    %cst_74 = arith.constant 9.99999974E-6 : f32
    %274 = vector.broadcast %cst_74 : f32 to vector<32x1xf32>
    %275 = arith.addf %271, %274 : vector<32x1xf32>
    %276 = math.rsqrt %275 : vector<32x1xf32>
    %277 = vector.broadcast %276 : vector<32x1xf32> to vector<32x32xf32>
    %278 = arith.mulf %273, %277 : vector<32x32xf32>
    %279 = vector.broadcast %225 : vector<1x32xf32> to vector<32x32xf32>
    %280 = arith.mulf %278, %279 : vector<32x32xf32>
    %281 = vector.broadcast %226 : vector<1x32xf32> to vector<32x32xf32>
    %282 = arith.addf %280, %281 : vector<32x32xf32>
    %283 = arith.truncf %282 : vector<32x32xf32> to vector<32x32xbf16>
    %cst_75 = arith.constant dense<0.000000e+00> : vector<32x32xf32>
    %284 = tpu.matmul %258, %17, %cst_75 {dimension_numbers = #tpu.dot_dimension_numbers<[1], [0], [0], [1], [0, 0, 1, 1], [], []>} : vector<32x32xbf16>, vector<32x32xbf16>, vector<32x32xf32> -> vector<32x32xf32>
    %285 = vector.broadcast %227 : vector<1x32xf32> to vector<32x32xf32>
    %286 = arith.addf %284, %285 : vector<32x32xf32>
    %cst_76 = arith.constant dense<0.000000e+00> : vector<32x64xf32>
    %287 = tpu.matmul %283, %18, %cst_76 {dimension_numbers = #tpu.dot_dimension_numbers<[1], [0], [0], [1], [0, 0, 1, 1], [], []>} : vector<32x32xbf16>, vector<32x64xbf16>, vector<32x64xf32> -> vector<32x64xf32>
    %288 = vector.broadcast %228 : vector<1x64xf32> to vector<32x64xf32>
    %289 = arith.addf %287, %288 : vector<32x64xf32>
    %290 = vector.extract_strided_slice %286 {offsets = [0, 0], sizes = [32, 8], strides = [1, 1]} : vector<32x32xf32> to vector<32x8xf32>
    %291 = vector.extract_strided_slice %286 {offsets = [0, 8], sizes = [32, 8], strides = [1, 1]} : vector<32x32xf32> to vector<32x8xf32>
    %292 = vector.extract_strided_slice %286 {offsets = [0, 16], sizes = [32, 8], strides = [1, 1]} : vector<32x32xf32> to vector<32x8xf32>
    %293 = vector.extract_strided_slice %286 {offsets = [0, 24], sizes = [32, 8], strides = [1, 1]} : vector<32x32xf32> to vector<32x8xf32>
    %294 = vector.shape_cast %290 : vector<32x8xf32> to vector<1x32x8xf32>
    %295 = vector.shape_cast %291 : vector<32x8xf32> to vector<1x32x8xf32>
    %296 = vector.shape_cast %292 : vector<32x8xf32> to vector<1x32x8xf32>
    %297 = vector.shape_cast %293 : vector<32x8xf32> to vector<1x32x8xf32>
    %298 = tpu.concatenate %294, %295, %296, %297 in 0 : vector<1x32x8xf32>, vector<1x32x8xf32>, vector<1x32x8xf32>, vector<1x32x8xf32> -> vector<4x32x8xf32>
    %299 = arith.truncf %298 : vector<4x32x8xf32> to vector<4x32x8xbf16>
    %300 = vector.extract_strided_slice %289 {offsets = [0, 0], sizes = [32, 32], strides = [1, 1]} : vector<32x64xf32> to vector<32x32xf32>
    %301 = vector.extract_strided_slice %300 {offsets = [0, 0], sizes = [32, 8], strides = [1, 1]} : vector<32x32xf32> to vector<32x8xf32>
    %302 = vector.extract_strided_slice %300 {offsets = [0, 8], sizes = [32, 8], strides = [1, 1]} : vector<32x32xf32> to vector<32x8xf32>
    %303 = vector.extract_strided_slice %300 {offsets = [0, 16], sizes = [32, 8], strides = [1, 1]} : vector<32x32xf32> to vector<32x8xf32>
    %304 = vector.extract_strided_slice %300 {offsets = [0, 24], sizes = [32, 8], strides = [1, 1]} : vector<32x32xf32> to vector<32x8xf32>
    %305 = vector.shape_cast %301 : vector<32x8xf32> to vector<1x32x8xf32>
    %306 = vector.shape_cast %302 : vector<32x8xf32> to vector<1x32x8xf32>
    %307 = vector.shape_cast %303 : vector<32x8xf32> to vector<1x32x8xf32>
    %308 = vector.shape_cast %304 : vector<32x8xf32> to vector<1x32x8xf32>
    %309 = tpu.concatenate %305, %306, %307, %308 in 0 : vector<1x32x8xf32>, vector<1x32x8xf32>, vector<1x32x8xf32>, vector<1x32x8xf32> -> vector<4x32x8xf32>
    %310 = arith.truncf %309 : vector<4x32x8xf32> to vector<4x32x8xbf16>
    %311 = vector.extract_strided_slice %289 {offsets = [0, 32], sizes = [32, 32], strides = [1, 1]} : vector<32x64xf32> to vector<32x32xf32>
    %312 = vector.extract_strided_slice %311 {offsets = [0, 0], sizes = [32, 8], strides = [1, 1]} : vector<32x32xf32> to vector<32x8xf32>
    %313 = vector.extract_strided_slice %311 {offsets = [0, 8], sizes = [32, 8], strides = [1, 1]} : vector<32x32xf32> to vector<32x8xf32>
    %314 = vector.extract_strided_slice %311 {offsets = [0, 16], sizes = [32, 8], strides = [1, 1]} : vector<32x32xf32> to vector<32x8xf32>
    %315 = vector.extract_strided_slice %311 {offsets = [0, 24], sizes = [32, 8], strides = [1, 1]} : vector<32x32xf32> to vector<32x8xf32>
    %316 = vector.shape_cast %312 : vector<32x8xf32> to vector<1x32x8xf32>
    %317 = vector.shape_cast %313 : vector<32x8xf32> to vector<1x32x8xf32>
    %318 = vector.shape_cast %314 : vector<32x8xf32> to vector<1x32x8xf32>
    %319 = vector.shape_cast %315 : vector<32x8xf32> to vector<1x32x8xf32>
    %320 = tpu.concatenate %316, %317, %318, %319 in 0 : vector<1x32x8xf32>, vector<1x32x8xf32>, vector<1x32x8xf32>, vector<1x32x8xf32> -> vector<4x32x8xf32>
    %321 = arith.truncf %320 : vector<4x32x8xf32> to vector<4x32x8xbf16>
    %322 = vector.extract_strided_slice %299 {offsets = [0, 0, 0], sizes = [4, 16, 8], strides = [1, 1, 1]} : vector<4x32x8xbf16> to vector<4x16x8xbf16>
    %323 = vector.extract_strided_slice %310 {offsets = [0, 0, 0], sizes = [4, 16, 8], strides = [1, 1, 1]} : vector<4x32x8xbf16> to vector<4x16x8xbf16>
    %324 = vector.extract_strided_slice %321 {offsets = [0, 0, 0], sizes = [4, 16, 8], strides = [1, 1, 1]} : vector<4x32x8xbf16> to vector<4x16x8xbf16>
    "tpu.trace_start"() <{level = 10 : i32, message = "hld,hsd->hls"}> : () -> ()
    %cst_77 = arith.constant dense<0.000000e+00> : vector<4x16x16xf32>
    %325 = tpu.matmul %322, %323, %cst_77 {dimension_numbers = #tpu.dot_dimension_numbers<[2], [2], [1], [1], [0, 0, 0, 1, 1, 1], [0], [0]>} : vector<4x16x8xbf16>, vector<4x16x8xbf16>, vector<4x16x16xf32> -> vector<4x16x16xf32>
    "tpu.trace_stop"() : () -> ()
    %cst_78 = arith.constant dense<0xFF800000> : vector<4x16xf32>
    %326 = vector.multi_reduction <maximumf>, %325, %cst_78 [2] : vector<4x16x16xf32> to vector<4x16xf32>
    %327 = vector.shape_cast %326 : vector<4x16xf32> to vector<4x16x1xf32>
    %328 = vector.broadcast %327 : vector<4x16x1xf32> to vector<4x16x16xf32>
    %329 = arith.subf %325, %328 : vector<4x16x16xf32>
    %330 = math.exp %329 : vector<4x16x16xf32>
    %cst_79 = arith.constant dense<0.000000e+00> : vector<4x16xf32>
    %331 = vector.multi_reduction <add>, %330, %cst_79 [2] : vector<4x16x16xf32> to vector<4x16xf32>
    %332 = vector.shape_cast %331 : vector<4x16xf32> to vector<4x16x1xf32>
    %333 = tpu.reciprocal %332 {approx = true} : vector<4x16x1xf32> -> vector<4x16x1xf32>
    %334 = vector.broadcast %333 : vector<4x16x1xf32> to vector<4x16x16xf32>
    %335 = arith.mulf %330, %334 : vector<4x16x16xf32>
    %336 = arith.truncf %335 : vector<4x16x16xf32> to vector<4x16x16xbf16>
    "tpu.trace_start"() <{level = 10 : i32, message = "hls,hsd->hld"}> : () -> ()
    %cst_80 = arith.constant dense<0.000000e+00> : vector<4x16x8xf32>
    %337 = tpu.matmul %336, %324, %cst_80 {dimension_numbers = #tpu.dot_dimension_numbers<[2], [1], [1], [2], [0, 0, 0, 1, 1, 2], [0], [0]>} : vector<4x16x16xbf16>, vector<4x16x8xbf16>, vector<4x16x8xf32> -> vector<4x16x8xf32>
    "tpu.trace_stop"() : () -> ()
    %338 = vector.extract_strided_slice %337 {offsets = [0, 0, 0], sizes = [1, 16, 8], strides = [1, 1, 1]} : vector<4x16x8xf32> to vector<1x16x8xf32>
    %339 = vector.shape_cast %338 : vector<1x16x8xf32> to vector<16x8xf32>
    %340 = vector.extract_strided_slice %337 {offsets = [1, 0, 0], sizes = [1, 16, 8], strides = [1, 1, 1]} : vector<4x16x8xf32> to vector<1x16x8xf32>
    %341 = vector.shape_cast %340 : vector<1x16x8xf32> to vector<16x8xf32>
    %342 = vector.extract_strided_slice %337 {offsets = [2, 0, 0], sizes = [1, 16, 8], strides = [1, 1, 1]} : vector<4x16x8xf32> to vector<1x16x8xf32>
    %343 = vector.shape_cast %342 : vector<1x16x8xf32> to vector<16x8xf32>
    %344 = vector.extract_strided_slice %337 {offsets = [3, 0, 0], sizes = [1, 16, 8], strides = [1, 1, 1]} : vector<4x16x8xf32> to vector<1x16x8xf32>
    %345 = vector.shape_cast %344 : vector<1x16x8xf32> to vector<16x8xf32>
    %346 = tpu.concatenate %339, %341, %343, %345 in 1 : vector<16x8xf32>, vector<16x8xf32>, vector<16x8xf32>, vector<16x8xf32> -> vector<16x32xf32>
    %347 = vector.extract_strided_slice %299 {offsets = [0, 16, 0], sizes = [4, 16, 8], strides = [1, 1, 1]} : vector<4x32x8xbf16> to vector<4x16x8xbf16>
    %348 = vector.extract_strided_slice %310 {offsets = [0, 16, 0], sizes = [4, 16, 8], strides = [1, 1, 1]} : vector<4x32x8xbf16> to vector<4x16x8xbf16>
    %349 = vector.extract_strided_slice %321 {offsets = [0, 16, 0], sizes = [4, 16, 8], strides = [1, 1, 1]} : vector<4x32x8xbf16> to vector<4x16x8xbf16>
    "tpu.trace_start"() <{level = 10 : i32, message = "hld,hsd->hls"}> : () -> ()
    %cst_81 = arith.constant dense<0.000000e+00> : vector<4x16x16xf32>
    %350 = tpu.matmul %347, %348, %cst_81 {dimension_numbers = #tpu.dot_dimension_numbers<[2], [2], [1], [1], [0, 0, 0, 1, 1, 1], [0], [0]>} : vector<4x16x8xbf16>, vector<4x16x8xbf16>, vector<4x16x16xf32> -> vector<4x16x16xf32>
    "tpu.trace_stop"() : () -> ()
    %cst_82 = arith.constant dense<0xFF800000> : vector<4x16xf32>
    %351 = vector.multi_reduction <maximumf>, %350, %cst_82 [2] : vector<4x16x16xf32> to vector<4x16xf32>
    %352 = vector.shape_cast %351 : vector<4x16xf32> to vector<4x16x1xf32>
    %353 = vector.broadcast %352 : vector<4x16x1xf32> to vector<4x16x16xf32>
    %354 = arith.subf %350, %353 : vector<4x16x16xf32>
    %355 = math.exp %354 : vector<4x16x16xf32>
    %cst_83 = arith.constant dense<0.000000e+00> : vector<4x16xf32>
    %356 = vector.multi_reduction <add>, %355, %cst_83 [2] : vector<4x16x16xf32> to vector<4x16xf32>
    %357 = vector.shape_cast %356 : vector<4x16xf32> to vector<4x16x1xf32>
    %358 = tpu.reciprocal %357 {approx = true} : vector<4x16x1xf32> -> vector<4x16x1xf32>
    %359 = vector.broadcast %358 : vector<4x16x1xf32> to vector<4x16x16xf32>
    %360 = arith.mulf %355, %359 : vector<4x16x16xf32>
    %361 = arith.truncf %360 : vector<4x16x16xf32> to vector<4x16x16xbf16>
    "tpu.trace_start"() <{level = 10 : i32, message = "hls,hsd->hld"}> : () -> ()
    %cst_84 = arith.constant dense<0.000000e+00> : vector<4x16x8xf32>
    %362 = tpu.matmul %361, %349, %cst_84 {dimension_numbers = #tpu.dot_dimension_numbers<[2], [1], [1], [2], [0, 0, 0, 1, 1, 2], [0], [0]>} : vector<4x16x16xbf16>, vector<4x16x8xbf16>, vector<4x16x8xf32> -> vector<4x16x8xf32>
    "tpu.trace_stop"() : () -> ()
    %363 = vector.extract_strided_slice %362 {offsets = [0, 0, 0], sizes = [1, 16, 8], strides = [1, 1, 1]} : vector<4x16x8xf32> to vector<1x16x8xf32>
    %364 = vector.shape_cast %363 : vector<1x16x8xf32> to vector<16x8xf32>
    %365 = vector.extract_strided_slice %362 {offsets = [1, 0, 0], sizes = [1, 16, 8], strides = [1, 1, 1]} : vector<4x16x8xf32> to vector<1x16x8xf32>
    %366 = vector.shape_cast %365 : vector<1x16x8xf32> to vector<16x8xf32>
    %367 = vector.extract_strided_slice %362 {offsets = [2, 0, 0], sizes = [1, 16, 8], strides = [1, 1, 1]} : vector<4x16x8xf32> to vector<1x16x8xf32>
    %368 = vector.shape_cast %367 : vector<1x16x8xf32> to vector<16x8xf32>
    %369 = vector.extract_strided_slice %362 {offsets = [3, 0, 0], sizes = [1, 16, 8], strides = [1, 1, 1]} : vector<4x16x8xf32> to vector<1x16x8xf32>
    %370 = vector.shape_cast %369 : vector<1x16x8xf32> to vector<16x8xf32>
    %371 = tpu.concatenate %364, %366, %368, %370 in 1 : vector<16x8xf32>, vector<16x8xf32>, vector<16x8xf32>, vector<16x8xf32> -> vector<16x32xf32>
    %372 = tpu.concatenate %346, %371 in 0 : vector<16x32xf32>, vector<16x32xf32> -> vector<32x32xf32>
    %373 = arith.truncf %372 : vector<32x32xf32> to vector<32x32xbf16>
    %cst_85 = arith.constant dense<0.000000e+00> : vector<32x32xf32>
    %374 = tpu.matmul %373, %19, %cst_85 {dimension_numbers = #tpu.dot_dimension_numbers<[1], [0], [0], [1], [0, 0, 1, 1], [], []>} : vector<32x32xbf16>, vector<32x32xbf16>, vector<32x32xf32> -> vector<32x32xf32>
    %375 = arith.addf %222, %374 : vector<32x32xf32>
    %376 = vector.broadcast %229 : vector<1x32xf32> to vector<32x32xf32>
    %377 = arith.addf %375, %376 : vector<32x32xf32>
    %cst_86 = arith.constant dense<0.000000e+00> : vector<32xf32>
    %378 = vector.multi_reduction <add>, %377, %cst_86 [1] : vector<32x32xf32> to vector<32xf32>
    %379 = vector.shape_cast %378 : vector<32xf32> to vector<32x1xf32>
    %cst_87 = arith.constant 3.200000e+01 : f32
    %380 = vector.broadcast %cst_87 : f32 to vector<32x1xf32>
    %381 = arith.divf %379, %380 : vector<32x1xf32>
    %382 = vector.broadcast %381 : vector<32x1xf32> to vector<32x32xf32>
    %383 = arith.subf %377, %382 : vector<32x32xf32>
    %384 = vector.broadcast %381 : vector<32x1xf32> to vector<32x32xf32>
    %385 = arith.subf %377, %384 : vector<32x32xf32>
    %386 = arith.mulf %383, %385 : vector<32x32xf32>
    %cst_88 = arith.constant dense<0.000000e+00> : vector<32xf32>
    %387 = vector.multi_reduction <add>, %386, %cst_88 [1] : vector<32x32xf32> to vector<32xf32>
    %388 = vector.shape_cast %387 : vector<32xf32> to vector<32x1xf32>
    %cst_89 = arith.constant 3.200000e+01 : f32
    %389 = vector.broadcast %cst_89 : f32 to vector<32x1xf32>
    %390 = arith.divf %388, %389 : vector<32x1xf32>
    %391 = vector.broadcast %381 : vector<32x1xf32> to vector<32x32xf32>
    %392 = arith.subf %377, %391 : vector<32x32xf32>
    %cst_90 = arith.constant 9.99999974E-6 : f32
    %393 = vector.broadcast %cst_90 : f32 to vector<32x1xf32>
    %394 = arith.addf %390, %393 : vector<32x1xf32>
    %395 = math.rsqrt %394 : vector<32x1xf32>
    %396 = vector.broadcast %395 : vector<32x1xf32> to vector<32x32xf32>
    %397 = arith.mulf %392, %396 : vector<32x32xf32>
    %398 = vector.broadcast %230 : vector<1x32xf32> to vector<32x32xf32>
    %399 = arith.mulf %397, %398 : vector<32x32xf32>
    %400 = vector.broadcast %231 : vector<1x32xf32> to vector<32x32xf32>
    %401 = arith.addf %399, %400 : vector<32x32xf32>
    %402 = arith.truncf %401 : vector<32x32xf32> to vector<32x32xbf16>
    %cst_91 = arith.constant dense<0.000000e+00> : vector<32x128xf32>
    %403 = tpu.matmul %402, %20, %cst_91 {dimension_numbers = #tpu.dot_dimension_numbers<[1], [0], [0], [1], [0, 0, 1, 1], [], []>} : vector<32x32xbf16>, vector<32x128xbf16>, vector<32x128xf32> -> vector<32x128xf32>
    %404 = vector.broadcast %232 : vector<1x128xf32> to vector<32x128xf32>
    %405 = arith.addf %403, %404 : vector<32x128xf32>
    %cst_92 = arith.constant 5.000000e-01 : f32
    %406 = vector.broadcast %cst_92 : f32 to vector<32x128xf32>
    %407 = arith.mulf %406, %405 : vector<32x128xf32>
    %cst_93 = arith.constant 4.471500e-02 : f32
    %408 = vector.broadcast %cst_93 : f32 to vector<32x128xf32>
    %409 = arith.mulf %408, %405 : vector<32x128xf32>
    %410 = arith.mulf %409, %405 : vector<32x128xf32>
    %411 = arith.mulf %410, %405 : vector<32x128xf32>
    %412 = arith.addf %405, %411 : vector<32x128xf32>
    %cst_94 = arith.constant 0.797884583 : f32
    %413 = vector.broadcast %cst_94 : f32 to vector<32x128xf32>
    %414 = arith.mulf %413, %412 : vector<32x128xf32>
    %415 = math.tanh %414 : vector<32x128xf32>
    %cst_95 = arith.constant 1.000000e+00 : f32
    %416 = vector.broadcast %cst_95 : f32 to vector<32x128xf32>
    %417 = arith.addf %416, %415 : vector<32x128xf32>
    %418 = arith.mulf %407, %417 : vector<32x128xf32>
    %419 = arith.truncf %418 : vector<32x128xf32> to vector<32x128xbf16>
    %cst_96 = arith.constant dense<0.000000e+00> : vector<32x32xf32>
    %420 = tpu.matmul %419, %21, %cst_96 {dimension_numbers = #tpu.dot_dimension_numbers<[1], [0], [0], [1], [0, 0, 1, 1], [], []>} : vector<32x128xbf16>, vector<128x32xbf16>, vector<32x32xf32> -> vector<32x32xf32>
    %421 = arith.addf %377, %420 : vector<32x32xf32>
    %422 = vector.broadcast %233 : vector<1x32xf32> to vector<32x32xf32>
    %423 = arith.addf %421, %422 : vector<32x32xf32>
    %c1_i32 = arith.constant 1 : i32
    %424 = vector.extract_strided_slice %16 {offsets = [0, 0], sizes = [1, 32], strides = [1, 1]} : vector<16x128xf32> to vector<1x32xf32>
    %425 = vector.extract_strided_slice %16 {offsets = [1, 0], sizes = [1, 32], strides = [1, 1]} : vector<16x128xf32> to vector<1x32xf32>
    %426 = vector.extract_strided_slice %16 {offsets = [2, 0], sizes = [1, 32], strides = [1, 1]} : vector<16x128xf32> to vector<1x32xf32>
    %427 = vector.extract_strided_slice %16 {offsets = [3, 0], sizes = [1, 32], strides = [1, 1]} : vector<16x128xf32> to vector<1x32xf32>
    %428 = vector.extract_strided_slice %16 {offsets = [4, 0], sizes = [1, 32], strides = [1, 1]} : vector<16x128xf32> to vector<1x32xf32>
    %429 = vector.extract_strided_slice %16 {offsets = [5, 0], sizes = [1, 64], strides = [1, 1]} : vector<16x128xf32> to vector<1x64xf32>
    %430 = vector.extract_strided_slice %16 {offsets = [6, 0], sizes = [1, 32], strides = [1, 1]} : vector<16x128xf32> to vector<1x32xf32>
    %431 = vector.extract_strided_slice %16 {offsets = [7, 0], sizes = [1, 32], strides = [1, 1]} : vector<16x128xf32> to vector<1x32xf32>
    %432 = vector.extract_strided_slice %16 {offsets = [8, 0], sizes = [1, 32], strides = [1, 1]} : vector<16x128xf32> to vector<1x32xf32>
    %433 = vector.extract_strided_slice %16 {offsets = [9, 0], sizes = [1, 128], strides = [1, 1]} : vector<16x128xf32> to vector<1x128xf32>
    %434 = vector.extract_strided_slice %16 {offsets = [10, 0], sizes = [1, 32], strides = [1, 1]} : vector<16x128xf32> to vector<1x32xf32>
    %cst_97 = arith.constant dense<0.000000e+00> : vector<32xf32>
    %435 = vector.multi_reduction <add>, %423, %cst_97 [1] : vector<32x32xf32> to vector<32xf32>
    %436 = vector.shape_cast %435 : vector<32xf32> to vector<32x1xf32>
    %cst_98 = arith.constant 3.200000e+01 : f32
    %437 = vector.broadcast %cst_98 : f32 to vector<32x1xf32>
    %438 = arith.divf %436, %437 : vector<32x1xf32>
    %439 = vector.broadcast %438 : vector<32x1xf32> to vector<32x32xf32>
    %440 = arith.subf %423, %439 : vector<32x32xf32>
    %441 = vector.broadcast %438 : vector<32x1xf32> to vector<32x32xf32>
    %442 = arith.subf %423, %441 : vector<32x32xf32>
    %443 = arith.mulf %440, %442 : vector<32x32xf32>
    %cst_99 = arith.constant dense<0.000000e+00> : vector<32xf32>
    %444 = vector.multi_reduction <add>, %443, %cst_99 [1] : vector<32x32xf32> to vector<32xf32>
    %445 = vector.shape_cast %444 : vector<32xf32> to vector<32x1xf32>
    %cst_100 = arith.constant 3.200000e+01 : f32
    %446 = vector.broadcast %cst_100 : f32 to vector<32x1xf32>
    %447 = arith.divf %445, %446 : vector<32x1xf32>
    %448 = vector.broadcast %438 : vector<32x1xf32> to vector<32x32xf32>
    %449 = arith.subf %423, %448 : vector<32x32xf32>
    %cst_101 = arith.constant 9.99999974E-6 : f32
    %450 = vector.broadcast %cst_101 : f32 to vector<32x1xf32>
    %451 = arith.addf %447, %450 : vector<32x1xf32>
    %452 = math.rsqrt %451 : vector<32x1xf32>
    %453 = vector.broadcast %452 : vector<32x1xf32> to vector<32x32xf32>
    %454 = arith.mulf %449, %453 : vector<32x32xf32>
    %455 = vector.broadcast %424 : vector<1x32xf32> to vector<32x32xf32>
    %456 = arith.mulf %454, %455 : vector<32x32xf32>
    %457 = vector.broadcast %425 : vector<1x32xf32> to vector<32x32xf32>
    %458 = arith.addf %456, %457 : vector<32x32xf32>
    %459 = arith.truncf %458 : vector<32x32xf32> to vector<32x32xbf16>
    %cst_102 = arith.constant dense<0.000000e+00> : vector<32xf32>
    %460 = vector.multi_reduction <add>, %423, %cst_102 [1] : vector<32x32xf32> to vector<32xf32>
    %461 = vector.shape_cast %460 : vector<32xf32> to vector<32x1xf32>
    %cst_103 = arith.constant 3.200000e+01 : f32
    %462 = vector.broadcast %cst_103 : f32 to vector<32x1xf32>
    %463 = arith.divf %461, %462 : vector<32x1xf32>
    %464 = vector.broadcast %463 : vector<32x1xf32> to vector<32x32xf32>
    %465 = arith.subf %423, %464 : vector<32x32xf32>
    %466 = vector.broadcast %463 : vector<32x1xf32> to vector<32x32xf32>
    %467 = arith.subf %423, %466 : vector<32x32xf32>
    %468 = arith.mulf %465, %467 : vector<32x32xf32>
    %cst_104 = arith.constant dense<0.000000e+00> : vector<32xf32>
    %469 = vector.multi_reduction <add>, %468, %cst_104 [1] : vector<32x32xf32> to vector<32xf32>
    %470 = vector.shape_cast %469 : vector<32xf32> to vector<32x1xf32>
    %cst_105 = arith.constant 3.200000e+01 : f32
    %471 = vector.broadcast %cst_105 : f32 to vector<32x1xf32>
    %472 = arith.divf %470, %471 : vector<32x1xf32>
    %473 = vector.broadcast %463 : vector<32x1xf32> to vector<32x32xf32>
    %474 = arith.subf %423, %473 : vector<32x32xf32>
    %cst_106 = arith.constant 9.99999974E-6 : f32
    %475 = vector.broadcast %cst_106 : f32 to vector<32x1xf32>
    %476 = arith.addf %472, %475 : vector<32x1xf32>
    %477 = math.rsqrt %476 : vector<32x1xf32>
    %478 = vector.broadcast %477 : vector<32x1xf32> to vector<32x32xf32>
    %479 = arith.mulf %474, %478 : vector<32x32xf32>
    %480 = vector.broadcast %426 : vector<1x32xf32> to vector<32x32xf32>
    %481 = arith.mulf %479, %480 : vector<32x32xf32>
    %482 = vector.broadcast %427 : vector<1x32xf32> to vector<32x32xf32>
    %483 = arith.addf %481, %482 : vector<32x32xf32>
    %484 = arith.truncf %483 : vector<32x32xf32> to vector<32x32xbf16>
    %cst_107 = arith.constant dense<0.000000e+00> : vector<32x32xf32>
    %485 = tpu.matmul %459, %17, %cst_107 {dimension_numbers = #tpu.dot_dimension_numbers<[1], [0], [0], [1], [0, 0, 1, 1], [], []>} : vector<32x32xbf16>, vector<32x32xbf16>, vector<32x32xf32> -> vector<32x32xf32>
    %486 = vector.broadcast %428 : vector<1x32xf32> to vector<32x32xf32>
    %487 = arith.addf %485, %486 : vector<32x32xf32>
    %cst_108 = arith.constant dense<0.000000e+00> : vector<32x64xf32>
    %488 = tpu.matmul %484, %18, %cst_108 {dimension_numbers = #tpu.dot_dimension_numbers<[1], [0], [0], [1], [0, 0, 1, 1], [], []>} : vector<32x32xbf16>, vector<32x64xbf16>, vector<32x64xf32> -> vector<32x64xf32>
    %489 = vector.broadcast %429 : vector<1x64xf32> to vector<32x64xf32>
    %490 = arith.addf %488, %489 : vector<32x64xf32>
    %491 = vector.extract_strided_slice %487 {offsets = [0, 0], sizes = [32, 8], strides = [1, 1]} : vector<32x32xf32> to vector<32x8xf32>
    %492 = vector.extract_strided_slice %487 {offsets = [0, 8], sizes = [32, 8], strides = [1, 1]} : vector<32x32xf32> to vector<32x8xf32>
    %493 = vector.extract_strided_slice %487 {offsets = [0, 16], sizes = [32, 8], strides = [1, 1]} : vector<32x32xf32> to vector<32x8xf32>
    %494 = vector.extract_strided_slice %487 {offsets = [0, 24], sizes = [32, 8], strides = [1, 1]} : vector<32x32xf32> to vector<32x8xf32>
    %495 = vector.shape_cast %491 : vector<32x8xf32> to vector<1x32x8xf32>
    %496 = vector.shape_cast %492 : vector<32x8xf32> to vector<1x32x8xf32>
    %497 = vector.shape_cast %493 : vector<32x8xf32> to vector<1x32x8xf32>
    %498 = vector.shape_cast %494 : vector<32x8xf32> to vector<1x32x8xf32>
    %499 = tpu.concatenate %495, %496, %497, %498 in 0 : vector<1x32x8xf32>, vector<1x32x8xf32>, vector<1x32x8xf32>, vector<1x32x8xf32> -> vector<4x32x8xf32>
    %500 = arith.truncf %499 : vector<4x32x8xf32> to vector<4x32x8xbf16>
    %501 = vector.extract_strided_slice %490 {offsets = [0, 0], sizes = [32, 32], strides = [1, 1]} : vector<32x64xf32> to vector<32x32xf32>
    %502 = vector.extract_strided_slice %501 {offsets = [0, 0], sizes = [32, 8], strides = [1, 1]} : vector<32x32xf32> to vector<32x8xf32>
    %503 = vector.extract_strided_slice %501 {offsets = [0, 8], sizes = [32, 8], strides = [1, 1]} : vector<32x32xf32> to vector<32x8xf32>
    %504 = vector.extract_strided_slice %501 {offsets = [0, 16], sizes = [32, 8], strides = [1, 1]} : vector<32x32xf32> to vector<32x8xf32>
    %505 = vector.extract_strided_slice %501 {offsets = [0, 24], sizes = [32, 8], strides = [1, 1]} : vector<32x32xf32> to vector<32x8xf32>
    %506 = vector.shape_cast %502 : vector<32x8xf32> to vector<1x32x8xf32>
    %507 = vector.shape_cast %503 : vector<32x8xf32> to vector<1x32x8xf32>
    %508 = vector.shape_cast %504 : vector<32x8xf32> to vector<1x32x8xf32>
    %509 = vector.shape_cast %505 : vector<32x8xf32> to vector<1x32x8xf32>
    %510 = tpu.concatenate %506, %507, %508, %509 in 0 : vector<1x32x8xf32>, vector<1x32x8xf32>, vector<1x32x8xf32>, vector<1x32x8xf32> -> vector<4x32x8xf32>
    %511 = arith.truncf %510 : vector<4x32x8xf32> to vector<4x32x8xbf16>
    %512 = vector.extract_strided_slice %490 {offsets = [0, 32], sizes = [32, 32], strides = [1, 1]} : vector<32x64xf32> to vector<32x32xf32>
    %513 = vector.extract_strided_slice %512 {offsets = [0, 0], sizes = [32, 8], strides = [1, 1]} : vector<32x32xf32> to vector<32x8xf32>
    %514 = vector.extract_strided_slice %512 {offsets = [0, 8], sizes = [32, 8], strides = [1, 1]} : vector<32x32xf32> to vector<32x8xf32>
    %515 = vector.extract_strided_slice %512 {offsets = [0, 16], sizes = [32, 8], strides = [1, 1]} : vector<32x32xf32> to vector<32x8xf32>
    %516 = vector.extract_strided_slice %512 {offsets = [0, 24], sizes = [32, 8], strides = [1, 1]} : vector<32x32xf32> to vector<32x8xf32>
    %517 = vector.shape_cast %513 : vector<32x8xf32> to vector<1x32x8xf32>
    %518 = vector.shape_cast %514 : vector<32x8xf32> to vector<1x32x8xf32>
    %519 = vector.shape_cast %515 : vector<32x8xf32> to vector<1x32x8xf32>
    %520 = vector.shape_cast %516 : vector<32x8xf32> to vector<1x32x8xf32>
    %521 = tpu.concatenate %517, %518, %519, %520 in 0 : vector<1x32x8xf32>, vector<1x32x8xf32>, vector<1x32x8xf32>, vector<1x32x8xf32> -> vector<4x32x8xf32>
    %522 = arith.truncf %521 : vector<4x32x8xf32> to vector<4x32x8xbf16>
    %523 = vector.extract_strided_slice %500 {offsets = [0, 0, 0], sizes = [4, 16, 8], strides = [1, 1, 1]} : vector<4x32x8xbf16> to vector<4x16x8xbf16>
    %524 = vector.extract_strided_slice %511 {offsets = [0, 0, 0], sizes = [4, 16, 8], strides = [1, 1, 1]} : vector<4x32x8xbf16> to vector<4x16x8xbf16>
    %525 = vector.extract_strided_slice %522 {offsets = [0, 0, 0], sizes = [4, 16, 8], strides = [1, 1, 1]} : vector<4x32x8xbf16> to vector<4x16x8xbf16>
    "tpu.trace_start"() <{level = 10 : i32, message = "hld,hsd->hls"}> : () -> ()
    %cst_109 = arith.constant dense<0.000000e+00> : vector<4x16x16xf32>
    %526 = tpu.matmul %523, %524, %cst_109 {dimension_numbers = #tpu.dot_dimension_numbers<[2], [2], [1], [1], [0, 0, 0, 1, 1, 1], [0], [0]>} : vector<4x16x8xbf16>, vector<4x16x8xbf16>, vector<4x16x16xf32> -> vector<4x16x16xf32>
    "tpu.trace_stop"() : () -> ()
    %cst_110 = arith.constant dense<0xFF800000> : vector<4x16xf32>
    %527 = vector.multi_reduction <maximumf>, %526, %cst_110 [2] : vector<4x16x16xf32> to vector<4x16xf32>
    %528 = vector.shape_cast %527 : vector<4x16xf32> to vector<4x16x1xf32>
    %529 = vector.broadcast %528 : vector<4x16x1xf32> to vector<4x16x16xf32>
    %530 = arith.subf %526, %529 : vector<4x16x16xf32>
    %531 = math.exp %530 : vector<4x16x16xf32>
    %cst_111 = arith.constant dense<0.000000e+00> : vector<4x16xf32>
    %532 = vector.multi_reduction <add>, %531, %cst_111 [2] : vector<4x16x16xf32> to vector<4x16xf32>
    %533 = vector.shape_cast %532 : vector<4x16xf32> to vector<4x16x1xf32>
    %534 = tpu.reciprocal %533 {approx = true} : vector<4x16x1xf32> -> vector<4x16x1xf32>
    %535 = vector.broadcast %534 : vector<4x16x1xf32> to vector<4x16x16xf32>
    %536 = arith.mulf %531, %535 : vector<4x16x16xf32>
    %537 = arith.truncf %536 : vector<4x16x16xf32> to vector<4x16x16xbf16>
    "tpu.trace_start"() <{level = 10 : i32, message = "hls,hsd->hld"}> : () -> ()
    %cst_112 = arith.constant dense<0.000000e+00> : vector<4x16x8xf32>
    %538 = tpu.matmul %537, %525, %cst_112 {dimension_numbers = #tpu.dot_dimension_numbers<[2], [1], [1], [2], [0, 0, 0, 1, 1, 2], [0], [0]>} : vector<4x16x16xbf16>, vector<4x16x8xbf16>, vector<4x16x8xf32> -> vector<4x16x8xf32>
    "tpu.trace_stop"() : () -> ()
    %539 = vector.extract_strided_slice %538 {offsets = [0, 0, 0], sizes = [1, 16, 8], strides = [1, 1, 1]} : vector<4x16x8xf32> to vector<1x16x8xf32>
    %540 = vector.shape_cast %539 : vector<1x16x8xf32> to vector<16x8xf32>
    %541 = vector.extract_strided_slice %538 {offsets = [1, 0, 0], sizes = [1, 16, 8], strides = [1, 1, 1]} : vector<4x16x8xf32> to vector<1x16x8xf32>
    %542 = vector.shape_cast %541 : vector<1x16x8xf32> to vector<16x8xf32>
    %543 = vector.extract_strided_slice %538 {offsets = [2, 0, 0], sizes = [1, 16, 8], strides = [1, 1, 1]} : vector<4x16x8xf32> to vector<1x16x8xf32>
    %544 = vector.shape_cast %543 : vector<1x16x8xf32> to vector<16x8xf32>
    %545 = vector.extract_strided_slice %538 {offsets = [3, 0, 0], sizes = [1, 16, 8], strides = [1, 1, 1]} : vector<4x16x8xf32> to vector<1x16x8xf32>
    %546 = vector.shape_cast %545 : vector<1x16x8xf32> to vector<16x8xf32>
    %547 = tpu.concatenate %540, %542, %544, %546 in 1 : vector<16x8xf32>, vector<16x8xf32>, vector<16x8xf32>, vector<16x8xf32> -> vector<16x32xf32>
    %548 = vector.extract_strided_slice %500 {offsets = [0, 16, 0], sizes = [4, 16, 8], strides = [1, 1, 1]} : vector<4x32x8xbf16> to vector<4x16x8xbf16>
    %549 = vector.extract_strided_slice %511 {offsets = [0, 16, 0], sizes = [4, 16, 8], strides = [1, 1, 1]} : vector<4x32x8xbf16> to vector<4x16x8xbf16>
    %550 = vector.extract_strided_slice %522 {offsets = [0, 16, 0], sizes = [4, 16, 8], strides = [1, 1, 1]} : vector<4x32x8xbf16> to vector<4x16x8xbf16>
    "tpu.trace_start"() <{level = 10 : i32, message = "hld,hsd->hls"}> : () -> ()
    %cst_113 = arith.constant dense<0.000000e+00> : vector<4x16x16xf32>
    %551 = tpu.matmul %548, %549, %cst_113 {dimension_numbers = #tpu.dot_dimension_numbers<[2], [2], [1], [1], [0, 0, 0, 1, 1, 1], [0], [0]>} : vector<4x16x8xbf16>, vector<4x16x8xbf16>, vector<4x16x16xf32> -> vector<4x16x16xf32>
    "tpu.trace_stop"() : () -> ()
    %cst_114 = arith.constant dense<0xFF800000> : vector<4x16xf32>
    %552 = vector.multi_reduction <maximumf>, %551, %cst_114 [2] : vector<4x16x16xf32> to vector<4x16xf32>
    %553 = vector.shape_cast %552 : vector<4x16xf32> to vector<4x16x1xf32>
    %554 = vector.broadcast %553 : vector<4x16x1xf32> to vector<4x16x16xf32>
    %555 = arith.subf %551, %554 : vector<4x16x16xf32>
    %556 = math.exp %555 : vector<4x16x16xf32>
    %cst_115 = arith.constant dense<0.000000e+00> : vector<4x16xf32>
    %557 = vector.multi_reduction <add>, %556, %cst_115 [2] : vector<4x16x16xf32> to vector<4x16xf32>
    %558 = vector.shape_cast %557 : vector<4x16xf32> to vector<4x16x1xf32>
    %559 = tpu.reciprocal %558 {approx = true} : vector<4x16x1xf32> -> vector<4x16x1xf32>
    %560 = vector.broadcast %559 : vector<4x16x1xf32> to vector<4x16x16xf32>
    %561 = arith.mulf %556, %560 : vector<4x16x16xf32>
    %562 = arith.truncf %561 : vector<4x16x16xf32> to vector<4x16x16xbf16>
    "tpu.trace_start"() <{level = 10 : i32, message = "hls,hsd->hld"}> : () -> ()
    %cst_116 = arith.constant dense<0.000000e+00> : vector<4x16x8xf32>
    %563 = tpu.matmul %562, %550, %cst_116 {dimension_numbers = #tpu.dot_dimension_numbers<[2], [1], [1], [2], [0, 0, 0, 1, 1, 2], [0], [0]>} : vector<4x16x16xbf16>, vector<4x16x8xbf16>, vector<4x16x8xf32> -> vector<4x16x8xf32>
    "tpu.trace_stop"() : () -> ()
    %564 = vector.extract_strided_slice %563 {offsets = [0, 0, 0], sizes = [1, 16, 8], strides = [1, 1, 1]} : vector<4x16x8xf32> to vector<1x16x8xf32>
    %565 = vector.shape_cast %564 : vector<1x16x8xf32> to vector<16x8xf32>
    %566 = vector.extract_strided_slice %563 {offsets = [1, 0, 0], sizes = [1, 16, 8], strides = [1, 1, 1]} : vector<4x16x8xf32> to vector<1x16x8xf32>
    %567 = vector.shape_cast %566 : vector<1x16x8xf32> to vector<16x8xf32>
    %568 = vector.extract_strided_slice %563 {offsets = [2, 0, 0], sizes = [1, 16, 8], strides = [1, 1, 1]} : vector<4x16x8xf32> to vector<1x16x8xf32>
    %569 = vector.shape_cast %568 : vector<1x16x8xf32> to vector<16x8xf32>
    %570 = vector.extract_strided_slice %563 {offsets = [3, 0, 0], sizes = [1, 16, 8], strides = [1, 1, 1]} : vector<4x16x8xf32> to vector<1x16x8xf32>
    %571 = vector.shape_cast %570 : vector<1x16x8xf32> to vector<16x8xf32>
    %572 = tpu.concatenate %565, %567, %569, %571 in 1 : vector<16x8xf32>, vector<16x8xf32>, vector<16x8xf32>, vector<16x8xf32> -> vector<16x32xf32>
    %573 = tpu.concatenate %547, %572 in 0 : vector<16x32xf32>, vector<16x32xf32> -> vector<32x32xf32>
    %574 = arith.truncf %573 : vector<32x32xf32> to vector<32x32xbf16>
    %cst_117 = arith.constant dense<0.000000e+00> : vector<32x32xf32>
    %575 = tpu.matmul %574, %19, %cst_117 {dimension_numbers = #tpu.dot_dimension_numbers<[1], [0], [0], [1], [0, 0, 1, 1], [], []>} : vector<32x32xbf16>, vector<32x32xbf16>, vector<32x32xf32> -> vector<32x32xf32>
    %576 = arith.addf %423, %575 : vector<32x32xf32>
    %577 = vector.broadcast %430 : vector<1x32xf32> to vector<32x32xf32>
    %578 = arith.addf %576, %577 : vector<32x32xf32>
    %cst_118 = arith.constant dense<0.000000e+00> : vector<32xf32>
    %579 = vector.multi_reduction <add>, %578, %cst_118 [1] : vector<32x32xf32> to vector<32xf32>
    %580 = vector.shape_cast %579 : vector<32xf32> to vector<32x1xf32>
    %cst_119 = arith.constant 3.200000e+01 : f32
    %581 = vector.broadcast %cst_119 : f32 to vector<32x1xf32>
    %582 = arith.divf %580, %581 : vector<32x1xf32>
    %583 = vector.broadcast %582 : vector<32x1xf32> to vector<32x32xf32>
    %584 = arith.subf %578, %583 : vector<32x32xf32>
    %585 = vector.broadcast %582 : vector<32x1xf32> to vector<32x32xf32>
    %586 = arith.subf %578, %585 : vector<32x32xf32>
    %587 = arith.mulf %584, %586 : vector<32x32xf32>
    %cst_120 = arith.constant dense<0.000000e+00> : vector<32xf32>
    %588 = vector.multi_reduction <add>, %587, %cst_120 [1] : vector<32x32xf32> to vector<32xf32>
    %589 = vector.shape_cast %588 : vector<32xf32> to vector<32x1xf32>
    %cst_121 = arith.constant 3.200000e+01 : f32
    %590 = vector.broadcast %cst_121 : f32 to vector<32x1xf32>
    %591 = arith.divf %589, %590 : vector<32x1xf32>
    %592 = vector.broadcast %582 : vector<32x1xf32> to vector<32x32xf32>
    %593 = arith.subf %578, %592 : vector<32x32xf32>
    %cst_122 = arith.constant 9.99999974E-6 : f32
    %594 = vector.broadcast %cst_122 : f32 to vector<32x1xf32>
    %595 = arith.addf %591, %594 : vector<32x1xf32>
    %596 = math.rsqrt %595 : vector<32x1xf32>
    %597 = vector.broadcast %596 : vector<32x1xf32> to vector<32x32xf32>
    %598 = arith.mulf %593, %597 : vector<32x32xf32>
    %599 = vector.broadcast %431 : vector<1x32xf32> to vector<32x32xf32>
    %600 = arith.mulf %598, %599 : vector<32x32xf32>
    %601 = vector.broadcast %432 : vector<1x32xf32> to vector<32x32xf32>
    %602 = arith.addf %600, %601 : vector<32x32xf32>
    %603 = arith.truncf %602 : vector<32x32xf32> to vector<32x32xbf16>
    %cst_123 = arith.constant dense<0.000000e+00> : vector<32x128xf32>
    %604 = tpu.matmul %603, %20, %cst_123 {dimension_numbers = #tpu.dot_dimension_numbers<[1], [0], [0], [1], [0, 0, 1, 1], [], []>} : vector<32x32xbf16>, vector<32x128xbf16>, vector<32x128xf32> -> vector<32x128xf32>
    %605 = vector.broadcast %433 : vector<1x128xf32> to vector<32x128xf32>
    %606 = arith.addf %604, %605 : vector<32x128xf32>
    %cst_124 = arith.constant 5.000000e-01 : f32
    %607 = vector.broadcast %cst_124 : f32 to vector<32x128xf32>
    %608 = arith.mulf %607, %606 : vector<32x128xf32>
    %cst_125 = arith.constant 4.471500e-02 : f32
    %609 = vector.broadcast %cst_125 : f32 to vector<32x128xf32>
    %610 = arith.mulf %609, %606 : vector<32x128xf32>
    %611 = arith.mulf %610, %606 : vector<32x128xf32>
    %612 = arith.mulf %611, %606 : vector<32x128xf32>
    %613 = arith.addf %606, %612 : vector<32x128xf32>
    %cst_126 = arith.constant 0.797884583 : f32
    %614 = vector.broadcast %cst_126 : f32 to vector<32x128xf32>
    %615 = arith.mulf %614, %613 : vector<32x128xf32>
    %616 = math.tanh %615 : vector<32x128xf32>
    %cst_127 = arith.constant 1.000000e+00 : f32
    %617 = vector.broadcast %cst_127 : f32 to vector<32x128xf32>
    %618 = arith.addf %617, %616 : vector<32x128xf32>
    %619 = arith.mulf %608, %618 : vector<32x128xf32>
    %620 = arith.truncf %619 : vector<32x128xf32> to vector<32x128xbf16>
    %cst_128 = arith.constant dense<0.000000e+00> : vector<32x32xf32>
    %621 = tpu.matmul %620, %21, %cst_128 {dimension_numbers = #tpu.dot_dimension_numbers<[1], [0], [0], [1], [0, 0, 1, 1], [], []>} : vector<32x128xbf16>, vector<128x32xbf16>, vector<32x32xf32> -> vector<32x32xf32>
    %622 = arith.addf %578, %621 : vector<32x32xf32>
    %623 = vector.broadcast %434 : vector<1x32xf32> to vector<32x32xf32>
    %624 = arith.addf %622, %623 : vector<32x32xf32>
    %625 = vector.extract_strided_slice %624 {offsets = [0, 0], sizes = [16, 32], strides = [1, 1]} : vector<32x32xf32> to vector<16x32xf32>
    %c0_129 = arith.constant 0 : index
    %c0_130 = arith.constant 0 : index
    %c0_131 = arith.constant 0 : index
    %626 = vector.load %arg15[%c0_129, %c0_130, %c0_131] : memref<2x16x32xf32, #tpu.memory_space<vmem>>, vector<1x16x32xf32>
    %627 = vector.shape_cast %626 : vector<1x16x32xf32> to vector<16x32xf32>
    %628 = vector.shape_cast %625 : vector<16x32xf32> to vector<1x16x32xf32>
    tpu.vector_store %arg15[%c0_129, %c0_130, %c0_131], %628 {strides = array<i32>} : memref<2x16x32xf32, #tpu.memory_space<vmem>>, vector<1x16x32xf32>,
    %629 = vector.extract_strided_slice %624 {offsets = [16, 0], sizes = [16, 32], strides = [1, 1]} : vector<32x32xf32> to vector<16x32xf32>
    %c1_132 = arith.constant 1 : index
    %c0_133 = arith.constant 0 : index
    %c0_134 = arith.constant 0 : index
    %630 = vector.load %arg15[%c1_132, %c0_133, %c0_134] : memref<2x16x32xf32, #tpu.memory_space<vmem>>, vector<1x16x32xf32>
    %631 = vector.shape_cast %630 : vector<1x16x32xf32> to vector<16x32xf32>
    %632 = vector.shape_cast %629 : vector<16x32xf32> to vector<1x16x32xf32>
    tpu.vector_store %arg15[%c1_132, %c0_133, %c0_134], %632 {strides = array<i32>} : memref<2x16x32xf32, #tpu.memory_space<vmem>>, vector<1x16x32xf32>,
    return
  }
  func.func @transform_0(%arg0: i32) -> (i32, i32, i32) {
    %c0_i32 = arith.constant 0 : i32
    %c0_i32_0 = arith.constant 0 : i32
    %c0_i32_1 = arith.constant 0 : i32
    %c0_i32_2 = arith.constant 0 : i32
    return %c0_i32, %c0_i32_0, %c0_i32_1 : i32, i32, i32
  }
  func.func @transform_1(%arg0: i32) -> (i32, i32, i32) {
    %c0_i32 = arith.constant 0 : i32
    %c0_i32_0 = arith.constant 0 : i32
    %c0_i32_1 = arith.constant 0 : i32
    %c0_i32_2 = arith.constant 0 : i32
    return %c0_i32, %c0_i32_0, %c0_i32_1 : i32, i32, i32
  }
  func.func @transform_2(%arg0: i32) -> (i32, i32) {
    %c0_i32 = arith.constant 0 : i32
    %c0_i32_0 = arith.constant 0 : i32
    %c0_i32_1 = arith.constant 0 : i32
    return %c0_i32, %c0_i32_0 : i32, i32
  }
  func.func @transform_3(%arg0: i32) -> (i32, i32) {
    %c0_i32 = arith.constant 0 : i32
    %c0_i32_0 = arith.constant 0 : i32
    %c0_i32_1 = arith.constant 0 : i32
    return %c0_i32, %c0_i32_0 : i32, i32
  }
  func.func @transform_4(%arg0: i32) -> (i32, i32) {
    %c0_i32 = arith.constant 0 : i32
    %c0_i32_0 = arith.constant 0 : i32
    %c0_i32_1 = arith.constant 0 : i32
    return %c0_i32, %c0_i32_0 : i32, i32
  }
  func.func @transform_5(%arg0: i32) -> (i32, i32) {
    %c0_i32 = arith.constant 0 : i32
    %c0_i32_0 = arith.constant 0 : i32
    %c0_i32_1 = arith.constant 0 : i32
    return %c0_i32, %c0_i32_0 : i32, i32
  }
  func.func @transform_6(%arg0: i32) -> (i32, i32) {
    %c0_i32 = arith.constant 0 : i32
    %c0_i32_0 = arith.constant 0 : i32
    %c0_i32_1 = arith.constant 0 : i32
    return %c0_i32, %c0_i32_0 : i32, i32
  }
  func.func @transform_7(%arg0: i32) -> (i32, i32) {
    %c0_i32 = arith.constant 0 : i32
    %c0_i32_0 = arith.constant 0 : i32
    %c0_i32_1 = arith.constant 0 : i32
    return %c0_i32, %c0_i32_0 : i32, i32
  }
  func.func @transform_8(%arg0: i32) -> (i32, i32) {
    %c0_i32 = arith.constant 0 : i32
    %c0_i32_0 = arith.constant 0 : i32
    %c0_i32_1 = arith.constant 0 : i32
    return %c0_i32, %c0_i32_0 : i32, i32
  }
  func.func @transform_9(%arg0: i32) -> (i32, i32) {
    %c0_i32 = arith.constant 0 : i32
    %c0_i32_0 = arith.constant 0 : i32
    %c0_i32_1 = arith.constant 0 : i32
    return %c0_i32, %c0_i32_0 : i32, i32
  }
  func.func @transform_10(%arg0: i32) -> (i32, i32) {
    %c0_i32 = arith.constant 0 : i32
    %c0_i32_0 = arith.constant 0 : i32
    %c0_i32_1 = arith.constant 0 : i32
    return %c0_i32, %c0_i32_0 : i32, i32
  }
  func.func @transform_11(%arg0: i32) -> (i32, i32) {
    %c0_i32 = arith.constant 0 : i32
    %c0_i32_0 = arith.constant 0 : i32
    %c0_i32_1 = arith.constant 0 : i32
    return %c0_i32, %c0_i32_0 : i32, i32
  }
  func.func @transform_12(%arg0: i32) -> (i32, i32) {
    %c0_i32 = arith.constant 0 : i32
    %c0_i32_0 = arith.constant 0 : i32
    %c0_i32_1 = arith.constant 0 : i32
    return %c0_i32, %c0_i32_0 : i32, i32
  }
  func.func @transform_13(%arg0: i32) -> (i32, i32) {
    %c0_i32 = arith.constant 0 : i32
    %c0_i32_0 = arith.constant 0 : i32
    %c0_i32_1 = arith.constant 0 : i32
    return %c0_i32, %c0_i32_0 : i32, i32
  }
  func.func @transform_14(%arg0: i32) -> (i32, i32, i32) {
    %c0_i32 = arith.constant 0 : i32
    %c0_i32_0 = arith.constant 0 : i32
    %c0_i32_1 = arith.constant 0 : i32
    %c0_i32_2 = arith.constant 0 : i32
    return %c0_i32, %c0_i32_0, %c0_i32_1 : i32, i32, i32
  }
}

</mosaic_0001>

<bundles_post_ra>
// kernel: tpu_custom_call.1
= control target key start
LH: loop header
LB: loop body
LE: loop exit
PB: predicated region body
PF: predicated region fallthrough
CT: control target
= control target key end

     0   :  { %vm139_vm0 = vcmask 261120   ;;  %s9294_s0 = inlined_call_operand.vmem [shape: f32[2,16,32], index: 0, kind: input, shape index: {}]   ;;  %s9295_s1 = inlined_call_operand.vmem [shape: f32[2,64,32], index: 1, kind: input, shape index: {}]   ;;  %s9296_s2 = inlined_call_operand.vmem [shape: f32[16,128], index: 2, kind: input, shape index: {}]   ;;  %s9297_s3 = inlined_call_operand.vmem [shape: bf16[32,32], index: 3, kind: input, shape index: {}]   ;;  %s9298_s4 = inlined_call_operand.vmem [shape: bf16[32,64], index: 4, kind: input, shape index: {}]   ;;  %s9299_s5 = inlined_call_operand.vmem [shape: bf16[32,32], index: 5, kind: input, shape index: {}]   ;;  %s9300_s6 = inlined_call_operand.vmem [shape: bf16[32,128], index: 6, kind: input, shape index: {}]   ;;  %s9301_s7 = inlined_call_operand.vmem [shape: bf16[128,32], index: 7, kind: input, shape index: {}]   ;;  %s9302_s8 = inlined_call_operand.vmem [shape: f32[16,128], index: 8, kind: input, shape index: {}]   ;;  %s9303_s9 = inlined_call_operand.vmem [shape: bf16[32,32], index: 9, kind: input, shape index: {}]   ;;  %s9304_s10 = inlined_call_operand.vmem [shape: bf16[32,64], index: 10, kind: input, shape index: {}]   ;;  %s9305_s11 = inlined_call_operand.vmem [shape: bf16[32,32], index: 11, kind: input, shape index: {}]   ;;  %s9306_s12 = inlined_call_operand.vmem [shape: bf16[32,128], index: 12, kind: input, shape index: {}]   ;;  %s9307_s13 = inlined_call_operand.vmem [shape: bf16[128,32], index: 13, kind: input, shape index: {}]   ;;  %s9308_s14 = inlined_call_operand.hbm [shape: f32[2,16,32], index: 14, kind: output, shape index: {}]  }
   0x1   :  { %v54_v0 = vld [vmem:[%s9295_s1] sm:$0xff]  ;;  %v56_v1 = vld [vmem:[%s9295_s1 + $0x10] sm:$0xff]  ;;  %v55_v2 = vld [vmem:[%s9295_s1 + $0x8] sm:$0xff] }
   0x2   :  { %v211_v3 = vsel %vm139_vm0, %v54_v0, 0.0  ;;  %v217_v4 = vsel %vm139_vm0, %v56_v1, 0.0  ;;  %v57_v5 = vld [vmem:[%s9295_s1 + $0x18] sm:$0xff]  ;;  %v58_v6 = vld [vmem:[%s9295_s1 + $0x20] sm:$0xff]  ;;  %v59_v7 = vld [vmem:[%s9295_s1 + $0x28] sm:$0xff]  ;;  %v214_v8 = vsel %vm139_vm0, %v55_v2, 0.0 }
   0x3   :  { %212 = vadd.xlane.f32.xlu0 %v211_v3  ;;  %218 = vadd.xlane.f32.xlu1 %v217_v4  ;;  %v220_v9 = vsel %vm139_vm0, %v57_v5, 0.0  ;;  %v223_v10 = vsel %vm139_vm0, %v58_v6, 0.0  ;;  %v60_v11 = vld [vmem:[%s9295_s1 + $0x30] sm:$0xff]  ;;  %v61_v12 = vld [vmem:[%s9295_s1 + $0x38] sm:$0xff]  ;;  %v7500_v13 = vld [vmem:[%s9294_s0] sm:$0xff]  ;;  %v226_v14 = vsel %vm139_vm0, %v59_v7, 0.0 }
   0x4   :  { %v229_v15 = vsel %vm139_vm0, %v60_v11, 0.0  ;;  %v232_v16 = vsel %vm139_vm0, %v61_v12, 0.0  ;;  %v7508_v17 = vld [vmem:[%s9294_s0 + $0x8] sm:$0xff]  ;;  %v7513_v18 = vld [vmem:[%s9294_s0 + $0x10] sm:$0xff]  ;;  %v7518_v19 = vld [vmem:[%s9294_s0 + $0x18] sm:$0xff]  ;;  %v140_v20 = vsel %vm139_vm0, %v7500_v13, 0.0 }
   0x5   :  { %v143_v21 = vsel %vm139_vm0, %v7508_v17, 0.0  ;;  %v146_v22 = vsel %vm139_vm0, %v7513_v18, 0.0  ;;  %v149_v23 = vsel %vm139_vm0, %v7518_v19, 0.0 }
   0x7   :  { %215 = vadd.xlane.f32.xlu0 %v214_v8  ;;  %221 = vadd.xlane.f32.xlu1 %v220_v9 }
   0xb   :  { %224 = vadd.xlane.f32.xlu0 %v223_v10  ;;  %227 = vadd.xlane.f32.xlu1 %v226_v14 }
   0xf   :  { %230 = vadd.xlane.f32.xlu0 %v229_v15  ;;  %233 = vadd.xlane.f32.xlu1 %v232_v16 }
  0x13   :  { %141 = vadd.xlane.f32.xlu0 %v140_v20  ;;  %144 = vadd.xlane.f32.xlu1 %v143_v21 }
  0x17   :  { %147 = vadd.xlane.f32.xlu0 %v146_v22  ;;  %150 = vadd.xlane.f32.xlu1 %v149_v23 }
  0x18   :  { %19 = vsyncpa [#allocation3], 0  ;;  %v7602_v22 = vld [vmem:[%s9295_s1 + $0x48] sm:$0xff]  ;;  %v7607_v23 = vld [vmem:[%s9295_s1 + $0x50] sm:$0xff]  ;;  %vm7383_vm1 = vmmov 0   ;;  %vm915_vm2 = vcmask 64512  }
  0x19   :  { %s7384_s28 = smov 120   ;;  %s7385_s29 = smov 112   ;;  %vm1140_vm3 = vcmask 523264   ;;  %vm1499_vm4 = vcmask 130048   ;;  %vm1502_vm5 = vcmask 195584  }
  0x1a   :  { %s7386_s30 = smov 104   ;;  %s7387_s15 = smov 96  }
  0x1b   :  { %s7388_s16 = smov 8   ;;  %s7389_s17 = smov 16  }
  0x1c   :  { %s7390_s18 = smov 24  }
  0x8c   :  { %v213_v24 = vpop.xlane.xlu0 %212  ;;  %v219_v25 = vpop.xlane.xlu1 %218 }
  0x8d   :  { %v259_v26 = vmul.f32 0.03125, %v213_v24  ;;  %v261_v27 = vmul.f32 0.03125, %v219_v25  ;;  %v238_v24 = vsel %vm139_vm0, %v7602_v22, 0.0  ;;  %v241_v25 = vsel %vm139_vm0, %v7607_v23, 0.0 }
  0x8f   :  { %v7528_v28 = vsub.f32 %v54_v0, %v259_v26  ;;  %v7530_v29 = vsub.f32 %v56_v1, %v261_v27  ;;  %v7616_v26 = vld [vmem:[%s9295_s1 + $0x58] sm:$0xff]  ;;  %v7621_v27 = vld [vmem:[%s9295_s1 + $0x60] sm:$0xff] }
  0x90   :  { %v216_v30 = vpop.xlane.xlu0 %215  ;;  %v222_v31 = vpop.xlane.xlu1 %221 }
  0x91   :  { %v260_v32 = vmul.f32 0.03125, %v216_v30  ;;  %v262_v33 = vmul.f32 0.03125, %v222_v31  ;;  %v291_v34 = vmul.f32 %v7528_v28, %v7528_v28  ;;  %v293_v35 = vmul.f32 %v7530_v29, %v7530_v29 }
  0x92   :  { %v244_v30 = vsel %vm139_vm0, %v7616_v26, 0.0  ;;  %v247_v31 = vsel %vm139_vm0, %v7621_v27, 0.0 }
  0x93   :  { %v7536_v36 = vsub.f32 %v55_v2, %v260_v32  ;;  %v7538_v37 = vsub.f32 %v57_v5, %v262_v33  ;;  %v307_v38 = vsel %vm139_vm0, %v291_v34, 0.0  ;;  %v313_v41 = vsel %vm139_vm0, %v293_v35, 0.0  ;;  %v7630_v32 = vld [vmem:[%s9295_s1 + $0x68] sm:$0xff]  ;;  %v7635_v33 = vld [vmem:[%s9295_s1 + $0x70] sm:$0xff] }
  0x94   :  { %v225_v39 = vpop.xlane.xlu0 %224  ;;  %308 = vadd.xlane.f32.xlu0 %v307_v38  ;;  %v228_v40 = vpop.xlane.xlu1 %227  ;;  %v250_v34 = vsel %vm139_vm0, %v7630_v32, 0.0  ;;  %v253_v35 = vsel %vm139_vm0, %v7635_v33, 0.0  ;;  %v7644_v38 = vld [vmem:[%s9295_s1 + $0x78] sm:$0xff] }
  0x95   :  { %v263_v42 = vmul.f32 0.03125, %v225_v39  ;;  %v264_v43 = vmul.f32 0.03125, %v228_v40  ;;  %v292_v44 = vmul.f32 %v7536_v36, %v7536_v36  ;;  %v294_v45 = vmul.f32 %v7538_v37, %v7538_v37  ;;  %v7010_v39 = vld [vmem:[%s9298_s4 + $0x8] sm:$0xff]  }
  0x96   :  { %v256_v40 = vsel %vm139_vm0, %v7644_v38, 0.0  ;;  %6095 = vmatprep.subr.bf16.mxu1 %v7010_v39 }
  0x97   :  { %v7546_v46 = vsub.f32 %v58_v6, %v263_v42  ;;  %v7548_v47 = vsub.f32 %v59_v7, %v264_v43  ;;  %v310_v48 = vsel %vm139_vm0, %v292_v44, 0.0  ;;  %v316_v51 = vsel %vm139_vm0, %v294_v45, 0.0  ;;  %6096 = vmatpush3.bf16.msra.mxu1 %v7010_v39  ;;  %v7012_v42 = vld [vmem:[%s9297_s3 + $0x8] sm:$0xff]   ;;  %v7013_v43 = vld [vmem:[%s9297_s3] sm:$0xff]  }
  0x98   :  { %v231_v49 = vpop.xlane.xlu0 %230  ;;  %311 = vadd.xlane.f32.xlu1 %v310_v48  ;;  %314 = vadd.xlane.f32.xlu0 %v313_v41  ;;  %v234_v50 = vpop.xlane.xlu1 %233  ;;  %v7011_v41 = vld [vmem:[%s9298_s4] sm:$0xff]  }
  0x99   :  { %v265_v52 = vmul.f32 0.03125, %v231_v49  ;;  %v266_v53 = vmul.f32 0.03125, %v234_v50  ;;  %v295_v54 = vmul.f32 %v7546_v46, %v7546_v46  ;;  %v296_v55 = vmul.f32 %v7548_v47, %v7548_v47  ;;  %6097 = vmatprep.subr.bf16.mxu1 %v7011_v41  ;;  %6087 = vmatprep.subr.bf16.mxu0 %v7012_v42 }
  0x9a   :  { %6088 = vmatpush3.bf16.msra.mxu0 %v7012_v42 }
  0x9b   :  { %v7556_v56 = vsub.f32 %v60_v11, %v265_v52  ;;  %v7558_v57 = vsub.f32 %v61_v12, %v266_v53  ;;  %v319_v58 = vsel %vm139_vm0, %v295_v54, 0.0  ;;  %v322_v60 = vsel %vm139_vm0, %v296_v55, 0.0  ;;  %6098 = vmatpush3.bf16.msra.mxu1 %v7011_v41  ;;  %6089 = vmatprep.subr.bf16.mxu0 %v7013_v43 }
  0x9c   :  { %317 = vadd.xlane.f32.xlu1 %v316_v51  ;;  %320 = vadd.xlane.f32.xlu0 %v319_v58  ;;  %v142_v59 = vpop.xlane.xlu0 %141  ;;  %v145_v61 = vpop.xlane.xlu1 %144  ;;  %v193_v53 = vlaneseq }
  0x9d   :  { %v153_v62 = vmul.f32 0.03125, %v142_v59  ;;  %v154_v63 = vmul.f32 0.03125, %v145_v61  ;;  %v297_v0 = vmul.f32 %v7556_v56, %v7556_v56  ;;  %v298_v1 = vmul.f32 %v7558_v57, %v7558_v57 }
  0x9e   :  { %6090 = vmatpush3.bf16.msra.mxu0 %v7013_v43 }
  0x9f   :  { %v7567_v2 = vsub.f32 %v7500_v13, %v153_v62  ;;  %v7570_v3 = vsub.f32 %v7508_v17, %v154_v63  ;;  %v325_v4 = vsel %vm139_vm0, %v297_v0, 0.0  ;;  %v328_v6 = vsel %vm139_vm0, %v298_v1, 0.0 }
  0xa0   :  { %323 = vadd.xlane.f32.xlu1 %v322_v60  ;;  %326 = vadd.xlane.f32.xlu0 %v325_v4  ;;  %v148_v5 = vpop.xlane.xlu0 %147  ;;  %v151_v7 = vpop.xlane.xlu1 %150  ;;  %v7660_v62 = vshrl.u32 %v193_v53, 7 }
  0xa1   :  { %v155_v8 = vmul.f32 0.03125, %v148_v5  ;;  %v156_v9 = vmul.f32 0.03125, %v151_v7  ;;  %v161_v10 = vmul.f32 %v7567_v2, %v7567_v2  ;;  %v162_v11 = vmul.f32 %v7570_v3, %v7570_v3 }
  0xa2   :  { %v7663_v7 = vsub.s32 2, %v7660_v62 }
  0xa3   :  { %v7579_v12 = vsub.f32 %v7513_v18, %v155_v8  ;;  %v7582_v13 = vsub.f32 %v7518_v19, %v156_v9  ;;  %v165_v14 = vsel %vm139_vm0, %v161_v10, 0.0  ;;  %v168_v15 = vsel %vm139_vm0, %v162_v11, 0.0  ;;  %v7593_v18 = vld [vmem:[%s9295_s1 + $0x40] sm:$0xff] }
  0xa4   :  { %329 = vadd.xlane.f32.xlu1 %v328_v6  ;;  %166 = vadd.xlane.f32.xlu0 %v165_v14  ;;  %v235_v21 = vsel %vm139_vm0, %v7593_v18, 0.0  ;;  %v7668_v10 = vld [vmem:[%s9296_s2] sm:$0xff] }
  0xa5   :  { %v163_v16 = vmul.f32 %v7579_v12, %v7579_v12  ;;  %v164_v17 = vmul.f32 %v7582_v13, %v7582_v13 }
  0xa7   :  { %v171_v19 = vsel %vm139_vm0, %v163_v16, 0.0  ;;  %v174_v20 = vsel %vm139_vm0, %v164_v17, 0.0 }
  0xa8   :  { %169 = vadd.xlane.f32.xlu1 %v168_v15  ;;  %172 = vadd.xlane.f32.xlu0 %v171_v19  ;;  %v7672_v19 = vrot.slane %v7668_v10, %v7663_v7 }
  0xac   :  { %175 = vadd.xlane.f32.xlu1 %v174_v20  ;;  %236 = vadd.xlane.f32.xlu0 %v235_v21  ;;  %v441_v20 = vsub.s32 3, %v7660_v62 }
  0xae   :  { %v7680_v41 = vrot.slane %v7668_v10, %v441_v20 }
  0xb0   :  { %239 = vadd.xlane.f32.xlu1 %v238_v24  ;;  %242 = vadd.xlane.f32.xlu0 %v241_v25 }
  0xb4   :  { %245 = vadd.xlane.f32.xlu1 %v244_v30  ;;  %248 = vadd.xlane.f32.xlu0 %v247_v31 }
  0xb8   :  { %251 = vadd.xlane.f32.xlu1 %v250_v34  ;;  %254 = vadd.xlane.f32.xlu0 %v253_v35 }
  0xbc   :  { %257 = vadd.xlane.f32.xlu1 %v256_v40 }
 0x11d   :  { %v309_v44 = vpop.xlane.xlu0 %308 }
 0x11e   :  { %v355_v45 = vmul.f32 0.03125, %v309_v44 }
 0x120   :  { %v371_v48 = vadd.f32 1e-05, %v355_v45 }
 0x121   :  { %v312_v49 = vpop.xlane.xlu1 %311  ;;  %v315_v50 = vpop.xlane.xlu0 %314 }
 0x122   :  { %7042 = vrsqrt.f32 %v371_v48  ;;  %v356_v51 = vmul.f32 0.03125, %v312_v49  ;;  %v357_v52 = vmul.f32 0.03125, %v315_v50 }
 0x124   :  { %v372_v54 = vadd.f32 1e-05, %v356_v51  ;;  %v373_v55 = vadd.f32 1e-05, %v357_v52 }
 0x125   :  { %v318_v58 = vpop.xlane.xlu1 %317  ;;  %v321_v59 = vpop.xlane.xlu0 %320 }
 0x126   :  { %7044 = vrsqrt.f32 %v372_v54  ;;  %v358_v60 = vmul.f32 0.03125, %v318_v58  ;;  %v359_v61 = vmul.f32 0.03125, %v321_v59  ;;  %v7688_v58 = vsub.s32 0, %v7660_v62 }
 0x127   :  { %7046 = vrsqrt.f32 %v373_v55 }
 0x128   :  { %v374_v63 = vadd.f32 1e-05, %v358_v60  ;;  %v375_v0 = vadd.f32 1e-05, %v359_v61 }
 0x129   :  { %v324_v1 = vpop.xlane.xlu1 %323  ;;  %v327_v4 = vpop.xlane.xlu0 %326 }
 0x12a   :  { %7048 = vrsqrt.f32 %v374_v63  ;;  %v360_v5 = vmul.f32 0.03125, %v324_v1  ;;  %v361_v6 = vmul.f32 0.03125, %v327_v4 }
 0x12b   :  { %7050 = vrsqrt.f32 %v375_v0 }
 0x12c   :  { %v376_v8 = vadd.f32 1e-05, %v360_v5  ;;  %v377_v9 = vadd.f32 1e-05, %v361_v6 }
 0x12d   :  { %v330_v11 = vpop.xlane.xlu1 %329  ;;  %v167_v14 = vpop.xlane.xlu0 %166 }
 0x12e   :  { %7052 = vrsqrt.f32 %v376_v8  ;;  %v362_v15 = vmul.f32 0.03125, %v330_v11  ;;  %v177_v16 = vmul.f32 0.03125, %v167_v14 }
 0x12f   :  { %v7043_v17 = vpop.eup %7042  ;;  %7054 = vrsqrt.f32 %v377_v9 }
 0x130   :  { %v378_v21 = vadd.f32 1e-05, %v362_v15  ;;  %v181_v24 = vadd.f32 1e-05, %v177_v16  ;;  %v403_v25 = vmul.f32 %v7043_v17, %v7528_v28 }
 0x131   :  { %v170_v30 = vpop.xlane.xlu1 %169  ;;  %v173_v31 = vpop.xlane.xlu0 %172 }
 0x132   :  { %7056 = vrsqrt.f32 %v378_v21  ;;  %v178_v34 = vmul.f32 0.03125, %v170_v30  ;;  %v179_v35 = vmul.f32 0.03125, %v173_v31  ;;  %v423_v40 = vmul.f32 %v7672_v19, %v403_v25 }
 0x133   :  { %v7045_v39 = vpop.eup %7044  ;;  %7058 = vrsqrt.f32 %v181_v24 }
 0x134   :  { %v7047_v42 = vpop.eup %7046  ;;  %v182_v43 = vadd.f32 1e-05, %v178_v34  ;;  %v183_v44 = vadd.f32 1e-05, %v179_v35  ;;  %v404_v45 = vmul.f32 %v7045_v39, %v7536_v36  ;;  %v443_v54 = vadd.f32 %v7680_v41, %v423_v40 }
 0x135   :  { %v176_v28 = vpop.xlane.xlu1 %175  ;;  %v237_v48 = vpop.xlane.xlu0 %236  ;;  %v405_v49 = vmul.f32 %v7047_v42, %v7530_v29  ;;  %v7717_v34 = vsub.s32 1, %v7660_v62 }
 0x136   :  { %7060 = vrsqrt.f32 %v182_v43  ;;  %v180_v50 = vmul.f32 0.03125, %v176_v28  ;;  %v424_v51 = vmul.f32 %v7672_v19, %v404_v45  ;;  %v267_v52 = vmul.f32 0.03125, %v237_v48 }
 0x137   :  { %v7049_v53 = vpop.eup %7048  ;;  %7062 = vrsqrt.f32 %v183_v44  ;;  %v425_v55 = vmul.f32 %v7672_v19, %v405_v49 }
 0x138   :  { %v7051_v59 = vpop.eup %7050  ;;  %v184_v36 = vadd.f32 1e-05, %v180_v50  ;;  %v444_v60 = vadd.f32 %v7680_v41, %v424_v51  ;;  %v7692_v29 = vsub.f32 %v7593_v18, %v267_v52  ;;  %v406_v61 = vmul.f32 %v7049_v53, %v7538_v37 }
 0x139   :  { %v240_v63 = vpop.xlane.xlu1 %239  ;;  %v243_v0 = vpop.xlane.xlu0 %242  ;;  %v407_v1 = vmul.f32 %v7051_v59, %v7546_v46  ;;  %v7702_v18 = vrot.slane %v7668_v10, %v7688_v58  ;;  %v445_v15 = vadd.f32 %v7680_v41, %v425_v55 }
 0x13a   :  { %7064 = vrsqrt.f32 %v184_v36  ;;  %v459_v4 = vpack.c.bf16 %v444_v60, %v443_v54  ;;  %v268_v5 = vmul.f32 0.03125, %v240_v63  ;;  %v426_v6 = vmul.f32 %v7672_v19, %v406_v61 }
 0x13b   :  { %v7053_v8 = vpop.eup %7052  ;;  %v269_v9 = vmul.f32 0.03125, %v243_v0  ;;  %v427_v11 = vmul.f32 %v7672_v19, %v407_v1  ;;  %v299_v14 = vmul.f32 %v7692_v29, %v7692_v29 }
 0x13c   :  { %v7055_v37 = vpop.eup %7054  ;;  %6099 = vmatprep.mubr.msk.bf16.mxu1 %vm139_vm0, %v459_v4  ;;  %v7706_v46 = vsub.f32 %v7602_v22, %v268_v5  ;;  %v446_v16 = vadd.f32 %v7680_v41, %v426_v6  ;;  %v408_v17 = vmul.f32 %v7053_v8, %v7548_v47 }
 0x13d   :  { %v246_v21 = vpop.xlane.xlu1 %245  ;;  %v7712_v24 = vsub.f32 %v7607_v23, %v269_v9  ;;  %v331_v25 = vsel %vm139_vm0, %v299_v14, 0.0  ;;  %v249_v30 = vpop.xlane.xlu0 %248  ;;  %v409_v31 = vmul.f32 %v7055_v37, %v7556_v56  ;;  %v447_v23 = vadd.f32 %v7680_v41, %v427_v11 }
 0x13e   :  { %v460_v22 = vpack.c.bf16 %v446_v16, %v445_v15  ;;  %v270_v35 = vmul.f32 0.03125, %v246_v21  ;;  %v428_v39 = vmul.f32 %v7672_v19, %v408_v17  ;;  %v300_v40 = vmul.f32 %v7706_v46, %v7706_v46  ;;  %332 = vadd.xlane.f32.xlu0 %v331_v25 }
 0x13f   :  { %v7057_v47 = vpop.eup %7056  ;;  %v271_v42 = vmul.f32 0.03125, %v249_v30  ;;  %v429_v43 = vmul.f32 %v7672_v19, %v409_v31  ;;  %v301_v56 = vmul.f32 %v7712_v24, %v7712_v24 }
 0x140   :  { %v7059_v44 = vpop.eup %7058  ;;  %6100 = vmatmul.mubr.msk.bf16.vlgmr.msra.gmra.mxu1 %vm139_vm0, %v460_v22  ;;  %v7728_v45 = vsub.f32 %v7616_v26, %v270_v35  ;;  %v448_v28 = vadd.f32 %v7680_v41, %v428_v39  ;;  %v334_v48 = vsel %vm139_vm0, %v300_v40, 0.0  ;;  %v410_v49 = vmul.f32 %v7057_v47, %v7558_v57 }
 0x141   :  { %335 = vadd.xlane.f32.xlu1 %v334_v48  ;;  %v252_v50 = vpop.xlane.xlu1 %251  ;;  %v7734_v51 = vsub.f32 %v7621_v27, %v271_v42  ;;  %v337_v52 = vsel %vm139_vm0, %v301_v56, 0.0  ;;  %v255_v53 = vpop.xlane.xlu0 %254  ;;  %v189_v54 = vmul.f32 %v7059_v44, %v7567_v2  ;;  %v204_v26 = vrot.slane %v7668_v10, %v7717_v34 }
 0x142   :  { %v461_v55 = vpack.c.bf16 %v448_v28, %v447_v23  ;;  %v272_v59 = vmul.f32 0.03125, %v252_v50  ;;  %v430_v36 = vmul.f32 %v7672_v19, %v410_v49  ;;  %v302_v57 = vmul.f32 %v7728_v45, %v7728_v45  ;;  %338 = vadd.xlane.f32.xlu0 %v337_v52 }
 0x143   :  { %v7061_v60 = vpop.eup %7060  ;;  %v449_v27 = vadd.f32 %v7680_v41, %v429_v43  ;;  %v273_v61 = vmul.f32 0.03125, %v255_v53  ;;  %v197_v63 = vmul.f32 %v7702_v18, %v189_v54  ;;  %v303_v2 = vmul.f32 %v7734_v51, %v7734_v51 }
 0x144   :  { %v7063_v0 = vpop.eup %7062  ;;  %6103 = vmatprep.mubr.msk.bf16.mxu1 %vm139_vm0, %v461_v55  ;;  %v7749_v1 = vsub.f32 %v7630_v32, %v272_v59  ;;  %v450_v4 = vadd.f32 %v7680_v41, %v430_v36  ;;  %v340_v5 = vsel %vm139_vm0, %v302_v57, 0.0  ;;  %v190_v6 = vmul.f32 %v7061_v60, %v7570_v3 }
 0x145   :  { %341 = vadd.xlane.f32.xlu1 %v340_v5  ;;  %v258_v8 = vpop.xlane.xlu1 %257  ;;  %v7755_v9 = vsub.f32 %v7635_v33, %v273_v61  ;;  %v343_v11 = vsel %vm139_vm0, %v303_v2, 0.0  ;;  %v191_v14 = vmul.f32 %v7063_v0, %v7579_v12  ;;  %v205_v21 = vadd.f32 %v204_v26, %v197_v63 }
 0x146   :  { %v462_v37 = vpack.c.bf16 %v450_v4, %v449_v27  ;;  %v274_v15 = vmul.f32 0.03125, %v258_v8  ;;  %v198_v32 = vmul.f32 %v7702_v18, %v190_v6  ;;  %v304_v16 = vmul.f32 %v7749_v1, %v7749_v1  ;;  %344 = vadd.xlane.f32.xlu0 %v343_v11 }
 0x147   :  { %v7065_v17 = vpop.eup %7064  ;;  %v199_v3 = vmul.f32 %v7702_v18, %v191_v14  ;;  %v305_v33 = vmul.f32 %v7755_v9, %v7755_v9 }
 0x148   :  { %6104 = vmatmul.mubr.msk.bf16.gmra.mxu1 %vm139_vm0, %v462_v37  ;;  %v7767_v25 = vsub.f32 %v7644_v38, %v274_v15  ;;  %v206_v12 = vadd.f32 %v204_v26, %v198_v32  ;;  %v346_v30 = vsel %vm139_vm0, %v304_v16, 0.0  ;;  %v192_v31 = vmul.f32 %v7065_v17, %v7582_v13 }
 0x149   :  { %347 = vadd.xlane.f32.xlu1 %v346_v30  ;;  %v349_v22 = vsel %vm139_vm0, %v305_v33, 0.0  ;;  %v207_v47 = vadd.f32 %v204_v26, %v199_v3  ;;  %v7382_v13 = vmov 0.0  }
 0x14a   :  { %v209_v35 = vpack.c.bf16 %v206_v12, %v205_v21  ;;  %v200_v39 = vmul.f32 %v7702_v18, %v192_v31  ;;  %v306_v40 = vmul.f32 %v7767_v25, %v7767_v25  ;;  %350 = vadd.xlane.f32.xlu0 %v349_v22  ;;  %6115 = vmatprep.subr.bf16.mxu0 %v7382_v13 }
 0x14b   :  { %6127 = vmatprep.subr.bf16.mxu1 %v7382_v13 }
 0x14c   :  { %6091 = vmatprep.mubr.msk.bf16.mxu0 %vm139_vm0, %v209_v35  ;;  %v208_v38 = vadd.f32 %v204_v26, %v200_v39  ;;  %v352_v23 = vsel %vm139_vm0, %v306_v40, 0.0 }
 0x14d   :  { %353 = vadd.xlane.f32.xlu1 %v352_v23 }
 0x14e   :  { %v210_v42 = vpack.c.bf16 %v208_v38, %v207_v47 }
 0x150   :  { %6092 = vmatmul.mubr.msk.bf16.vlgmr.msra.gmra.mxu0 %vm139_vm0, %v210_v42 }
 0x151   :  { %6123 = vmatprep.mubr.msk.bf16.mxu0 %vm7383_vm1, %v7382_v13 }
 0x1c7   :  { %v333_v18 = vpop.xlane.xlu0 %332 }
 0x1c8   :  { %v363_v43 = vmul.f32 0.03125, %v333_v18 }
 0x1ca   :  { %v336_v56 = vpop.xlane.xlu1 %335  ;;  %v379_v44 = vadd.f32 1e-05, %v363_v43 }
 0x1cb   :  { %v364_v28 = vmul.f32 0.03125, %v336_v56  ;;  %v339_v48 = vpop.xlane.xlu0 %338 }
 0x1cc   :  { %7066 = vrsqrt.f32 %v379_v44  ;;  %v365_v49 = vmul.f32 0.03125, %v339_v48 }
 0x1cd   :  { %v380_v50 = vadd.f32 1e-05, %v364_v28 }
 0x1ce   :  { %v342_v52 = vpop.xlane.xlu1 %341  ;;  %v381_v53 = vadd.f32 1e-05, %v365_v49 }
 0x1cf   :  { %7068 = vrsqrt.f32 %v380_v50  ;;  %v366_v54 = vmul.f32 0.03125, %v342_v52  ;;  %v345_v26 = vpop.xlane.xlu0 %344 }
 0x1d0   :  { %7070 = vrsqrt.f32 %v381_v53  ;;  %v367_v55 = vmul.f32 0.03125, %v345_v26 }
 0x1d1   :  { %v382_v59 = vadd.f32 1e-05, %v366_v54 }
 0x1d2   :  { %v348_v36 = vpop.xlane.xlu1 %347  ;;  %v383_v57 = vadd.f32 1e-05, %v367_v55 }
 0x1d3   :  { %7072 = vrsqrt.f32 %v382_v59  ;;  %v368_v60 = vmul.f32 0.03125, %v348_v36  ;;  %v351_v27 = vpop.xlane.xlu0 %350 }
 0x1d4   :  { %7074 = vrsqrt.f32 %v383_v57  ;;  %v369_v61 = vmul.f32 0.03125, %v351_v27 }
 0x1d5   :  { %v384_v63 = vadd.f32 1e-05, %v368_v60 }
 0x1d6   :  { %v354_v2 = vpop.xlane.xlu1 %353  ;;  %v385_v0 = vadd.f32 1e-05, %v369_v61 }
 0x1d7   :  { %7076 = vrsqrt.f32 %v384_v63  ;;  %v370_v4 = vmul.f32 0.03125, %v354_v2 }
 0x1d8   :  { %7078 = vrsqrt.f32 %v385_v0 }
 0x1d9   :  { %v7067_v5 = vpop.eup %7066  ;;  %v386_v6 = vadd.f32 1e-05, %v370_v4 }
 0x1da   :  { %v411_v8 = vmul.f32 %v7067_v5, %v7692_v29 }
 0x1db   :  { %7080 = vrsqrt.f32 %v386_v6 }
 0x1dc   :  { %v7069_v11 = vpop.eup %7068  ;;  %v431_v14 = vmul.f32 %v7672_v19, %v411_v8 }
 0x1dd   :  { %v7071_v37 = vpop.eup %7070  ;;  %v412_v15 = vmul.f32 %v7069_v11, %v7706_v46 }
 0x1de   :  { %v413_v32 = vmul.f32 %v7071_v37, %v7712_v24  ;;  %v451_v17 = vadd.f32 %v7680_v41, %v431_v14 }
 0x1df   :  { %v432_v16 = vmul.f32 %v7672_v19, %v412_v15 }
 0x1e0   :  { %v7073_v21 = vpop.eup %7072  ;;  %v433_v3 = vmul.f32 %v7672_v19, %v413_v32 }
 0x1e1   :  { %v7075_v33 = vpop.eup %7074  ;;  %v452_v12 = vadd.f32 %v7680_v41, %v432_v16  ;;  %v414_v29 = vmul.f32 %v7073_v21, %v7728_v45 }
 0x1e2   :  { %v415_v30 = vmul.f32 %v7075_v33, %v7734_v51  ;;  %v453_v46 = vadd.f32 %v7680_v41, %v433_v3 }
 0x1e3   :  { %v463_v31 = vpack.c.bf16 %v452_v12, %v451_v17  ;;  %v434_v22 = vmul.f32 %v7672_v19, %v414_v29 }
 0x1e4   :  { %v7077_v24 = vpop.eup %7076  ;;  %v435_v35 = vmul.f32 %v7672_v19, %v415_v30 }
 0x1e5   :  { %v7079_v39 = vpop.eup %7078  ;;  %6107 = vmatprep.mubr.msk.bf16.mxu1 %vm139_vm0, %v463_v31  ;;  %v454_v40 = vadd.f32 %v7680_v41, %v434_v22  ;;  %v416_v47 = vmul.f32 %v7077_v24, %v7749_v1 }
 0x1e6   :  { %v417_v38 = vmul.f32 %v7079_v39, %v7755_v9  ;;  %v455_v23 = vadd.f32 %v7680_v41, %v435_v35 }
 0x1e7   :  { %v464_v45 = vpack.c.bf16 %v454_v40, %v453_v46  ;;  %v436_v51 = vmul.f32 %v7672_v19, %v416_v47 }
 0x1e8   :  { %v7081_v42 = vpop.eup %7080  ;;  %v437_v18 = vmul.f32 %v7672_v19, %v417_v38 }
 0x1e9   :  { %6108 = vmatmul.mubr.msk.bf16.gmra.mxu1 %vm139_vm0, %v464_v45  ;;  %v456_v43 = vadd.f32 %v7680_v41, %v436_v51  ;;  %v418_v56 = vmul.f32 %v7081_v42, %v7767_v25  ;;  %v540_v25 = vsub.s32 5, %v7660_v62 }
 0x1ea   :  { %v457_v1 = vadd.f32 %v7680_v41, %v437_v18 }
 0x1eb   :  { %v465_v44 = vpack.c.bf16 %v456_v43, %v455_v23  ;;  %v438_v28 = vmul.f32 %v7672_v19, %v418_v56  ;;  %v469_v19 = vsub.s32 4, %v7660_v62 }
 0x1ed   :  { %6111 = vmatprep.mubr.msk.bf16.mxu1 %vm139_vm0, %v465_v44  ;;  %v458_v9 = vadd.f32 %v7680_v41, %v438_v28  ;;  %v7817_v41 = vrot.slane %v7668_v10, %v540_v25  ;;  %v470_v57 = vrot.slane %v7668_v10, %v469_v19 }
 0x1ef   :  { %v466_v48 = vpack.c.bf16 %v458_v9, %v457_v1 }
 0x1f1   :  { %6112 = vmatmul.mubr.msk.bf16.gmra.mxu1 %vm139_vm0, %v466_v48 }
 0x1f2   :  { %6135 = vmatprep.mubr.msk.bf16.mxu1 %vm7383_vm1, %v7382_v13 }
 0x200   :  { %v6101_v49 = vpop.f32.mrf.mxu1 }
 0x201   :  { %v621_v11 = vadd.f32 %v6101_v49, %v7817_v41 }
 0x202   :  { %v612_v50 = vpop.f32.mrf.mxu1 }
 0x203   :  { %v613_v17 = vadd.f32 %v612_v50, %v7817_v41 }
 0x204   :  { %v6102_v52 = vpop.f32.mrf.mxu1 }
 0x205   :  { %v624_v4 = vadd.f32 %v6102_v52, %v7817_v41 }
 0x206   :  { %v615_v53 = vpop.f32.mrf.mxu1 }
 0x207   :  { %v616_v37 = vadd.f32 %v615_v53, %v7817_v41  ;;  %v6660_v32 = vpack.i.bf16 %v624_v4, %v621_v11  ;;  %v884_v46 = vpack.c.bf16 %v624_v4, %v621_v11 }
 0x208   :  { %v6105_v54 = vpop.f32.mrf.mxu1 }
 0x209   :  { %v637_v59 = vadd.f32 %v6105_v54, %v7817_v41  ;;  %v6665_v31 = vpack.i.bf16 %v616_v37, %v613_v17  ;;  %v923_v24 = vsel %vm915_vm2, %v884_v46, 0  ;;  %v883_v35 = vpack.c.bf16 %v616_v37, %v613_v17 }
 0x20a   :  { %v628_v26 = vpop.f32.mrf.mxu1 }
 0x20b   :  { %v629_v27 = vadd.f32 %v628_v26, %v7817_v41  ;;  %v920_v39 = vsel %vm915_vm2, %v883_v35, 0 }
 0x20c   :  { %v6106_v55 = vpop.f32.mrf.mxu1 }
 0x20d   :  { %v640_v36 = vadd.f32 %v6106_v55, %v7817_v41 }
 0x20e   :  { %v631_v60 = vpop.f32.mrf.mxu1 }
 0x20f   :  { %v632_v61 = vadd.f32 %v631_v60, %v7817_v41  ;;  %v6650_v63 = vpack.i.bf16 %v640_v36, %v637_v59  ;;  %v886_v2 = vpack.c.bf16 %v640_v36, %v637_v59 }
 0x210   :  { %v6093_v0 = vpop.f32.mrf.mxu0 }
 0x211   :  { %v7827_v5 = vadd.f32 %v6093_v0, %v470_v57  ;;  %6651 = vrot.lane.b32.xlu0 %v6650_v63, %s7384_s28  ;;  %v929_v6 = vsel %vm915_vm2, %v886_v2, 0  ;;  %v6655_v8 = vpack.i.bf16 %v632_v61, %v629_v27  ;;  %v885_v16 = vpack.c.bf16 %v632_v61, %v629_v27 }
 0x212   :  { %v523_v10 = vpop.f32.mrf.mxu0  ;;  %6116 = vmatpush3.bf16.xpose.msra.mxu0 %v929_v6 }
 0x213   :  { %6656 = vrot.lane.b32.xlu1 %v6655_v8, %s7384_s28  ;;  %6117 = vmatprep.subr.bf16.mxu0 %v7382_v13  ;;  %v524_v21 = vadd.f32 %v523_v10, %v470_v57  ;;  %v926_v30 = vsel %vm915_vm2, %v885_v16, 0 }
 0x214   :  { %v6094_v14 = vpop.f32.mrf.mxu0 }
 0x215   :  { %v7835_v15 = vadd.f32 %v6094_v14, %v470_v57  ;;  %6671 = vrot.lane.b32.xlu0 %v6650_v63, %s7385_s29 }
 0x216   :  { %v526_v3 = vpop.f32.mrf.mxu0 }
 0x217   :  { %v716_v33 = vpack.c.bf16 %v7835_v15, %v7827_v5  ;;  %v527_v12 = vadd.f32 %v526_v3, %v470_v57  ;;  %6661 = vrot.lane.b32.xlu1 %v6660_v32, %s7384_s28  ;;  %v7844_v29 = vpack.i.bf16 %v7835_v15, %v7827_v5 }
 0x219   :  { %v6680_v22 = vpack.i.bf16 %v527_v12, %v524_v21  ;;  %v715_v40 = vpack.c.bf16 %v527_v12, %v524_v21 }
 0x21a   :  { %6118 = vmatpush3.bf16.xpose.msra.mxu0 %v926_v30 }
 0x21b   :  { %6666 = vrot.lane.b32.xlu1 %v6665_v31, %s7384_s28  ;;  %6681 = vrot.lane.b32.xlu0 %v6680_v22, %s7384_s28 }
 0x21c   :  { %6119 = vmatprep.subr.bf16.mxu0 %v7382_v13 }
 0x21f   :  { %6676 = vrot.lane.b32.xlu1 %v6650_v63, %s7386_s30  ;;  %6691 = vrot.lane.b32.xlu0 %v6655_v8, %s7386_s30 }
 0x222   :  { %6120 = vmatpush3.bf16.xpose.msra.mxu0 %v923_v24 }
 0x223   :  { %6686 = vrot.lane.b32.xlu1 %v6655_v8, %s7385_s29  ;;  %6701 = vrot.lane.b32.xlu0 %v6660_v32, %s7386_s30 }
 0x224   :  { %6121 = vmatprep.subr.bf16.mxu0 %v7382_v13 }
 0x227   :  { %6696 = vrot.lane.b32.xlu1 %v6660_v32, %s7385_s29  ;;  %6711 = vrot.lane.b32.xlu0 %v6665_v31, %s7386_s30 }
 0x22a   :  { %6122 = vmatpush3.bf16.xpose.msra.mxu0 %v920_v39 }
 0x22b   :  { %6706 = vrot.lane.b32.xlu1 %v6665_v31, %s7385_s29  ;;  %6721 = vrot.lane.b32.xlu0 %v6680_v22, %s7386_s30 }
 0x22c   :  { %6139 = vmatprep.subr.bf16.mxu0 %v7382_v13 }
 0x22f   :  { %6716 = vrot.lane.b32.xlu1 %v6680_v22, %s7385_s29  ;;  %1241 = vrot.lane.b32.xlu0 %v885_v16, %s7387_s15 }
 0x231   :  { %6124 = vmatmul.mubr.msk.bf16.vlgmr.msra.gmra.mxu0 %vm915_vm2, %v715_v40 }
 0x232   :  { %6147 = vmatprep.mubr.msk.bf16.mxu0 %vm7383_vm1, %v7382_v13 }
 0x233   :  { %1239 = vrot.lane.b32.xlu1 %v884_v46, %s7387_s15 }
 0x237   :  { %1237 = vrot.lane.b32.xlu1 %v883_v35, %s7387_s15 }
 0x23b   :  { %1243 = vrot.lane.b32.xlu1 %v886_v2, %s7387_s15 }
 0x283   :  { %v6652_v47 = vpop.permute.xlu0 %6651 }
 0x284   :  { %v6654_v38 = vunpack.i.h.bf16 %v6652_v47  ;;  %v6653_v45 = vunpack.i.l.bf16 %v6652_v47 }
 0x285   :  { %v6657_v51 = vpop.permute.xlu1 %6656 }
 0x286   :  { %v894_v23 = vpack.c.bf16 %v6654_v38, %v6653_v45  ;;  %v6659_v42 = vunpack.i.h.bf16 %v6657_v51  ;;  %v6658_v43 = vunpack.i.l.bf16 %v6657_v51 }
 0x287   :  { %v6672_v18 = vpop.permute.xlu0 %6671 }
 0x288   :  { %v6674_v56 = vunpack.i.h.bf16 %v6672_v18  ;;  %v6673_v44 = vunpack.i.l.bf16 %v6672_v18  ;;  %v985_v28 = vsel %vm915_vm2, %v894_v23, 0  ;;  %v893_v53 = vpack.c.bf16 %v6659_v42, %v6658_v43 }
 0x289   :  { %v6662_v1 = vpop.permute.xlu1 %6661  ;;  %6128 = vmatpush3.bf16.xpose.msra.mxu1 %v985_v28 }
 0x28a   :  { %v6664_v9 = vunpack.i.h.bf16 %v6662_v1  ;;  %v6663_v48 = vunpack.i.l.bf16 %v6662_v1  ;;  %v902_v49 = vpack.c.bf16 %v6674_v56, %v6673_v44  ;;  %6129 = vmatprep.subr.bf16.mxu1 %v7382_v13  ;;  %v982_v59 = vsel %vm915_vm2, %v893_v53, 0 }
 0x28c   :  { %v1041_v50 = vsel %vm915_vm2, %v902_v49, 0  ;;  %v892_v52 = vpack.c.bf16 %v6664_v9, %v6663_v48 }
 0x28d   :  { %v6667_v54 = vpop.permute.xlu1 %6666  ;;  %6140 = vmatpush3.bf16.xpose.msra.mxu0 %v1041_v50  ;;  %v6682_v37 = vpop.permute.xlu0 %6681 }
 0x28e   :  { %v6669_v26 = vunpack.i.h.bf16 %v6667_v54  ;;  %v6668_v55 = vunpack.i.l.bf16 %v6667_v54  ;;  %1299 = vrot.lane.b32.xlu1 %v892_v52, %s7387_s15  ;;  %6141 = vmatprep.subr.bf16.mxu0 %v7382_v13  ;;  %v979_v4 = vsel %vm915_vm2, %v892_v52, 0  ;;  %v6684_v21 = vunpack.i.h.bf16 %v6682_v37 }
 0x28f   :  { %v6683_v3 = vunpack.i.l.bf16 %v6682_v37 }
 0x290   :  { %v891_v36 = vpack.c.bf16 %v6669_v26, %v6668_v55 }
 0x291   :  { %v6677_v57 = vpop.permute.xlu1 %6676  ;;  %6130 = vmatpush3.bf16.xpose.msra.mxu1 %v982_v59  ;;  %v6692_v22 = vpop.permute.xlu0 %6691  ;;  %v717_v46 = vpack.c.bf16 %v6684_v21, %v6683_v3 }
 0x292   :  { %v6679_v60 = vunpack.i.h.bf16 %v6677_v57  ;;  %v6678_v27 = vunpack.i.l.bf16 %v6677_v57  ;;  %1297 = vrot.lane.b32.xlu1 %v891_v36, %s7387_s15  ;;  %6131 = vmatprep.subr.bf16.mxu1 %v7382_v13  ;;  %v976_v17 = vsel %vm915_vm2, %v891_v36, 0  ;;  %v6694_v35 = vunpack.i.h.bf16 %v6692_v22 }
 0x293   :  { %v6693_v39 = vunpack.i.l.bf16 %v6692_v22 }
 0x294   :  { %v910_v61 = vpack.c.bf16 %v6679_v60, %v6678_v27 }
 0x295   :  { %v6687_v63 = vpop.permute.xlu1 %6686  ;;  %v7906_v18 = vpack.c.bf16 %v6694_v35, %v6693_v39 }
 0x296   :  { %v6689_v2 = vunpack.i.h.bf16 %v6687_v63  ;;  %v6688_v0 = vunpack.i.l.bf16 %v6687_v63  ;;  %1423 = vrot.lane.b32.xlu0 %v910_v61, %s7387_s15  ;;  %1303 = vrot.lane.b32.xlu1 %v894_v23, %s7387_s15  ;;  %v1097_v40 = vsel %vm915_vm2, %v910_v61, 0  ;;  %v6702_v23 = vpop.permute.xlu0 %6701 }
 0x297   :  { %v6704_v1 = vunpack.i.h.bf16 %v6702_v23  ;;  %v6703_v9 = vunpack.i.l.bf16 %v6702_v23 }
 0x298   :  { %v901_v6 = vpack.c.bf16 %v6689_v2, %v6688_v0 }
 0x299   :  { %v6697_v8 = vpop.permute.xlu1 %6696  ;;  %6132 = vmatpush3.bf16.xpose.msra.mxu1 %v979_v4  ;;  %v7923_v36 = vpack.c.bf16 %v6704_v1, %v6703_v9 }
 0x29a   :  { %1301 = vrot.lane.b32.xlu0 %v893_v53, %s7387_s15  ;;  %1363 = vrot.lane.b32.xlu1 %v902_v49, %s7387_s15  ;;  %v6699_v10 = vunpack.i.h.bf16 %v6697_v8  ;;  %v6698_v11 = vunpack.i.l.bf16 %v6697_v8  ;;  %v1038_v14 = vsel %vm915_vm2, %v901_v6, 0  ;;  %v1094_v49 = vsel %vm915_vm2, %v7906_v18, 0  ;;  %v6712_v55 = vpop.permute.xlu0 %6711 }
 0x29b   :  { %6133 = vmatprep.subr.bf16.mxu1 %v7382_v13  ;;  %6142 = vmatpush3.bf16.xpose.msra.mxu0 %v1038_v14  ;;  %v6714_v27 = vunpack.i.h.bf16 %v6712_v55  ;;  %v6713_v61 = vunpack.i.l.bf16 %v6712_v55  ;;  %v1091_v63 = vsel %vm915_vm2, %v7923_v36, 0 }
 0x29c   :  { %6143 = vmatprep.subr.bf16.mxu0 %v7382_v13  ;;  %v7887_v32 = vpack.c.bf16 %v6699_v10, %v6698_v11 }
 0x29d   :  { %v6707_v16 = vpop.permute.xlu1 %6706 }
 0x29e   :  { %1361 = vrot.lane.b32.xlu1 %v901_v6, %s7387_s15  ;;  %v6709_v12 = vunpack.i.h.bf16 %v6707_v16  ;;  %v6708_v30 = vunpack.i.l.bf16 %v6707_v16  ;;  %v1035_v31 = vsel %vm915_vm2, %v7887_v32, 0  ;;  %v7935_v6 = vpack.c.bf16 %v6714_v27, %v6713_v61  ;;  %v6722_v8 = vpop.permute.xlu0 %6721 }
 0x29f   :  { %v6724_v11 = vunpack.i.h.bf16 %v6722_v8  ;;  %v6723_v14 = vunpack.i.l.bf16 %v6722_v8 }
 0x2a0   :  { %v7894_v24 = vpack.c.bf16 %v6709_v12, %v6708_v30  ;;  %v1088_v10 = vsel %vm915_vm2, %v7935_v6, 0 }
 0x2a1   :  { %6134 = vmatpush3.bf16.xpose.msra.mxu1 %v976_v17  ;;  %v6717_v38 = vpop.permute.xlu1 %6716  ;;  %v721_v16 = vpack.c.bf16 %v6724_v11, %v6723_v14 }
 0x2a2   :  { %6151 = vmatprep.subr.bf16.mxu1 %v7382_v13  ;;  %v1032_v45 = vsel %vm915_vm2, %v7894_v24, 0  ;;  %v6719_v43 = vunpack.i.h.bf16 %v6717_v38  ;;  %v6718_v56 = vunpack.i.l.bf16 %v6717_v38  ;;  %v1242_v21 = vpop.permute.xlu0 %1241 }
 0x2a3   :  { %6144 = vmatpush3.bf16.xpose.msra.mxu0 %v1035_v31 }
 0x2a4   :  { %6145 = vmatprep.subr.bf16.mxu0 %v7382_v13  ;;  %v719_v52 = vpack.c.bf16 %v6719_v43, %v6718_v56 }
 0x2a5   :  { %v1240_v4 = vpop.permute.xlu1 %1239 }
 0x2a8   :  { %6136 = vmatmul.mubr.msk.bf16.vlgmr.msra.gmra.mxu1 %vm915_vm2, %v717_v46 }
 0x2a9   :  { %6152 = vmatpush3.bf16.xpose.msra.mxu1 %v1097_v40  ;;  %v6109_v47 = vpop.f32.mrf.mxu1  ;;  %6159 = vmatprep.mubr.msk.bf16.mxu1 %vm7383_vm1, %v7382_v13  ;;  %v1238_v37 = vpop.permute.xlu1 %1237 }
 0x2aa   :  { %6153 = vmatprep.subr.bf16.mxu1 %v7382_v13  ;;  %v653_v42 = vadd.f32 %v6109_v47, %v7817_v41 }
 0x2ab   :  { %v7903_v51 = vpop.f32.mrf.mxu1  ;;  %6146 = vmatpush3.bf16.xpose.msra.mxu0 %v1032_v45 }
 0x2ac   :  { %6187 = vmatprep.subr.bf16.mxu0 %v7382_v13 }
 0x2ad   :  { %v6110_v44 = vpop.f32.mrf.mxu1  ;;  %v1244_v17 = vpop.permute.xlu1 %1243 }
 0x2ae   :  { %v656_v28 = vadd.f32 %v6110_v44, %v7817_v41 }
 0x2af   :  { %v7910_v48 = vpop.f32.mrf.mxu1 }
 0x2b0   :  { %v7914_v50 = vpack.i.bf16 %v656_v28, %v653_v42  ;;  %v7916_v54 = vpack.c.bf16 %v656_v28, %v653_v42 }
 0x2b1   :  { %6154 = vmatpush3.bf16.xpose.msra.mxu1 %v1094_v49  ;;  %v6113_v53 = vpop.f32.mrf.mxu1 }
 0x2b2   :  { %6155 = vmatprep.subr.bf16.mxu1 %v7382_v13  ;;  %6148 = vmatmul.mubr.msk.bf16.vlgmr.msra.gmra.mxu0 %vm915_vm2, %v719_v52  ;;  %v669_v59 = vadd.f32 %v6113_v53, %v7817_v41 }
 0x2b3   :  { %v7920_v26 = vpop.f32.mrf.mxu1  ;;  %6195 = vmatprep.mubr.msk.bf16.mxu0 %vm7383_vm1, %v7382_v13 }
 0x2b5   :  { %v6114_v57 = vpop.f32.mrf.mxu1 }
 0x2b6   :  { %v672_v60 = vadd.f32 %v6114_v57, %v7817_v41 }
 0x2b7   :  { %v7957_v45 = vpop.f32.mrf.mxu1 }
 0x2b8   :  { %v7930_v2 = vpack.i.bf16 %v672_v60, %v669_v59  ;;  %v7932_v0 = vpack.c.bf16 %v672_v60, %v669_v59 }
 0x2b9   :  { %6156 = vmatpush3.bf16.xpose.msra.mxu1 %v1091_v63 }
 0x2ba   :  { %6157 = vmatprep.subr.bf16.mxu1 %v7382_v13 }
 0x2c1   :  { %6158 = vmatpush3.bf16.xpose.msra.mxu1 %v1088_v10 }
 0x2c2   :  { %6163 = vmatprep.subr.bf16.mxu1 %v7382_v13 }
 0x2c8   :  { %6160 = vmatmul.mubr.msk.bf16.vlgmr.msra.gmra.mxu1 %vm915_vm2, %v721_v16 }
 0x2c9   :  { %6164 = vmatpush3.bf16.msra.mxu1 %v1244_v17  ;;  %6171 = vmatprep.mubr.msk.bf16.mxu1 %vm7383_vm1, %v7382_v13 }
 0x2ca   :  { %6165 = vmatprep.subr.bf16.mxu1 %v7382_v13 }
 0x2cd   :  { %6166 = vmatpush3.bf16.msra.mxu1 %v1242_v21 }
 0x2ce   :  { %6167 = vmatprep.subr.bf16.mxu1 %v7382_v13 }
 0x2d1   :  { %6168 = vmatpush3.bf16.msra.mxu1 %v1240_v4 }
 0x2d2   :  { %6169 = vmatprep.subr.bf16.mxu1 %v7382_v13 }
 0x2d5   :  { %6170 = vmatpush3.bf16.msra.mxu1 %v1238_v37 }
 0x2d6   :  { %6175 = vmatprep.subr.bf16.mxu1 %v7382_v13 }
 0x2f1   :  { %v965_v3 = vpop.f32.mrf.mxu0 }
 0x2f2   :  { %v1141_v12 = vsel %vm1140_vm3, %v965_v3, -inf }
 0x2f3   :  { %v6125_v30 = vpop.f32.mrf.mxu0  ;;  %1142 = vmax.xlane.f32.xlu1 %v1141_v12 }
 0x2f5   :  { %v968_v31 = vpop.f32.mrf.mxu0 }
 0x2f6   :  { %v1144_v22 = vsel %vm1140_vm3, %v968_v31, -inf }
 0x2f7   :  { %v6126_v46 = vpop.f32.mrf.mxu0  ;;  %1145 = vmax.xlane.f32.xlu0 %v1144_v22 }
 0x300   :  { %v7949_v35 = vpop.permute.xlu1 %1299 }
 0x304   :  { %v7951_v39 = vpop.permute.xlu1 %1297 }
 0x308   :  { %v7953_v40 = vpop.permute.xlu1 %1303  ;;  %v7967_v4 = vpop.permute.xlu0 %1423 }
 0x30c   :  { %v1364_v47 = vpop.permute.xlu1 %1363  ;;  %v7969_v8 = vpop.permute.xlu0 %1301 }
 0x30d   :  { %6188 = vmatpush3.bf16.msra.mxu0 %v1364_v47 }
 0x30e   :  { %6189 = vmatprep.subr.bf16.mxu0 %v7382_v13 }
 0x310   :  { %v1362_v38 = vpop.permute.xlu1 %1361 }
 0x311   :  { %6190 = vmatpush3.bf16.msra.mxu0 %v1362_v38 }
 0x312   :  { %6191 = vmatprep.subr.bf16.mxu0 %v7382_v13 }
 0x368   :  { %v1021_v23 = vpop.f32.mrf.mxu1 }
 0x369   :  { %v1147_v42 = vsel %vm1140_vm3, %v1021_v23, -inf }
 0x36a   :  { %1148 = vmax.xlane.f32.xlu0 %v1147_v42  ;;  %v6137_v43 = vpop.f32.mrf.mxu1 }
 0x36c   :  { %v1024_v56 = vpop.f32.mrf.mxu1 }
 0x36d   :  { %v1150_v44 = vsel %vm1140_vm3, %v1024_v56, -inf }
 0x36e   :  { %1151 = vmax.xlane.f32.xlu0 %v1150_v44  ;;  %v6138_v28 = vpop.f32.mrf.mxu1 }
 0x372   :  { %v1077_v1 = vpop.f32.mrf.mxu0 }
 0x373   :  { %v1153_v9 = vsel %vm1140_vm3, %v1077_v1, -inf }
 0x374   :  { %v6149_v49 = vpop.f32.mrf.mxu0  ;;  %1154 = vmax.xlane.f32.xlu1 %v1153_v9 }
 0x376   :  { %v1080_v52 = vpop.f32.mrf.mxu0 }
 0x377   :  { %v1156_v53 = vsel %vm1140_vm3, %v1080_v52, -inf }
 0x378   :  { %v6150_v55 = vpop.f32.mrf.mxu0  ;;  %1157 = vmax.xlane.f32.xlu0 %v1156_v53 }
 0x37c   :  { %v1143_v10 = vpop.xlane.xlu1 %1142 }
 0x37d   :  { %v1165_v11 = vsub.f32 %v965_v3, %v1143_v10 }
 0x37f   :  { %v1173_v37 = vmul.f32 1.442695, %v1165_v11 }
 0x380   :  { %v1146_v14 = vpop.xlane.xlu0 %1145 }
 0x381   :  { %v1166_v16 = vsub.f32 %v968_v31, %v1146_v14  ;;  %7082 = vpow2.f32 %v1173_v37 }
 0x383   :  { %v1175_v17 = vmul.f32 1.442695, %v1166_v16 }
 0x385   :  { %7084 = vpow2.f32 %v1175_v17 }
 0x388   :  { %v1133_v59 = vpop.f32.mrf.mxu1 }
 0x389   :  { %v1159_v57 = vsel %vm1140_vm3, %v1133_v59, -inf }
 0x38a   :  { %1160 = vmax.xlane.f32.xlu1 %v1159_v57  ;;  %v6161_v60 = vpop.f32.mrf.mxu1 }
 0x38c   :  { %v1136_v27 = vpop.f32.mrf.mxu1 }
 0x38d   :  { %v1162_v61 = vsel %vm1140_vm3, %v1136_v27, -inf }
 0x38e   :  { %1163 = vmax.xlane.f32.xlu0 %v1162_v61  ;;  %v6162_v63 = vpop.f32.mrf.mxu1  ;;  %v7973_v21 = vpop.eup %7082 }
 0x392   :  { %v7977_v12 = vpop.eup %7084 }
 0x393   :  { %v1192_v30 = vsel %vm1140_vm3, %v7977_v12, 0.0 }
 0x39b   :  { %1359 = vrot.lane.b32.xlu1 %v7887_v32, %s7387_s15  ;;  %v1189_v32 = vsel %vm1140_vm3, %v7973_v21, 0.0 }
 0x3a4   :  { %1421 = vrot.lane.b32.xlu0 %v7906_v18, %s7387_s15 }
 0x3bf   :  { %1190 = vadd.xlane.f32.xlu1 %v1189_v32 }
 0x3c3   :  { %1193 = vadd.xlane.f32.xlu0 %v1192_v30 }
 0x3f3   :  { %v1149_v18 = vpop.xlane.xlu0 %1148 }
 0x3f4   :  { %v1167_v3 = vsub.f32 %v1021_v23, %v1149_v18  ;;  %v661_v18 = vadd.f32 %v7920_v26, %v7817_v41  ;;  %v648_v26 = vadd.f32 %v7910_v48, %v7817_v41 }
 0x3f6   :  { %v1177_v22 = vmul.f32 1.442695, %v1167_v3  ;;  %v664_v3 = vadd.f32 %v7957_v45, %v7817_v41 }
 0x3f7   :  { %v1152_v46 = vpop.xlane.xlu0 %1151 }
 0x3f8   :  { %7086 = vpow2.f32 %v1177_v22  ;;  %v1168_v31 = vsub.f32 %v1024_v56, %v1152_v46  ;;  %v6730_v45 = vpack.i.bf16 %v664_v3, %v661_v18 }
 0x3fa   :  { %v1179_v47 = vmul.f32 1.442695, %v1168_v31 }
 0x3fc   :  { %7088 = vpow2.f32 %v1179_v47  ;;  %v645_v47 = vadd.f32 %v7903_v51, %v7817_v41  ;;  %v8061_v41 = vpack.c.bf16 %v664_v3, %v661_v18 }
 0x3fd   :  { %v1155_v38 = vpop.xlane.xlu1 %1154 }
 0x3fe   :  { %v1169_v42 = vsub.f32 %v1077_v1, %v1155_v38  ;;  %v8067_v51 = vpack.c.bf16 %v648_v26, %v645_v47 }
 0x400   :  { %v1181_v43 = vmul.f32 1.442695, %v1169_v42 }
 0x401   :  { %v1158_v55 = vpop.xlane.xlu0 %1157 }
 0x402   :  { %7090 = vpow2.f32 %v1181_v43  ;;  %v1170_v57 = vsub.f32 %v1080_v52, %v1158_v55 }
 0x404   :  { %v1183_v60 = vmul.f32 1.442695, %v1170_v57 }
 0x405   :  { %v7981_v44 = vpop.eup %7086 }
 0x406   :  { %v1195_v28 = vsel %vm1140_vm3, %v7981_v44, 0.0  ;;  %7092 = vpow2.f32 %v1183_v60 }
 0x407   :  { %1196 = vadd.xlane.f32.xlu0 %v1195_v28 }
 0x409   :  { %v7985_v9 = vpop.eup %7088 }
 0x40a   :  { %v1198_v23 = vsel %vm1140_vm3, %v7985_v9, 0.0 }
 0x40b   :  { %1199 = vadd.xlane.f32.xlu0 %v1198_v23 }
 0x40f   :  { %v7989_v49 = vpop.eup %7090 }
 0x410   :  { %v1201_v56 = vsel %vm1140_vm3, %v7989_v49, 0.0 }
 0x411   :  { %1202 = vadd.xlane.f32.xlu1 %v1201_v56 }
 0x413   :  { %v1161_v1 = vpop.xlane.xlu1 %1160  ;;  %v7998_v37 = vpop.eup %7092 }
 0x414   :  { %v1171_v61 = vsub.f32 %v1133_v59, %v1161_v1  ;;  %v1204_v16 = vsel %vm1140_vm3, %v7998_v37, 0.0 }
 0x416   :  { %v1185_v11 = vmul.f32 1.442695, %v1171_v61 }
 0x417   :  { %v1360_v53 = vpop.permute.xlu1 %1359  ;;  %v1164_v63 = vpop.xlane.xlu0 %1163 }
 0x418   :  { %6192 = vmatpush3.bf16.msra.mxu0 %v1360_v53  ;;  %v1172_v10 = vsub.f32 %v1136_v27, %v1164_v63  ;;  %7094 = vpow2.f32 %v1185_v11 }
 0x419   :  { %6193 = vmatprep.subr.bf16.mxu0 %v7382_v13 }
 0x41a   :  { %v1187_v14 = vmul.f32 1.442695, %v1172_v10 }
 0x41b   :  { %v8010_v27 = vpop.permute.xlu0 %1421 }
 0x41c   :  { %7096 = vpow2.f32 %v1187_v14 }
 0x421   :  { %1419 = vrot.lane.b32.xlu0 %v7923_v36, %s7387_s15 }
 0x422   :  { %1357 = vrot.lane.b32.xlu1 %v7894_v24, %s7387_s15 }
 0x425   :  { %v8002_v36 = vpop.eup %7094 }
 0x426   :  { %v1207_v52 = vsel %vm1140_vm3, %v8002_v36, 0.0 }
 0x429   :  { %v8004_v24 = vpop.eup %7096 }
 0x42a   :  { %v1210_v59 = vsel %vm1140_vm3, %v8004_v24, 0.0 }
 0x440   :  { %1205 = vadd.xlane.f32.xlu0 %v1204_v16 }
 0x444   :  { %1208 = vadd.xlane.f32.xlu0 %v1207_v52 }
 0x446   :  { %1211 = vadd.xlane.f32.xlu1 %v1210_v59 }
 0x448   :  { %v1191_v17 = vpop.xlane.xlu1 %1190 }
 0x449   :  { %7098 = vrcp.f32 %v1191_v17 }
 0x44c   :  { %v1194_v32 = vpop.xlane.xlu0 %1193 }
 0x44d   :  { %7100 = vrcp.f32 %v1194_v32  ;;  %v1518_v32 = vsel %vm915_vm2, %v7932_v0, 0 }
 0x456   :  { %v7099_v30 = vpop.eup %7098 }
 0x457   :  { %6726 = vrot.lane.b32.xlu1 %v7930_v2, %s7384_s28  ;;  %v1221_v46 = vmul.f32 %v7099_v30, %v7973_v21 }
 0x45a   :  { %v7101_v22 = vpop.eup %7100  ;;  %1417 = vrot.lane.b32.xlu0 %v7935_v6, %s7387_s15  ;;  %v6740_v6 = vpack.i.bf16 %v648_v26, %v645_v47 }
 0x45b   :  { %v1222_v31 = vmul.f32 %v7101_v22, %v7977_v12  ;;  %6736 = vrot.lane.b32.xlu1 %v7914_v50, %s7384_s28 }
 0x45d   :  { %v1229_v38 = vpack.c.bf16 %v1222_v31, %v1221_v46 }
 0x45e   :  { %6731 = vrot.lane.b32.xlu0 %v6730_v45, %s7384_s28 }
 0x45f   :  { %6172 = vmatmul.mubr.msk.bf16.vlgmr.msra.gmra.mxu1 %vm1140_vm3, %v1229_v38  ;;  %6746 = vrot.lane.b32.xlu1 %v7930_v2, %s7385_s29 }
 0x460   :  { %6176 = vmatpush3.bf16.msra.mxu1 %v7953_v40  ;;  %6183 = vmatprep.mubr.msk.bf16.mxu1 %vm7383_vm1, %v7382_v13 }
 0x461   :  { %6177 = vmatprep.subr.bf16.mxu1 %v7382_v13 }
 0x462   :  { %6741 = vrot.lane.b32.xlu0 %v6740_v6, %s7384_s28 }
 0x463   :  { %6756 = vrot.lane.b32.xlu1 %v7844_v29, %s7384_s28 }
 0x464   :  { %6178 = vmatpush3.bf16.msra.mxu1 %v7969_v8 }
 0x465   :  { %6179 = vmatprep.subr.bf16.mxu1 %v7382_v13 }
 0x466   :  { %6751 = vrot.lane.b32.xlu0 %v7930_v2, %s7386_s30 }
 0x467   :  { %6766 = vrot.lane.b32.xlu1 %v6730_v45, %s7386_s30 }
 0x468   :  { %6180 = vmatpush3.bf16.msra.mxu1 %v7949_v35 }
 0x469   :  { %6181 = vmatprep.subr.bf16.mxu1 %v7382_v13 }
 0x46a   :  { %6761 = vrot.lane.b32.xlu0 %v6730_v45, %s7385_s29 }
 0x46b   :  { %6776 = vrot.lane.b32.xlu1 %v7914_v50, %s7386_s30 }
 0x46c   :  { %6182 = vmatpush3.bf16.msra.mxu1 %v7951_v39 }
 0x46d   :  { %6199 = vmatprep.subr.bf16.mxu1 %v7382_v13 }
 0x46e   :  { %6771 = vrot.lane.b32.xlu0 %v7914_v50, %s7385_s29 }
 0x46f   :  { %6786 = vrot.lane.b32.xlu1 %v6740_v6, %s7386_s30 }
 0x472   :  { %6781 = vrot.lane.b32.xlu0 %v6740_v6, %s7385_s29 }
 0x473   :  { %6796 = vrot.lane.b32.xlu1 %v7844_v29, %s7386_s30 }
 0x476   :  { %6791 = vrot.lane.b32.xlu0 %v7844_v29, %s7385_s29 }
 0x47a   :  { %1831 = vrot.lane.b32.xlu0 %v7932_v0, %s7387_s15 }
 0x47e   :  { %1829 = vrot.lane.b32.xlu0 %v8061_v41, %s7387_s15 }
 0x482   :  { %1827 = vrot.lane.b32.xlu0 %v7916_v54, %s7387_s15 }
 0x486   :  { %1825 = vrot.lane.b32.xlu0 %v8067_v51, %s7387_s15 }
 0x490   :  { %v1197_v48 = vpop.xlane.xlu0 %1196 }
 0x491   :  { %7102 = vrcp.f32 %v1197_v48 }
 0x494   :  { %v1200_v50 = vpop.xlane.xlu0 %1199 }
 0x495   :  { %7104 = vrcp.f32 %v1200_v50  ;;  %v1515_v50 = vsel %vm915_vm2, %v8061_v41, 0 }
 0x498   :  { %v1420_v12 = vpop.permute.xlu0 %1419 }
 0x49a   :  { %v1203_v29 = vpop.xlane.xlu1 %1202 }
 0x49b   :  { %7106 = vrcp.f32 %v1203_v29  ;;  %v1512_v29 = vsel %vm915_vm2, %v7916_v54, 0 }
 0x49e   :  { %v1358_v2 = vpop.permute.xlu1 %1357  ;;  %v7103_v35 = vpop.eup %7102 }
 0x49f   :  { %6194 = vmatpush3.bf16.msra.mxu0 %v1358_v2  ;;  %v1223_v40 = vmul.f32 %v7103_v35, %v7981_v44  ;;  %v1509_v2 = vsel %vm915_vm2, %v8067_v51, 0 }
 0x4a0   :  { %6211 = vmatprep.subr.bf16.mxu0 %v7382_v13 }
 0x4a2   :  { %v7105_v39 = vpop.eup %7104 }
 0x4a3   :  { %v1224_v8 = vmul.f32 %v7105_v39, %v7985_v9 }
 0x4a5   :  { %v1230_v21 = vpack.c.bf16 %v1224_v8, %v1223_v40 }
 0x4a7   :  { %6184 = vmatmul.mubr.msk.bf16.vlgmr.msra.gmra.mxu1 %vm1140_vm3, %v1230_v21 }
 0x4a8   :  { %6200 = vmatpush3.bf16.msra.mxu1 %v7967_v4  ;;  %6207 = vmatprep.mubr.msk.bf16.mxu1 %vm7383_vm1, %v7382_v13  ;;  %v7107_v9 = vpop.eup %7106 }
 0x4a9   :  { %6201 = vmatprep.subr.bf16.mxu1 %v7382_v13  ;;  %v1225_v63 = vmul.f32 %v7107_v9, %v7989_v49 }
 0x4ac   :  { %6202 = vmatpush3.bf16.msra.mxu1 %v8010_v27 }
 0x4ad   :  { %6203 = vmatprep.subr.bf16.mxu1 %v7382_v13 }
 0x4b0   :  { %6204 = vmatpush3.bf16.msra.mxu1 %v1420_v12 }
 0x4b1   :  { %6205 = vmatprep.subr.bf16.mxu1 %v7382_v13 }
 0x4c9   :  { %v1206_v42 = vpop.xlane.xlu0 %1205 }
 0x4ca   :  { %7108 = vrcp.f32 %v1206_v42 }
 0x4cd   :  { %v1209_v43 = vpop.xlane.xlu0 %1208 }
 0x4ce   :  { %7110 = vrcp.f32 %v1209_v43 }
 0x4cf   :  { %v1212_v44 = vpop.xlane.xlu1 %1211 }
 0x4d0   :  { %7112 = vrcp.f32 %v1212_v44 }
 0x4d1   :  { %v1418_v4 = vpop.permute.xlu0 %1417 }
 0x4d2   :  { %6206 = vmatpush3.bf16.msra.mxu1 %v1418_v4 }
 0x4d3   :  { %6223 = vmatprep.subr.bf16.mxu1 %v7382_v13  ;;  %v6727_v28 = vpop.permute.xlu1 %6726 }
 0x4d4   :  { %v6729_v23 = vunpack.i.h.bf16 %v6727_v28  ;;  %v6728_v56 = vunpack.i.l.bf16 %v6727_v28 }
 0x4d5   :  { %v6732_v1 = vpop.permute.xlu0 %6731 }
 0x4d6   :  { %v898_v55 = vpack.c.bf16 %v6729_v23, %v6728_v56  ;;  %v6734_v57 = vunpack.i.h.bf16 %v6732_v1  ;;  %v6733_v60 = vunpack.i.l.bf16 %v6732_v1 }
 0x4d7   :  { %v7109_v53 = vpop.eup %7108  ;;  %v6737_v61 = vpop.permute.xlu1 %6736 }
 0x4d8   :  { %v1226_v10 = vmul.f32 %v7109_v53, %v7998_v37  ;;  %1891 = vrot.lane.b32.xlu1 %v898_v55, %s7387_s15  ;;  %v897_v16 = vpack.c.bf16 %v6734_v57, %v6733_v60  ;;  %v6739_v52 = vunpack.i.h.bf16 %v6737_v61  ;;  %v6738_v59 = vunpack.i.l.bf16 %v6737_v61 }
 0x4d9   :  { %v6742_v11 = vpop.permute.xlu0 %6741  ;;  %v1574_v48 = vsel %vm915_vm2, %v898_v55, 0 }
 0x4da   :  { %v1231_v14 = vpack.c.bf16 %v1226_v10, %v1225_v63  ;;  %v6744_v37 = vunpack.i.h.bf16 %v6742_v11  ;;  %v6743_v3 = vunpack.i.l.bf16 %v6742_v11  ;;  %v896_v22 = vpack.c.bf16 %v6739_v52, %v6738_v59 }
 0x4db   :  { %v7111_v27 = vpop.eup %7110  ;;  %v6747_v17 = vpop.permute.xlu1 %6746 }
 0x4dc   :  { %6196 = vmatmul.mubr.msk.bf16.vlgmr.msra.gmra.mxu0 %vm1140_vm3, %v1231_v14  ;;  %v6749_v30 = vunpack.i.h.bf16 %v6747_v17  ;;  %v6748_v18 = vunpack.i.l.bf16 %v6747_v17  ;;  %1889 = vrot.lane.b32.xlu1 %v897_v16, %s7387_s15  ;;  %v1227_v31 = vmul.f32 %v7111_v27, %v8002_v36  ;;  %v895_v45 = vpack.c.bf16 %v6744_v37, %v6743_v3 }
 0x4dd   :  { %6212 = vmatpush3.bf16.xpose.msra.mxu0 %v1518_v32  ;;  %v7113_v49 = vpop.eup %7112  ;;  %6219 = vmatprep.mubr.msk.bf16.mxu0 %vm7383_vm1, %v7382_v13  ;;  %v6752_v0 = vpop.permute.xlu0 %6751  ;;  %v1568_v41 = vsel %vm915_vm2, %v896_v22, 0 }
 0x4de   :  { %6213 = vmatprep.subr.bf16.mxu0 %v7382_v13  ;;  %v906_v46 = vpack.c.bf16 %v6749_v30, %v6748_v18  ;;  %v1228_v47 = vmul.f32 %v7113_v49, %v8004_v24  ;;  %v6754_v38 = vunpack.i.h.bf16 %v6752_v0  ;;  %v6753_v6 = vunpack.i.l.bf16 %v6752_v0 }
 0x4df   :  { %v1571_v24 = vsel %vm915_vm2, %v897_v16, 0  ;;  %v6757_v39 = vpop.permute.xlu1 %6756  ;;  %v1565_v54 = vsel %vm915_vm2, %v895_v45, 0 }
 0x4e0   :  { %1951 = vrot.lane.b32.xlu0 %v906_v46, %s7387_s15  ;;  %1887 = vrot.lane.b32.xlu1 %v896_v22, %s7387_s15  ;;  %v1232_v26 = vpack.c.bf16 %v1228_v47, %v1227_v31  ;;  %v914_v36 = vpack.c.bf16 %v6754_v38, %v6753_v6  ;;  %v1630_v21 = vsel %vm915_vm2, %v906_v46, 0  ;;  %v6759_v51 = vunpack.i.h.bf16 %v6757_v39 }
 0x4e1   :  { %v6762_v35 = vpop.permute.xlu0 %6761  ;;  %v6758_v12 = vunpack.i.l.bf16 %v6757_v39 }
 0x4e2   :  { %6208 = vmatmul.mubr.msk.bf16.vlgmr.msra.gmra.mxu1 %vm1140_vm3, %v1232_v26  ;;  %v6764_v40 = vunpack.i.h.bf16 %v6762_v35  ;;  %v6763_v8 = vunpack.i.l.bf16 %v6762_v35 }
 0x4e3   :  { %6224 = vmatpush3.bf16.xpose.msra.mxu1 %v1574_v48  ;;  %6231 = vmatprep.mubr.msk.bf16.mxu1 %vm7383_vm1, %v7382_v13  ;;  %v6767_v42 = vpop.permute.xlu1 %6766  ;;  %v718_v44 = vpack.c.bf16 %v6759_v51, %v6758_v12 }
 0x4e4   :  { %1885 = vrot.lane.b32.xlu1 %v895_v45, %s7387_s15  ;;  %6225 = vmatprep.subr.bf16.mxu1 %v7382_v13  ;;  %v8127_v43 = vpack.c.bf16 %v6764_v40, %v6763_v8  ;;  %v6769_v5 = vunpack.i.h.bf16 %v6767_v42  ;;  %v6768_v15 = vunpack.i.l.bf16 %v6767_v42 }
 0x4e5   :  { %6214 = vmatpush3.bf16.xpose.msra.mxu0 %v1515_v50  ;;  %v6772_v4 = vpop.permute.xlu0 %6771 }
 0x4e6   :  { %6215 = vmatprep.subr.bf16.mxu0 %v7382_v13  ;;  %v6774_v28 = vunpack.i.h.bf16 %v6772_v4  ;;  %v6773_v9 = vunpack.i.l.bf16 %v6772_v4  ;;  %v1627_v23 = vsel %vm915_vm2, %v8127_v43, 0  ;;  %v8137_v56 = vpack.c.bf16 %v6769_v5, %v6768_v15 }
 0x4e7   :  { %v6777_v1 = vpop.permute.xlu1 %6776 }
 0x4e8   :  { %2011 = vrot.lane.b32.xlu1 %v914_v36, %s7387_s15  ;;  %v8139_v53 = vpack.c.bf16 %v6774_v28, %v6773_v9  ;;  %v6779_v57 = vunpack.i.h.bf16 %v6777_v1  ;;  %v6778_v60 = vunpack.i.l.bf16 %v6777_v1  ;;  %v1683_v61 = vsel %vm915_vm2, %v8137_v56, 0 }
 0x4e9   :  { %v6782_v55 = vpop.permute.xlu0 %6781 }
 0x4ea   :  { %v6784_v63 = vunpack.i.h.bf16 %v6782_v55  ;;  %v6783_v10 = vunpack.i.l.bf16 %v6782_v55  ;;  %v1624_v11 = vsel %vm915_vm2, %v8139_v53, 0  ;;  %v8147_v14 = vpack.c.bf16 %v6779_v57, %v6778_v60 }
 0x4eb   :  { %6226 = vmatpush3.bf16.xpose.msra.mxu1 %v1571_v24  ;;  %v6787_v16 = vpop.permute.xlu1 %6786 }
 0x4ec   :  { %6227 = vmatprep.subr.bf16.mxu1 %v7382_v13  ;;  %v8149_v59 = vpack.c.bf16 %v6784_v63, %v6783_v10  ;;  %v6789_v27 = vunpack.i.h.bf16 %v6787_v16  ;;  %v6788_v17 = vunpack.i.l.bf16 %v6787_v16  ;;  %v1680_v32 = vsel %vm915_vm2, %v8147_v14, 0 }
 0x4ed   :  { %6216 = vmatpush3.bf16.xpose.msra.mxu0 %v1512_v29  ;;  %v6792_v52 = vpop.permute.xlu0 %6791 }
 0x4ee   :  { %6217 = vmatprep.subr.bf16.mxu0 %v7382_v13  ;;  %v1621_v30 = vsel %vm915_vm2, %v8149_v59, 0  ;;  %v6794_v18 = vunpack.i.h.bf16 %v6792_v52  ;;  %v6793_v49 = vunpack.i.l.bf16 %v6792_v52  ;;  %v8157_v3 = vpack.c.bf16 %v6789_v27, %v6788_v17 }
 0x4ef   :  { %v6797_v46 = vpop.permute.xlu1 %6796 }
 0x4f0   :  { %v720_v22 = vpack.c.bf16 %v6794_v18, %v6793_v49  ;;  %v1677_v31 = vsel %vm915_vm2, %v8157_v3, 0  ;;  %v6799_v0 = vunpack.i.h.bf16 %v6797_v46  ;;  %v6798_v26 = vunpack.i.l.bf16 %v6797_v46 }
 0x4f1   :  { %v1832_v37 = vpop.permute.xlu0 %1831 }
 0x4f2   :  { %v722_v38 = vpack.c.bf16 %v6799_v0, %v6798_v26 }
 0x4f3   :  { %6228 = vmatpush3.bf16.xpose.msra.mxu1 %v1568_v41 }
 0x4f4   :  { %6229 = vmatprep.subr.bf16.mxu1 %v7382_v13 }
 0x4f5   :  { %6218 = vmatpush3.bf16.xpose.msra.mxu0 %v1509_v2  ;;  %v1830_v47 = vpop.permute.xlu0 %1829 }
 0x4f6   :  { %6235 = vmatprep.subr.bf16.mxu0 %v7382_v13 }
 0x4f9   :  { %v1828_v48 = vpop.permute.xlu0 %1827 }
 0x4fb   :  { %6230 = vmatpush3.bf16.xpose.msra.mxu1 %v1565_v54 }
 0x4fc   :  { %6220 = vmatmul.mubr.msk.bf16.vlgmr.msra.gmra.mxu0 %vm915_vm2, %v716_v33  ;;  %6247 = vmatprep.subr.bf16.mxu1 %v7382_v13  ;;  %v1686_v33 = vsel %vm915_vm2, %v914_v36, 0 }
 0x4fd   :  { %6236 = vmatpush3.bf16.xpose.msra.mxu0 %v1630_v21  ;;  %6243 = vmatprep.mubr.msk.bf16.mxu0 %vm7383_vm1, %v7382_v13  ;;  %v1826_v24 = vpop.permute.xlu0 %1825 }
 0x4fe   :  { %6237 = vmatprep.subr.bf16.mxu0 %v7382_v13 }
 0x502   :  { %6232 = vmatmul.mubr.msk.bf16.vlgmr.msra.gmra.mxu1 %vm915_vm2, %v718_v44 }
 0x503   :  { %6248 = vmatpush3.bf16.xpose.msra.mxu1 %v1686_v33  ;;  %6255 = vmatprep.mubr.msk.bf16.mxu1 %vm7383_vm1, %v7382_v13 }
 0x504   :  { %6249 = vmatprep.subr.bf16.mxu1 %v7382_v13 }
 0x505   :  { %6238 = vmatpush3.bf16.xpose.msra.mxu0 %v1627_v23 }
 0x506   :  { %6239 = vmatprep.subr.bf16.mxu0 %v7382_v13 }
 0x50b   :  { %6250 = vmatpush3.bf16.xpose.msra.mxu1 %v1683_v61 }
 0x50c   :  { %6251 = vmatprep.subr.bf16.mxu1 %v7382_v13 }
 0x50d   :  { %6240 = vmatpush3.bf16.xpose.msra.mxu0 %v1624_v11 }
 0x50e   :  { %6241 = vmatprep.subr.bf16.mxu0 %v7382_v13 }
 0x513   :  { %6252 = vmatpush3.bf16.xpose.msra.mxu1 %v1680_v32 }
 0x514   :  { %6253 = vmatprep.subr.bf16.mxu1 %v7382_v13 }
 0x515   :  { %6242 = vmatpush3.bf16.xpose.msra.mxu0 %v1621_v30 }
 0x516   :  { %6259 = vmatprep.subr.bf16.mxu0 %v7382_v13 }
 0x51b   :  { %6254 = vmatpush3.bf16.xpose.msra.mxu1 %v1677_v31 }
 0x51c   :  { %6244 = vmatmul.mubr.msk.bf16.vlgmr.msra.gmra.mxu0 %vm915_vm2, %v720_v22  ;;  %6271 = vmatprep.subr.bf16.mxu1 %v7382_v13 }
 0x51d   :  { %6260 = vmatpush3.bf16.msra.mxu0 %v1832_v37  ;;  %6267 = vmatprep.mubr.msk.bf16.mxu0 %vm7383_vm1, %v7382_v13 }
 0x51e   :  { %6261 = vmatprep.subr.bf16.mxu0 %v7382_v13 }
 0x51f   :  { %v8166_v45 = vpop.f32.mrf.mxu1 }
 0x521   :  { %6262 = vmatpush3.bf16.msra.mxu0 %v1830_v47  ;;  %v6173_v6 = vpop.f32.mrf.mxu1 }
 0x522   :  { %6263 = vmatprep.subr.bf16.mxu0 %v7382_v13  ;;  %6256 = vmatmul.mubr.msk.bf16.vlgmr.msra.gmra.mxu1 %vm915_vm2, %v722_v38 }
 0x523   :  { %v8170_v50 = vpop.f32.mrf.mxu1  ;;  %6279 = vmatprep.mubr.msk.bf16.mxu1 %vm7383_vm1, %v7382_v13 }
 0x525   :  { %6264 = vmatpush3.bf16.msra.mxu0 %v1828_v48  ;;  %v6174_v36 = vpop.f32.mrf.mxu1 }
 0x526   :  { %6265 = vmatprep.subr.bf16.mxu0 %v7382_v13 }
 0x529   :  { %6266 = vmatpush3.bf16.msra.mxu0 %v1826_v24 }
 0x52a   :  { %6283 = vmatprep.subr.bf16.mxu0 %v7382_v13 }
 0x54a   :  { %v1892_v29 = vpop.permute.xlu1 %1891 }
 0x54b   :  { %6272 = vmatpush3.bf16.msra.mxu1 %v1892_v29 }
 0x54c   :  { %6273 = vmatprep.subr.bf16.mxu1 %v7382_v13 }
 0x54e   :  { %v1890_v41 = vpop.permute.xlu1 %1889 }
 0x54f   :  { %6274 = vmatpush3.bf16.msra.mxu1 %v1890_v41 }
 0x550   :  { %6275 = vmatprep.subr.bf16.mxu1 %v7382_v13 }
 0x552   :  { %v1888_v2 = vpop.permute.xlu1 %1887  ;;  %v8210_v38 = vpop.permute.xlu0 %1951 }
 0x553   :  { %6276 = vmatpush3.bf16.msra.mxu1 %v1888_v2 }
 0x554   :  { %6277 = vmatprep.subr.bf16.mxu1 %v7382_v13 }
 0x556   :  { %v1886_v35 = vpop.permute.xlu1 %1885 }
 0x557   :  { %6278 = vmatpush3.bf16.msra.mxu1 %v1886_v35 }
 0x558   :  { %6295 = vmatprep.subr.bf16.mxu1 %v7382_v13 }
 0x55a   :  { %v8212_v6 = vpop.permute.xlu1 %2011 }
 0x567   :  { %v8180_v39 = vpop.f32.mrf.mxu1 }
 0x569   :  { %v6185_v54 = vpop.f32.mrf.mxu1 }
 0x56b   :  { %v8182_v40 = vpop.f32.mrf.mxu1 }
 0x56c   :  { %v6800_v8 = vpack.i.bf16 %v8182_v40, %v8180_v39 }
 0x56d   :  { %v6186_v21 = vpop.f32.mrf.mxu1 }
 0x59c   :  { %v8186_v51 = vpop.f32.mrf.mxu0 }
 0x59e   :  { %v6197_v12 = vpop.f32.mrf.mxu0 }
 0x5a0   :  { %v8188_v42 = vpop.f32.mrf.mxu0 }
 0x5a1   :  { %v6805_v44 = vpack.i.bf16 %v8188_v42, %v8186_v51 }
 0x5a2   :  { %v6198_v4 = vpop.f32.mrf.mxu0  ;;  %v8192_v5 = vpop.f32.mrf.mxu1 }
 0x5a4   :  { %v6209_v15 = vpop.f32.mrf.mxu1 }
 0x5a6   :  { %v8194_v33 = vpop.f32.mrf.mxu1 }
 0x5a7   :  { %v6810_v28 = vpack.i.bf16 %v8194_v33, %v8192_v5 }
 0x5a8   :  { %v6210_v9 = vpop.f32.mrf.mxu1 }
 0x5bc   :  { %v1554_v23 = vpop.f32.mrf.mxu0 }
 0x5bd   :  { %v1729_v1 = vsel %vm1140_vm3, %v1554_v23, -inf }
 0x5be   :  { %1730 = vmax.xlane.f32.xlu0 %v1729_v1  ;;  %v6221_v55 = vpop.f32.mrf.mxu0 }
 0x5c0   :  { %v1557_v57 = vpop.f32.mrf.mxu0 }
 0x5c1   :  { %v1732_v60 = vsel %vm1140_vm3, %v1557_v57, -inf }
 0x5c2   :  { %v6222_v61 = vpop.f32.mrf.mxu0  ;;  %1733 = vmax.xlane.f32.xlu1 %v1732_v60  ;;  %v1610_v63 = vpop.f32.mrf.mxu1 }
 0x5c3   :  { %v1735_v10 = vsel %vm1140_vm3, %v1610_v63, -inf }
 0x5c4   :  { %1736 = vmax.xlane.f32.xlu0 %v1735_v10  ;;  %v6233_v11 = vpop.f32.mrf.mxu1 }
 0x5c6   :  { %v1613_v16 = vpop.f32.mrf.mxu1 }
 0x5c7   :  { %v1738_v49 = vsel %vm1140_vm3, %v1613_v16, -inf }
 0x5c8   :  { %v6234_v52 = vpop.f32.mrf.mxu1 }
 0x5dc   :  { %v1666_v27 = vpop.f32.mrf.mxu0 }
 0x5dd   :  { %v1741_v17 = vsel %vm1140_vm3, %v1666_v27, -inf }
 0x5de   :  { %v6245_v32 = vpop.f32.mrf.mxu0  ;;  %1742 = vmax.xlane.f32.xlu0 %v1741_v17 }
 0x5e0   :  { %v1669_v30 = vpop.f32.mrf.mxu0 }
 0x5e1   :  { %v1744_v18 = vsel %vm1140_vm3, %v1669_v30, -inf }
 0x5e2   :  { %v6246_v37 = vpop.f32.mrf.mxu0  ;;  %1745 = vmax.xlane.f32.xlu1 %v1744_v18  ;;  %1739 = vmax.xlane.f32.xlu0 %v1738_v49  ;;  %v1722_v22 = vpop.f32.mrf.mxu1 }
 0x5e3   :  { %v1747_v31 = vsel %vm1140_vm3, %v1722_v22, -inf }
 0x5e4   :  { %v6257_v46 = vpop.f32.mrf.mxu1 }
 0x5e6   :  { %1748 = vmax.xlane.f32.xlu0 %v1747_v31  ;;  %v1725_v47 = vpop.f32.mrf.mxu1 }
 0x5e7   :  { %v1750_v0 = vsel %vm1140_vm3, %v1725_v47, -inf }
 0x5e8   :  { %1751 = vmax.xlane.f32.xlu1 %v1750_v0  ;;  %v6258_v26 = vpop.f32.mrf.mxu1 }
 0x5f9   :  { %2009 = vrot.lane.b32.xlu1 %v8137_v56, %s7387_s15 }
 0x5fc   :  { %1949 = vrot.lane.b32.xlu0 %v8127_v43, %s7387_s15 }
 0x647   :  { %v1731_v48 = vpop.xlane.xlu0 %1730 }
 0x648   :  { %v1753_v36 = vsub.f32 %v1554_v23, %v1731_v48 }
 0x64a   :  { %v1761_v24 = vmul.f32 1.442695, %v1753_v36 }
 0x64b   :  { %v1734_v29 = vpop.xlane.xlu1 %1733 }
 0x64c   :  { %7114 = vpow2.f32 %v1761_v24  ;;  %v1754_v41 = vsub.f32 %v1557_v57, %v1734_v29 }
 0x64d   :  { %v1737_v35 = vpop.xlane.xlu0 %1736 }
 0x64e   :  { %v1763_v2 = vmul.f32 1.442695, %v1754_v41  ;;  %v1755_v54 = vsub.f32 %v1610_v63, %v1737_v35 }
 0x650   :  { %7116 = vpow2.f32 %v1763_v2  ;;  %v1765_v21 = vmul.f32 1.442695, %v1755_v54 }
 0x652   :  { %7118 = vpow2.f32 %v1765_v21 }
 0x659   :  { %v7115_v56 = vpop.eup %7114 }
 0x65a   :  { %v1777_v12 = vsel %vm1140_vm3, %v7115_v56, 0.0 }
 0x65b   :  { %1778 = vadd.xlane.f32.xlu0 %v1777_v12 }
 0x65d   :  { %v7117_v43 = vpop.eup %7116 }
 0x65e   :  { %v1780_v4 = vsel %vm1140_vm3, %v7117_v43, 0.0 }
 0x65f   :  { %1781 = vadd.xlane.f32.xlu1 %v1780_v4  ;;  %v8216_v15 = vpop.eup %7118 }
 0x660   :  { %v1783_v9 = vsel %vm1140_vm3, %v8216_v15, 0.0 }
 0x661   :  { %1784 = vadd.xlane.f32.xlu0 %v1783_v9 }
 0x667   :  { %v1743_v23 = vpop.xlane.xlu0 %1742 }
 0x668   :  { %v1757_v55 = vsub.f32 %v1666_v27, %v1743_v23 }
 0x66a   :  { %v1769_v61 = vmul.f32 1.442695, %v1757_v55 }
 0x66b   :  { %v1740_v1 = vpop.xlane.xlu0 %1739  ;;  %v1746_v10 = vpop.xlane.xlu1 %1745 }
 0x66c   :  { %v1756_v63 = vsub.f32 %v1613_v16, %v1740_v1  ;;  %7120 = vpow2.f32 %v1769_v61  ;;  %v1758_v52 = vsub.f32 %v1669_v30, %v1746_v10 }
 0x66e   :  { %v1767_v17 = vmul.f32 1.442695, %v1756_v63  ;;  %v1771_v18 = vmul.f32 1.442695, %v1758_v52 }
 0x66f   :  { %v1749_v57 = vpop.xlane.xlu0 %1748 }
 0x670   :  { %2007 = vrot.lane.b32.xlu1 %v8147_v14, %s7387_s15  ;;  %v1759_v60 = vsub.f32 %v1722_v22, %v1749_v57 }
 0x671   :  { %v1752_v32 = vpop.xlane.xlu1 %1751 }
 0x672   :  { %v1773_v11 = vmul.f32 1.442695, %v1759_v60  ;;  %v1760_v49 = vsub.f32 %v1725_v47, %v1752_v32 }
 0x674   :  { %7122 = vpow2.f32 %v1773_v11  ;;  %v1775_v14 = vmul.f32 1.442695, %v1760_v49 }
 0x675   :  { %7124 = vpow2.f32 %v1767_v17  ;;  %v8257_v26 = vpop.permute.xlu1 %2009 }
 0x676   :  { %7126 = vpow2.f32 %v1771_v18 }
 0x677   :  { %1947 = vrot.lane.b32.xlu0 %v8139_v53, %s7387_s15  ;;  %7128 = vpow2.f32 %v1775_v14 }
 0x679   :  { %v8224_v37 = vpop.eup %7120 }
 0x67a   :  { %v1789_v16 = vsel %vm1140_vm3, %v8224_v37, 0.0 }
 0x681   :  { %v8226_v53 = vpop.eup %7122 }
 0x682   :  { %v7125_v27 = vpop.eup %7124  ;;  %v1795_v30 = vsel %vm1140_vm3, %v8226_v53, 0.0 }
 0x683   :  { %v1786_v22 = vsel %vm1140_vm3, %v7125_v27, 0.0  ;;  %v8233_v46 = vpop.eup %7126 }
 0x684   :  { %v1792_v31 = vsel %vm1140_vm3, %v8233_v46, 0.0  ;;  %v8237_v47 = vpop.eup %7128 }
 0x685   :  { %v1798_v0 = vsel %vm1140_vm3, %v8237_v47, 0.0 }
 0x694   :  { %1790 = vadd.xlane.f32.xlu1 %v1789_v16 }
 0x696   :  { %1796 = vadd.xlane.f32.xlu0 %v1795_v30 }
 0x698   :  { %1787 = vadd.xlane.f32.xlu1 %v1786_v22 }
 0x69c   :  { %1793 = vadd.xlane.f32.xlu1 %v1792_v31 }
 0x6a0   :  { %1799 = vadd.xlane.f32.xlu1 %v1798_v0 }
 0x6ac   :  { %1945 = vrot.lane.b32.xlu0 %v8149_v59, %s7387_s15  ;;  %v1950_v59 = vpop.permute.xlu0 %1949 }
 0x6b0   :  { %6801 = vrot.lane.b32.xlu0 %v6800_v8, %s7388_s16 }
 0x6b1   :  { %2005 = vrot.lane.b32.xlu1 %v8157_v3, %s7387_s15 }
 0x6b5   :  { %6806 = vrot.lane.b32.xlu1 %v6805_v44, %s7389_s17 }
 0x6b9   :  { %6811 = vrot.lane.b32.xlu1 %v6810_v28, %s7390_s18 }
 0x6e4   :  { %v1779_v39 = vpop.xlane.xlu0 %1778 }
 0x6e5   :  { %7130 = vrcp.f32 %v1779_v39 }
 0x6e8   :  { %v1782_v40 = vpop.xlane.xlu1 %1781 }
 0x6e9   :  { %7132 = vrcp.f32 %v1782_v40 }
 0x6ea   :  { %v1785_v51 = vpop.xlane.xlu0 %1784 }
 0x6eb   :  { %7134 = vrcp.f32 %v1785_v51 }
 0x6ec   :  { %v2008_v44 = vpop.permute.xlu1 %2007 }
 0x6ee   :  { %v1948_v42 = vpop.permute.xlu0 %1947 }
 0x6f2   :  { %v7131_v3 = vpop.eup %7130 }
 0x6f3   :  { %v1809_v48 = vmul.f32 %v7131_v3, %v7115_v56 }
 0x6f6   :  { %v7133_v8 = vpop.eup %7132 }
 0x6f7   :  { %v1810_v36 = vmul.f32 %v7133_v8, %v7117_v43 }
 0x6f8   :  { %v7135_v2 = vpop.eup %7134 }
 0x6f9   :  { %v1817_v24 = vpack.c.bf16 %v1810_v36, %v1809_v48  ;;  %v1811_v56 = vmul.f32 %v7135_v2, %v8216_v15 }
 0x6fb   :  { %6268 = vmatmul.mubr.msk.bf16.vlgmr.msra.gmra.mxu0 %vm1140_vm3, %v1817_v24  ;;  %v7015_v24 = vld [vmem:[%s9299_s5] sm:$0xff]  }
 0x6fc   :  { %6284 = vmatpush3.bf16.msra.mxu0 %v8210_v38  ;;  %6291 = vmatprep.mubr.msk.bf16.mxu0 %vm7383_vm1, %v7382_v13 }
 0x6fd   :  { %6285 = vmatprep.subr.bf16.mxu0 %v7382_v13 }
 0x700   :  { %6286 = vmatpush3.bf16.msra.mxu0 %v1950_v59 }
 0x701   :  { %6287 = vmatprep.subr.bf16.mxu0 %v7382_v13 }
 0x704   :  { %6288 = vmatpush3.bf16.msra.mxu0 %v1948_v42 }
 0x705   :  { %6289 = vmatprep.subr.bf16.mxu0 %v7382_v13 }
 0x71d   :  { %v1791_v5 = vpop.xlane.xlu1 %1790 }
 0x71f   :  { %v1797_v33 = vpop.xlane.xlu0 %1796 }
 0x721   :  { %v1788_v28 = vpop.xlane.xlu1 %1787 }
 0x722   :  { %7136 = vrcp.f32 %v1788_v28 }
 0x723   :  { %7138 = vrcp.f32 %v1791_v5  ;;  %v1946_v38 = vpop.permute.xlu0 %1945 }
 0x724   :  { %6290 = vmatpush3.bf16.msra.mxu0 %v1946_v38 }
 0x725   :  { %v1794_v29 = vpop.xlane.xlu1 %1793 }
 0x726   :  { %7140 = vrcp.f32 %v1794_v29 }
 0x727   :  { %v6802_v54 = vpop.permute.xlu0 %6801 }
 0x728   :  { %v6804_v4 = vunpack.i.h.bf16 %v6802_v54  ;;  %v6803_v23 = vunpack.i.l.bf16 %v6802_v54 }
 0x729   :  { %v1800_v41 = vpop.xlane.xlu1 %1799 }
 0x72a   :  { %7142 = vrcp.f32 %v1800_v41  ;;  %v1498_v10 = vsel %vm915_vm2, %v8170_v50, %v6804_v4  ;;  %v1497_v11 = vsel %vm915_vm2, %v8166_v45, %v6803_v23 }
 0x72b   :  { %7144 = vrcp.f32 %v1797_v33 }
 0x72d   :  { %v2006_v35 = vpop.permute.xlu1 %2005 }
 0x72f   :  { %v7137_v21 = vpop.eup %7136 }
 0x730   :  { %v1812_v12 = vmul.f32 %v7137_v21, %v7125_v27  ;;  %v7139_v43 = vpop.eup %7138 }
 0x731   :  { %v6807_v9 = vpop.permute.xlu1 %6806  ;;  %v1813_v61 = vmul.f32 %v7139_v43, %v8224_v37 }
 0x732   :  { %v1818_v1 = vpack.c.bf16 %v1812_v12, %v1811_v56  ;;  %v6809_v57 = vunpack.i.h.bf16 %v6807_v9  ;;  %v6808_v60 = vunpack.i.l.bf16 %v6807_v9 }
 0x733   :  { %v7141_v55 = vpop.eup %7140 }
 0x734   :  { %6280 = vmatmul.mubr.msk.bf16.vlgmr.msra.gmra.mxu1 %vm1140_vm3, %v1818_v1  ;;  %v1814_v63 = vmul.f32 %v7141_v55, %v8233_v46  ;;  %v1501_v18 = vsel %vm1499_vm4, %v1498_v10, %v6809_v57  ;;  %v1500_v49 = vsel %vm1499_vm4, %v1497_v11, %v6808_v60  ;;  %v2166_v60 = vsub.s32 6, %v7660_v62  ;;  %v7338_v10 = vld [vmem:[%s9294_s0 + $0x10] sm:$0xff]  ;;  %v8313_v11 = vld [vmem:[%s9296_s2] sm:$0xff] }
 0x735   :  { %6296 = vmatpush3.bf16.msra.mxu1 %v8212_v6  ;;  %v6812_v15 = vpop.permute.xlu1 %6811  ;;  %6303 = vmatprep.mubr.msk.bf16.mxu1 %vm7383_vm1, %v7382_v13 }
 0x736   :  { %v6814_v52 = vunpack.i.h.bf16 %v6812_v15  ;;  %v6813_v17 = vunpack.i.l.bf16 %v6812_v15  ;;  %6297 = vmatprep.subr.bf16.mxu1 %v7382_v13  ;;  %v1819_v32 = vpack.c.bf16 %v1814_v63, %v1813_v61 }
 0x737   :  { %v7143_v45 = vpop.eup %7142 }
 0x738   :  { %v1503_v50 = vsel %vm1502_vm5, %v1500_v49, %v6813_v17  ;;  %v1504_v6 = vsel %vm1502_vm5, %v1501_v18, %v6814_v52  ;;  %6292 = vmatmul.mubr.msk.bf16.vlgmr.msra.gmra.mxu0 %vm1140_vm3, %v1819_v32  ;;  %v7145_v37 = vpop.eup %7144  ;;  %v1816_v16 = vmul.f32 %v7143_v45, %v8237_v47  ;;  %v2167_v52 = vrot.slane %v8313_v11, %v2166_v60  ;;  %v7340_v17 = vld [vmem:[%s9294_s0] sm:$0xff] }
 0x739   :  { %6298 = vmatpush3.bf16.msra.mxu1 %v8257_v26  ;;  %v2091_v14 = vpack.c.bf16 %v1504_v6, %v1503_v50  ;;  %v1815_v27 = vmul.f32 %v7145_v37, %v8226_v53  ;;  %v7014_v26 = vld [vmem:[%s9299_s5 + $0x8] sm:$0xff]  }
 0x73a   :  { %6299 = vmatprep.subr.bf16.mxu1 %v7382_v13  ;;  %6307 = vmatprep.subr.bf16.mxu0 %v7014_v26  ;;  %v7342_v37 = vld [vmem:[%s9294_s0 + $0x8] sm:$0xff] }
 0x73b   :  { %6311 = vmatprep.mubr.msk.bf16.mxu0 %vm139_vm0, %v2091_v14  ;;  %v1820_v30 = vpack.c.bf16 %v1816_v16, %v1815_v27  ;;  %6308 = vmatpush3.bf16.msra.mxu0 %v7014_v26  ;;  %v7341_v14 = vld [vmem:[%s9294_s0 + $0x18] sm:$0xff] }
 0x73c   :  { %6309 = vmatprep.subr.bf16.mxu0 %v7015_v24 }
 0x73d   :  { %6300 = vmatpush3.bf16.msra.mxu1 %v2008_v44 }
 0x73e   :  { %6301 = vmatprep.subr.bf16.mxu1 %v7382_v13 }
 0x73f   :  { %6310 = vmatpush3.bf16.msra.mxu0 %v7015_v24 }
 0x741   :  { %6302 = vmatpush3.bf16.msra.mxu1 %v2006_v35 }
 0x744   :  { %6304 = vmatmul.mubr.msk.bf16.vlgmr.msra.gmra.mxu1 %vm1140_vm3, %v1820_v30 }
 0x7bb   :  { %v1874_v22 = vpop.f32.mrf.mxu0 }
 0x7bd   :  { %v6269_v46 = vpop.f32.mrf.mxu0 }
 0x7bf   :  { %v1877_v31 = vpop.f32.mrf.mxu0 }
 0x7c1   :  { %v6270_v0 = vpop.f32.mrf.mxu0 }
 0x7f4   :  { %v1934_v59 = vpop.f32.mrf.mxu1 }
 0x7f6   :  { %v6281_v39 = vpop.f32.mrf.mxu1 }
 0x7f8   :  { %v1937_v40 = vpop.f32.mrf.mxu1  ;;  %v1994_v47 = vpop.f32.mrf.mxu0 }
 0x7f9   :  { %v6815_v3 = vpack.i.bf16 %v1937_v40, %v1934_v59 }
 0x7fa   :  { %v6282_v53 = vpop.f32.mrf.mxu1  ;;  %v6293_v8 = vpop.f32.mrf.mxu0 }
 0x7fb   :  { %6816 = vrot.lane.b32.xlu0 %v6815_v3, %s7388_s16 }
 0x7fc   :  { %v1997_v48 = vpop.f32.mrf.mxu0 }
 0x7fd   :  { %v6820_v36 = vpack.i.bf16 %v1997_v48, %v1994_v47 }
 0x7fe   :  { %v6294_v51 = vpop.f32.mrf.mxu0 }
 0x7ff   :  { %6821 = vrot.lane.b32.xlu0 %v6820_v36, %s7389_s17 }
 0x804   :  { %v2054_v42 = vpop.f32.mrf.mxu1 }
 0x806   :  { %v6305_v44 = vpop.f32.mrf.mxu1 }
 0x808   :  { %v2057_v5 = vpop.f32.mrf.mxu1 }
 0x809   :  { %v6825_v33 = vpack.i.bf16 %v2057_v5, %v2054_v42 }
 0x80a   :  { %v6306_v28 = vpop.f32.mrf.mxu1 }
 0x80b   :  { %6826 = vrot.lane.b32.xlu1 %v6825_v33, %s7390_s18 }
 0x86d   :  { %v6817_v38 = vpop.permute.xlu0 %6816 }
 0x86e   :  { %v6819_v41 = vunpack.i.h.bf16 %v6817_v38  ;;  %v6818_v2 = vunpack.i.l.bf16 %v6817_v38 }
 0x870   :  { %v2086_v56 = vsel %vm915_vm2, %v1877_v31, %v6819_v41  ;;  %v2085_v12 = vsel %vm915_vm2, %v1874_v22, %v6818_v2  ;;  %v7016_v2 = vld [vmem:[%s9300_s6 + $0x8] sm:$0xff]  }
 0x871   :  { %v6822_v29 = vpop.permute.xlu0 %6821  ;;  %6315 = vmatprep.subr.bf16.mxu1 %v7016_v2 }
 0x872   :  { %v6824_v35 = vunpack.i.h.bf16 %v6822_v29  ;;  %v6823_v54 = vunpack.i.l.bf16 %v6822_v29  ;;  %6316 = vmatpush3.bf16.msra.mxu1 %v7016_v2 }
 0x874   :  { %v2087_v9 = vsel %vm1499_vm4, %v2085_v12, %v6823_v54  ;;  %v2088_v23 = vsel %vm1499_vm4, %v2086_v56, %v6824_v35  ;;  %v7017_v35 = vld [vmem:[%s9300_s6] sm:$0xff]  }
 0x875   :  { %6317 = vmatprep.subr.bf16.mxu1 %v7017_v35 }
 0x876   :  { %6318 = vmatpush3.bf16.msra.mxu1 %v7017_v35 }
 0x87d   :  { %v6827_v21 = vpop.permute.xlu1 %6826 }
 0x87e   :  { %v6829_v43 = vunpack.i.h.bf16 %v6827_v21  ;;  %v6828_v4 = vunpack.i.l.bf16 %v6827_v21 }
 0x880   :  { %v2090_v1 = vsel %vm1502_vm5, %v2088_v23, %v6829_v43  ;;  %v2089_v55 = vsel %vm1502_vm5, %v2087_v9, %v6828_v4 }
 0x881   :  { %v2092_v57 = vpack.c.bf16 %v2090_v1, %v2089_v55 }
 0x883   :  { %6312 = vmatmul.mubr.msk.bf16.vlgmr.msra.gmra.mxu0 %vm139_vm0, %v2092_v57 }
 0x943   :  { %v6313_v61 = vpop.f32.mrf.mxu0 }
 0x944   :  { %v2162_v15 = vadd.f32 %v7338_v10, %v6313_v61 }
 0x945   :  { %v2145_v63 = vpop.f32.mrf.mxu0 }
 0x946   :  { %v2160_v32 = vadd.f32 %v7340_v17, %v2145_v63  ;;  %v8323_v6 = vadd.f32 %v2167_v52, %v2162_v15  ;;  %v2226_v63 = vsub.s32 7, %v7660_v62  ;;  %v8364_v17 = vld [vmem:[%s9296_s2 + $0x8] sm:$0xff] }
 0x947   :  { %v6314_v18 = vpop.f32.mrf.mxu0 }
 0x948   :  { %v8321_v49 = vadd.f32 %v2167_v52, %v2160_v32  ;;  %v2163_v45 = vadd.f32 %v7341_v14, %v6314_v18  ;;  %v2178_v46 = vsel %vm139_vm0, %v8323_v6, 0.0 }
 0x949   :  { %v2148_v50 = vpop.f32.mrf.mxu0 }
 0x94a   :  { %v2161_v16 = vadd.f32 %v7342_v37, %v2148_v50  ;;  %v2172_v27 = vsel %vm139_vm0, %v8321_v49, 0.0  ;;  %v8335_v22 = vadd.f32 %v2167_v52, %v2163_v45  ;;  %v2235_v37 = vrot.slane %v8364_v17, %v7688_v58 }
 0x94b   :  { %2173 = vadd.xlane.f32.xlu0 %v2172_v27 }
 0x94c   :  { %v8333_v30 = vadd.f32 %v2167_v52, %v2161_v16  ;;  %v2181_v0 = vsel %vm139_vm0, %v8335_v22, 0.0  ;;  %v2227_v52 = vrot.slane %v8313_v11, %v2226_v63 }
 0x94e   :  { %v2175_v31 = vsel %vm139_vm0, %v8333_v30, 0.0 }
 0x94f   :  { %2179 = vadd.xlane.f32.xlu0 %v2178_v46  ;;  %2176 = vadd.xlane.f32.xlu1 %v2175_v31 }
 0x953   :  { %2182 = vadd.xlane.f32.xlu0 %v2181_v0 }
 0x9d4   :  { %v2174_v59 = vpop.xlane.xlu0 %2173 }
 0x9d5   :  { %v2184_v26 = vmul.f32 0.03125, %v2174_v59 }
 0x9d7   :  { %v2188_v39 = vsub.f32 %v8321_v49, %v2184_v26 }
 0x9d8   :  { %v2180_v40 = vpop.xlane.xlu0 %2179  ;;  %v2177_v47 = vpop.xlane.xlu1 %2176 }
 0x9d9   :  { %v2186_v3 = vmul.f32 0.03125, %v2180_v40  ;;  %v2185_v53 = vmul.f32 0.03125, %v2177_v47  ;;  %v2192_v8 = vmul.f32 %v2188_v39, %v2188_v39 }
 0x9db   :  { %v2190_v48 = vsub.f32 %v8323_v6, %v2186_v3  ;;  %v2189_v36 = vsub.f32 %v8333_v30, %v2185_v53  ;;  %v2196_v24 = vsel %vm139_vm0, %v2192_v8, 0.0  ;;  %v7018_v3 = vld [vmem:[%s9301_s7 + $0x38] sm:$0xff]   ;;  %v7019_v53 = vld [vmem:[%s9301_s7 + $0x30] sm:$0xff]   ;;  %v7020_v8 = vld [vmem:[%s9301_s7 + $0x28] sm:$0xff]  }
 0x9dc   :  { %2197 = vadd.xlane.f32.xlu0 %v2196_v24  ;;  %v2183_v51 = vpop.xlane.xlu0 %2182  ;;  %6323 = vmatprep.subr.bf16.mxu0 %v7018_v3  ;;  %v7023_v24 = vld [vmem:[%s9301_s7 + $0x10] sm:$0xff]  }
 0x9dd   :  { %v2187_v42 = vmul.f32 0.03125, %v2183_v51  ;;  %v2194_v44 = vmul.f32 %v2190_v48, %v2190_v48  ;;  %v2193_v5 = vmul.f32 %v2189_v36, %v2189_v36  ;;  %6324 = vmatpush3.bf16.msra.mxu0 %v7018_v3  ;;  %v7024_v51 = vld [vmem:[%s9301_s7 + $0x8] sm:$0xff]  }
 0x9de   :  { %6325 = vmatprep.subr.bf16.mxu0 %v7019_v53 }
 0x9df   :  { %v2191_v33 = vsub.f32 %v8335_v22, %v2187_v42  ;;  %v2202_v28 = vsel %vm139_vm0, %v2194_v44, 0.0  ;;  %v2199_v38 = vsel %vm139_vm0, %v2193_v5, 0.0  ;;  %v7025_v42 = vld [vmem:[%s9301_s7] sm:$0xff]   ;;  %v2245_v44 = vrot.slane %v8364_v17, %v7717_v34 }
 0x9e0   :  { %2203 = vadd.xlane.f32.xlu0 %v2202_v28  ;;  %2200 = vadd.xlane.f32.xlu1 %v2199_v38 }
 0x9e1   :  { %v2195_v29 = vmul.f32 %v2191_v33, %v2191_v33  ;;  %6326 = vmatpush3.bf16.msra.mxu0 %v7019_v53 }
 0x9e2   :  { %6327 = vmatprep.subr.bf16.mxu0 %v7020_v8 }
 0x9e3   :  { %v2205_v41 = vsel %vm139_vm0, %v2195_v29, 0.0 }
 0x9e4   :  { %2206 = vadd.xlane.f32.xlu1 %v2205_v41 }
 0x9e5   :  { %6328 = vmatpush3.bf16.msra.mxu0 %v7020_v8 }
 0xa65   :  { %v2198_v54 = vpop.xlane.xlu0 %2197 }
 0xa66   :  { %v2208_v21 = vmul.f32 0.03125, %v2198_v54 }
 0xa68   :  { %v2212_v56 = vadd.f32 1e-05, %v2208_v21 }
 0xa69   :  { %v2204_v12 = vpop.xlane.xlu0 %2203  ;;  %v2201_v43 = vpop.xlane.xlu1 %2200 }
 0xa6a   :  { %7146 = vrsqrt.f32 %v2212_v56  ;;  %v2210_v4 = vmul.f32 0.03125, %v2204_v12  ;;  %v2209_v9 = vmul.f32 0.03125, %v2201_v43 }
 0xa6c   :  { %v2214_v23 = vadd.f32 1e-05, %v2210_v4  ;;  %v2213_v1 = vadd.f32 1e-05, %v2209_v9 }
 0xa6d   :  { %v2207_v55 = vpop.xlane.xlu1 %2206 }
 0xa6e   :  { %7148 = vrsqrt.f32 %v2214_v23  ;;  %v2211_v57 = vmul.f32 0.03125, %v2207_v55 }
 0xa6f   :  { %7150 = vrsqrt.f32 %v2213_v1 }
 0xa70   :  { %v2215_v61 = vadd.f32 1e-05, %v2211_v57 }
 0xa72   :  { %7152 = vrsqrt.f32 %v2215_v61 }
 0xa77   :  { %v7147_v10 = vpop.eup %7146 }
 0xa78   :  { %v2220_v15 = vmul.f32 %v7147_v10, %v2188_v39 }
 0xa7a   :  { %v2228_v45 = vmul.f32 %v2227_v52, %v2220_v15 }
 0xa7b   :  { %v7149_v32 = vpop.eup %7148 }
 0xa7c   :  { %v7151_v18 = vpop.eup %7150  ;;  %v2222_v50 = vmul.f32 %v7149_v32, %v2190_v48  ;;  %v2236_v0 = vadd.f32 %v2235_v37, %v2228_v45  ;;  %v7021_v48 = vld [vmem:[%s9301_s7 + $0x20] sm:$0xff]  }
 0xa7d   :  { %v2221_v14 = vmul.f32 %v7151_v18, %v2189_v36  ;;  %6329 = vmatprep.subr.bf16.mxu0 %v7021_v48  ;;  %v7022_v36 = vld [vmem:[%s9301_s7 + $0x18] sm:$0xff]  }
 0xa7e   :  { %v2230_v31 = vmul.f32 %v2227_v52, %v2222_v50  ;;  %6330 = vmatpush3.bf16.msra.mxu0 %v7021_v48 }
 0xa7f   :  { %v7153_v16 = vpop.eup %7152  ;;  %v2229_v27 = vmul.f32 %v2227_v52, %v2221_v14  ;;  %6331 = vmatprep.subr.bf16.mxu0 %v7022_v36 }
 0xa80   :  { %v2223_v46 = vmul.f32 %v7153_v16, %v2191_v33  ;;  %v2238_v39 = vadd.f32 %v2235_v37, %v2230_v31 }
 0xa81   :  { %v2237_v59 = vadd.f32 %v2235_v37, %v2229_v27 }
 0xa82   :  { %v2231_v11 = vmul.f32 %v2227_v52, %v2223_v46  ;;  %6332 = vmatpush3.bf16.msra.mxu0 %v7022_v36 }
 0xa83   :  { %v2240_v26 = vpack.c.bf16 %v2237_v59, %v2236_v0  ;;  %6333 = vmatprep.subr.bf16.mxu0 %v7023_v24 }
 0xa84   :  { %v2239_v40 = vadd.f32 %v2235_v37, %v2231_v11 }
 0xa85   :  { %6319 = vmatprep.mubr.msk.bf16.mxu1 %vm139_vm0, %v2240_v26 }
 0xa86   :  { %v2241_v47 = vpack.c.bf16 %v2239_v40, %v2238_v39  ;;  %6334 = vmatpush3.bf16.msra.mxu0 %v7023_v24 }
 0xa87   :  { %6335 = vmatprep.subr.bf16.mxu0 %v7024_v51 }
 0xa88   :  { %6320 = vmatmul.mubr.msk.bf16.vlgmr.msra.gmra.mxu1 %vm139_vm0, %v2241_v47 }
 0xa8a   :  { %6336 = vmatpush3.bf16.msra.mxu0 %v7024_v51 }
 0xa8b   :  { %6337 = vmatprep.subr.bf16.mxu0 %v7025_v42 }
 0xa8e   :  { %6338 = vmatpush3.bf16.msra.mxu0 %v7025_v42 }
 0xa8f   :  { %6371 = vmatprep.subr.bf16.mxu0 %v7382_v13 }
 0xb48   :  { %v6321_v5 = vpop.f32.mrf.mxu1 }
 0xb49   :  { %v2307_v33 = vadd.f32 %v6321_v5, %v2245_v44  ;;  %v2455_v5 = vrot.slane %v8364_v17, %v7663_v7 }
 0xb4a   :  { %v2298_v28 = vpop.f32.mrf.mxu1 }
 0xb4b   :  { %v2319_v38 = vmul.f32 0.044715, %v2307_v33  ;;  %v2299_v29 = vadd.f32 %v2298_v28, %v2245_v44  ;;  %v2315_v47 = vmul.f32 0.5, %v2307_v33 }
 0xb4c   :  { %v6322_v41 = vpop.f32.mrf.mxu1 }
 0xb4d   :  { %v2323_v2 = vmul.f32 %v2319_v38, %v2307_v33  ;;  %v2317_v35 = vmul.f32 0.044715, %v2299_v29  ;;  %v2310_v54 = vadd.f32 %v6322_v41, %v2245_v44  ;;  %v2313_v26 = vmul.f32 0.5, %v2299_v29 }
 0xb4e   :  { %v2301_v21 = vpop.f32.mrf.mxu1 }
 0xb4f   :  { %v2327_v56 = vmul.f32 %v2323_v2, %v2307_v33  ;;  %v2321_v12 = vmul.f32 %v2317_v35, %v2299_v29  ;;  %v2320_v43 = vmul.f32 0.044715, %v2310_v54  ;;  %v2302_v4 = vadd.f32 %v2301_v21, %v2245_v44 }
 0xb50   :  { %v2316_v59 = vmul.f32 0.5, %v2310_v54 }
 0xb51   :  { %v2331_v9 = vadd.f32 %v2327_v56, %v2307_v33  ;;  %v2325_v23 = vmul.f32 %v2321_v12, %v2299_v29  ;;  %v2324_v1 = vmul.f32 %v2320_v43, %v2310_v54  ;;  %v2318_v55 = vmul.f32 0.044715, %v2302_v4 }
 0xb52   :  { %v2314_v39 = vmul.f32 0.5, %v2302_v4 }
 0xb53   :  { %v2328_v57 = vmul.f32 %v2324_v1, %v2310_v54  ;;  %v2322_v61 = vmul.f32 %v2318_v55, %v2302_v4  ;;  %v2329_v10 = vadd.f32 %v2325_v23, %v2299_v29  ;;  %v2335_v15 = vmul.f32 0.7978846, %v2331_v9 }
 0xb55   :  { %v2332_v52 = vadd.f32 %v2328_v57, %v2310_v54  ;;  %v2326_v32 = vmul.f32 %v2322_v61, %v2302_v4  ;;  %v2333_v18 = vmul.f32 0.7978846, %v2329_v10 }
 0xb57   :  { %v2336_v50 = vmul.f32 0.7978846, %v2332_v52  ;;  %v2330_v14 = vadd.f32 %v2326_v32, %v2302_v4  ;;  %7154 = vtanh.f32 %v2333_v18 }
 0xb58   :  { %7156 = vtanh.f32 %v2335_v15 }
 0xb59   :  { %7158 = vtanh.f32 %v2336_v50  ;;  %v2334_v45 = vmul.f32 0.7978846, %v2330_v14 }
 0xb5b   :  { %7160 = vtanh.f32 %v2334_v45 }
 0xb64   :  { %v7155_v37 = vpop.eup %7154 }
 0xb65   :  { %v7157_v16 = vpop.eup %7156  ;;  %v2341_v46 = vadd.f32 1.0, %v7155_v37 }
 0xb66   :  { %v7159_v27 = vpop.eup %7158  ;;  %v2343_v11 = vadd.f32 1.0, %v7157_v16  ;;  %v7026_v16 = vld [vmem:[%s9303_s9 + $0x8] sm:$0xff]  }
 0xb67   :  { %v2344_v31 = vadd.f32 1.0, %v7159_v27  ;;  %v2345_v53 = vmul.f32 %v2341_v46, %v2313_v26  ;;  %v7027_v27 = vld [vmem:[%s9303_s9] sm:$0xff]   ;;  %6343 = vmatprep.subr.bf16.mxu1 %v7026_v16  ;;  %v7028_v46 = vld [vmem:[%s9304_s10 + $0x8] sm:$0xff]  }
 0xb68   :  { %v7161_v0 = vpop.eup %7160  ;;  %v2347_v48 = vmul.f32 %v2343_v11, %v2315_v47  ;;  %6344 = vmatpush3.bf16.msra.mxu1 %v7026_v16 }
 0xb69   :  { %v2342_v40 = vadd.f32 1.0, %v7161_v0  ;;  %v2348_v3 = vmul.f32 %v2344_v31, %v2316_v59  ;;  %6345 = vmatprep.subr.bf16.mxu1 %v7027_v27 }
 0xb6b   :  { %v2346_v8 = vmul.f32 %v2342_v40, %v2314_v39  ;;  %v2350_v24 = vpack.c.bf16 %v2348_v3, %v2347_v48 }
 0xb6c   :  { %6346 = vmatpush3.bf16.msra.mxu1 %v7027_v27 }
 0xb6d   :  { %v2349_v36 = vpack.c.bf16 %v2346_v8, %v2345_v53  ;;  %6351 = vmatprep.subr.bf16.mxu1 %v7028_v46 }
 0xb6f   :  { %6339 = vmatprep.mubr.bf16.mxu0 %v2349_v36  ;;  %v105_v36 = vld [vmem:[%s9302_s8] sm:$0xff] }
 0xb70   :  { %6340 = vmatmul.mubr.bf16.vlgmr.msra.gmra.mxu0 %v2350_v24 }
 0xb71   :  { %6373 = vmatprep.mubr.msk.bf16.mxu0 %vm7383_vm1, %v7382_v13 }
 0xc30   :  { %v6341_v51 = vpop.f32.mrf.mxu0 }
 0xc31   :  { %v2450_v44 = vadd.f32 %v6341_v51, %v8323_v6  ;;  %v8442_v51 = vrot.slane %v105_v36, %v7688_v58 }
 0xc32   :  { %v2433_v42 = vpop.f32.mrf.mxu0 }
 0xc33   :  { %v2448_v33 = vadd.f32 %v2433_v42, %v8321_v49  ;;  %v8405_v41 = vadd.f32 %v2455_v5, %v2450_v44 }
 0xc34   :  { %v6342_v28 = vpop.f32.mrf.mxu0 }
 0xc35   :  { %v8403_v38 = vadd.f32 %v2455_v5, %v2448_v33  ;;  %v2451_v2 = vadd.f32 %v6342_v28, %v8335_v22  ;;  %v2466_v49 = vsel %vm139_vm0, %v8405_v41, 0.0  ;;  %v8445_v28 = vrot.slane %v105_v36, %v7717_v34 }
 0xc36   :  { %v2436_v29 = vpop.f32.mrf.mxu0 }
 0xc37   :  { %v2449_v35 = vadd.f32 %v2436_v29, %v8333_v30  ;;  %v2460_v54 = vsel %vm139_vm0, %v8403_v38, 0.0  ;;  %v8413_v21 = vadd.f32 %v2455_v5, %v2451_v2 }
 0xc38   :  { %2461 = vadd.xlane.f32.xlu0 %v2460_v54 }
 0xc39   :  { %v8411_v6 = vadd.f32 %v2455_v5, %v2449_v35  ;;  %v2469_v22 = vsel %vm139_vm0, %v8413_v21, 0.0  ;;  %v8449_v35 = vrot.slane %v105_v36, %v7663_v7 }
 0xc3b   :  { %v2463_v17 = vsel %vm139_vm0, %v8411_v6, 0.0 }
 0xc3c   :  { %2467 = vadd.xlane.f32.xlu0 %v2466_v49  ;;  %2464 = vadd.xlane.f32.xlu1 %v2463_v17 }
 0xc40   :  { %2470 = vadd.xlane.f32.xlu1 %v2469_v22 }
 0xcc1   :  { %v2462_v30 = vpop.xlane.xlu0 %2461 }
 0xcc2   :  { %v2472_v56 = vmul.f32 0.03125, %v2462_v30 }
 0xcc4   :  { %v2476_v12 = vsub.f32 %v8403_v38, %v2472_v56 }
 0xcc5   :  { %v2468_v43 = vpop.xlane.xlu0 %2467  ;;  %v2465_v4 = vpop.xlane.xlu1 %2464 }
 0xcc6   :  { %v2474_v9 = vmul.f32 0.03125, %v2468_v43  ;;  %v2473_v23 = vmul.f32 0.03125, %v2465_v4  ;;  %v2480_v1 = vmul.f32 %v2476_v12, %v2476_v12  ;;  %v8459_v4 = vrot.slane %v105_v36, %v441_v20 }
 0xcc8   :  { %v2478_v55 = vsub.f32 %v8405_v41, %v2474_v9  ;;  %v2477_v57 = vsub.f32 %v8411_v6, %v2473_v23  ;;  %v2484_v61 = vsel %vm139_vm0, %v2480_v1, 0.0 }
 0xcc9   :  { %2485 = vadd.xlane.f32.xlu0 %v2484_v61  ;;  %v2471_v10 = vpop.xlane.xlu1 %2470 }
 0xcca   :  { %v2475_v15 = vmul.f32 0.03125, %v2471_v10  ;;  %v2482_v52 = vmul.f32 %v2478_v55, %v2478_v55  ;;  %v2481_v32 = vmul.f32 %v2477_v57, %v2477_v57 }
 0xccc   :  { %v2479_v18 = vsub.f32 %v8413_v21, %v2475_v15  ;;  %v2490_v50 = vsel %vm139_vm0, %v2482_v52, 0.0  ;;  %v2487_v14 = vsel %vm139_vm0, %v2481_v32, 0.0  ;;  %v7029_v15 = vld [vmem:[%s9304_s10] sm:$0xff]  }
 0xccd   :  { %2491 = vadd.xlane.f32.xlu0 %v2490_v50  ;;  %2488 = vadd.xlane.f32.xlu1 %v2487_v14 }
 0xcce   :  { %v2483_v45 = vmul.f32 %v2479_v18, %v2479_v18 }
 0xcd0   :  { %v2493_v37 = vsel %vm139_vm0, %v2483_v45, 0.0 }
 0xcd1   :  { %2494 = vadd.xlane.f32.xlu1 %v2493_v37  ;;  %v8482_v37 = vrot.slane %v105_v36, %v469_v19 }
 0xd52   :  { %v2486_v31 = vpop.xlane.xlu0 %2485 }
 0xd53   :  { %v2496_v0 = vmul.f32 0.03125, %v2486_v31 }
 0xd55   :  { %v2500_v59 = vadd.f32 1e-05, %v2496_v0 }
 0xd56   :  { %v2492_v11 = vpop.xlane.xlu0 %2491  ;;  %v2489_v26 = vpop.xlane.xlu1 %2488 }
 0xd57   :  { %7162 = vrsqrt.f32 %v2500_v59  ;;  %v2498_v39 = vmul.f32 0.03125, %v2492_v11  ;;  %v2497_v40 = vmul.f32 0.03125, %v2489_v26 }
 0xd59   :  { %v2502_v47 = vadd.f32 1e-05, %v2498_v39  ;;  %v2501_v3 = vadd.f32 1e-05, %v2497_v40  ;;  %v8500_v40 = vrot.slane %v105_v36, %v540_v25 }
 0xd5a   :  { %v2495_v53 = vpop.xlane.xlu1 %2494 }
 0xd5b   :  { %7164 = vrsqrt.f32 %v2502_v47  ;;  %v2499_v8 = vmul.f32 0.03125, %v2495_v53 }
 0xd5c   :  { %7166 = vrsqrt.f32 %v2501_v3 }
 0xd5d   :  { %v2503_v48 = vadd.f32 1e-05, %v2499_v8 }
 0xd5f   :  { %7168 = vrsqrt.f32 %v2503_v48 }
 0xd64   :  { %v7163_v24 = vpop.eup %7162 }
 0xd65   :  { %v2508_v42 = vmul.f32 %v7163_v24, %v2476_v12 }
 0xd67   :  { %v2516_v2 = vmul.f32 %v8442_v51, %v2508_v42  ;;  %v2534_v43 = vmul.f32 %v8449_v35, %v2508_v42 }
 0xd68   :  { %v7165_v44 = vpop.eup %7164 }
 0xd69   :  { %v7167_v5 = vpop.eup %7166  ;;  %v2510_v33 = vmul.f32 %v7165_v44, %v2478_v55  ;;  %v2524_v56 = vadd.f32 %v8445_v28, %v2516_v2  ;;  %v2542_v61 = vadd.f32 %v8459_v4, %v2534_v43 }
 0xd6a   :  { %v2509_v29 = vmul.f32 %v7167_v5, %v2477_v57 }
 0xd6b   :  { %v2518_v30 = vmul.f32 %v8442_v51, %v2510_v33  ;;  %v2536_v32 = vmul.f32 %v8449_v35, %v2510_v33 }
 0xd6c   :  { %v7169_v54 = vpop.eup %7168  ;;  %v2517_v49 = vmul.f32 %v8442_v51, %v2509_v29  ;;  %v2535_v17 = vmul.f32 %v8449_v35, %v2509_v29 }
 0xd6d   :  { %v2511_v22 = vmul.f32 %v7169_v54, %v2479_v18  ;;  %v2526_v55 = vadd.f32 %v8445_v28, %v2518_v30  ;;  %v2544_v50 = vadd.f32 %v8459_v4, %v2536_v32 }
 0xd6e   :  { %v2525_v12 = vadd.f32 %v8445_v28, %v2517_v49  ;;  %v2543_v1 = vadd.f32 %v8459_v4, %v2535_v17 }
 0xd6f   :  { %v2519_v9 = vmul.f32 %v8442_v51, %v2511_v22  ;;  %v2537_v20 = vmul.f32 %v8449_v35, %v2511_v22 }
 0xd70   :  { %v2528_v23 = vpack.c.bf16 %v2525_v12, %v2524_v56  ;;  %v2546_v52 = vpack.c.bf16 %v2543_v1, %v2542_v61 }
 0xd71   :  { %v2527_v57 = vadd.f32 %v8445_v28, %v2519_v9  ;;  %v2545_v18 = vadd.f32 %v8459_v4, %v2537_v20 }
 0xd72   :  { %6347 = vmatprep.mubr.msk.bf16.mxu1 %vm139_vm0, %v2528_v23 }
 0xd73   :  { %v2529_v10 = vpack.c.bf16 %v2527_v57, %v2526_v55  ;;  %v2547_v14 = vpack.c.bf16 %v2545_v18, %v2544_v50 }
 0xd75   :  { %6348 = vmatmul.mubr.msk.bf16.vlgmr.msra.gmra.mxu1 %vm139_vm0, %v2529_v10 }
 0xd76   :  { %6352 = vmatpush3.bf16.msra.mxu1 %v7028_v46  ;;  %6355 = vmatprep.mubr.msk.bf16.mxu1 %vm139_vm0, %v2546_v52 }
 0xd77   :  { %6353 = vmatprep.subr.bf16.mxu1 %v7029_v15 }
 0xd7a   :  { %6354 = vmatpush3.bf16.msra.mxu1 %v7029_v15 }
 0xd7b   :  { %6359 = vmatprep.subr.bf16.mxu1 %v7382_v13 }
 0xd7d   :  { %6356 = vmatmul.mubr.msk.bf16.vlgmr.msra.gmra.mxu1 %vm139_vm0, %v2547_v14 }
 0xd7e   :  { %6361 = vmatprep.mubr.msk.bf16.mxu1 %vm7383_vm1, %v7382_v13 }
 0xe35   :  { %v6349_v45 = vpop.f32.mrf.mxu1 }
 0xe36   :  { %v8485_v46 = vadd.f32 %v6349_v45, %v8482_v37 }
 0xe37   :  { %v2604_v16 = vpop.f32.mrf.mxu1 }
 0xe38   :  { %v2605_v0 = vadd.f32 %v2604_v16, %v8482_v37 }
 0xe39   :  { %v6350_v27 = vpop.f32.mrf.mxu1 }
 0xe3a   :  { %v8488_v31 = vadd.f32 %v6350_v27, %v8482_v37 }
 0xe3b   :  { %v2607_v59 = vpop.f32.mrf.mxu1 }
 0xe3c   :  { %v2731_v11 = vpack.c.bf16 %v8488_v31, %v8485_v46  ;;  %v2608_v26 = vadd.f32 %v2607_v59, %v8482_v37  ;;  %v8496_v19 = vpack.i.bf16 %v8488_v31, %v8485_v46 }
 0xe3d   :  { %v6357_v39 = vpop.f32.mrf.mxu1 }
 0xe3e   :  { %v6835_v47 = vpack.i.bf16 %v2608_v26, %v2605_v0  ;;  %v2684_v8 = vadd.f32 %v6357_v39, %v8500_v40  ;;  %v2730_v2 = vpack.c.bf16 %v2608_v26, %v2605_v0 }
 0xe3f   :  { %v2675_v3 = vpop.f32.mrf.mxu1 }
 0xe40   :  { %6836 = vrot.lane.b32.xlu1 %v6835_v47, %s7384_s28  ;;  %v2676_v24 = vadd.f32 %v2675_v3, %v8500_v40 }
 0xe41   :  { %v6358_v53 = vpop.f32.mrf.mxu1 }
 0xe42   :  { %v2687_v48 = vadd.f32 %v6358_v53, %v8500_v40 }
 0xe43   :  { %v2678_v42 = vpop.f32.mrf.mxu1 }
 0xe44   :  { %v2679_v44 = vadd.f32 %v2678_v42, %v8500_v40  ;;  %v8507_v5 = vpack.i.bf16 %v2687_v48, %v2684_v8  ;;  %v8509_v33 = vpack.c.bf16 %v2687_v48, %v2684_v8 }
 0xe46   :  { %v6830_v25 = vpack.i.bf16 %v2679_v44, %v2676_v24  ;;  %v8511_v36 = vpack.c.bf16 %v2679_v44, %v2676_v24 }
 0xe48   :  { %6831 = vrot.lane.b32.xlu0 %v6830_v25, %s7384_s28  ;;  %6841 = vrot.lane.b32.xlu1 %v6830_v25, %s7385_s29  ;;  %v2790_v29 = vsel %vm915_vm2, %v8511_v36, 0 }
 0xe49   :  { %6360 = vmatpush3.bf16.xpose.msra.mxu1 %v2790_v29 }
 0xe4a   :  { %6365 = vmatprep.subr.bf16.mxu1 %v7382_v13 }
 0xe4c   :  { %6851 = vrot.lane.b32.xlu0 %v6835_v47, %s7385_s29  ;;  %6846 = vrot.lane.b32.xlu1 %v6830_v25, %s7386_s30 }
 0xe50   :  { %6856 = vrot.lane.b32.xlu1 %v6835_v47, %s7386_s30  ;;  %6362 = vmatmul.mubr.msk.bf16.vlgmr.msra.gmra.mxu1 %vm915_vm2, %v2730_v2 }
 0xe51   :  { %6367 = vmatprep.mubr.msk.bf16.mxu1 %vm7383_vm1, %v7382_v13 }
 0xeb2   :  { %v6837_v54 = vpop.permute.xlu1 %6836 }
 0xeb3   :  { %v6839_v15 = vunpack.i.h.bf16 %v6837_v54  ;;  %v6838_v20 = vunpack.i.l.bf16 %v6837_v54 }
 0xeb5   :  { %v2732_v50 = vpack.c.bf16 %v6839_v15, %v6838_v20 }
 0xeba   :  { %v6832_v49 = vpop.permute.xlu0 %6831  ;;  %v6842_v17 = vpop.permute.xlu1 %6841 }
 0xebb   :  { %v6834_v22 = vunpack.i.h.bf16 %v6832_v49  ;;  %v6833_v30 = vunpack.i.l.bf16 %v6832_v49  ;;  %v6844_v56 = vunpack.i.h.bf16 %v6842_v17  ;;  %v6843_v12 = vunpack.i.l.bf16 %v6842_v17 }
 0xebd   :  { %v2780_v43 = vpack.c.bf16 %v6834_v22, %v6833_v30  ;;  %v2782_v9 = vpack.c.bf16 %v6844_v56, %v6843_v12 }
 0xebe   :  { %v6847_v23 = vpop.permute.xlu1 %6846  ;;  %v6852_v1 = vpop.permute.xlu0 %6851 }
 0xebf   :  { %v6849_v55 = vunpack.i.h.bf16 %v6847_v23  ;;  %v6848_v57 = vunpack.i.l.bf16 %v6847_v23  ;;  %v2837_v61 = vsel %vm915_vm2, %v2780_v43, 0  ;;  %v2884_v10 = vsel %vm915_vm2, %v2782_v9, 0 }
 0xec0   :  { %6366 = vmatpush3.bf16.xpose.msra.mxu1 %v2837_v61  ;;  %6372 = vmatpush3.bf16.xpose.msra.mxu0 %v2884_v10  ;;  %v6854_v52 = vunpack.i.h.bf16 %v6852_v1  ;;  %v6853_v32 = vunpack.i.l.bf16 %v6852_v1 }
 0xec1   :  { %6377 = vmatprep.subr.bf16.mxu1 %v7382_v13  ;;  %6383 = vmatprep.subr.bf16.mxu0 %v7382_v13  ;;  %v2784_v18 = vpack.c.bf16 %v6849_v55, %v6848_v57 }
 0xec2   :  { %v2734_v14 = vpack.c.bf16 %v6854_v52, %v6853_v32  ;;  %v6857_v45 = vpop.permute.xlu1 %6856 }
 0xec3   :  { %v2931_v16 = vsel %vm915_vm2, %v2784_v18, 0  ;;  %v6859_v27 = vunpack.i.h.bf16 %v6857_v45  ;;  %v6858_v0 = vunpack.i.l.bf16 %v6857_v45 }
 0xec5   :  { %v2736_v59 = vpack.c.bf16 %v6859_v27, %v6858_v0 }
 0xec7   :  { %6368 = vmatmul.mubr.msk.bf16.vlgmr.msra.gmra.mxu1 %vm915_vm2, %v2732_v50  ;;  %6374 = vmatmul.mubr.msk.bf16.vlgmr.msra.gmra.mxu0 %vm915_vm2, %v2734_v14 }
 0xec8   :  { %6378 = vmatpush3.bf16.xpose.msra.mxu1 %v2931_v16  ;;  %6379 = vmatprep.mubr.msk.bf16.mxu1 %vm7383_vm1, %v7382_v13 }
 0xec9   :  { %6389 = vmatprep.subr.bf16.mxu1 %v7382_v13  ;;  %6385 = vmatprep.mubr.msk.bf16.mxu0 %vm7383_vm1, %v7382_v13 }
 0xecf   :  { %6380 = vmatmul.mubr.msk.bf16.vlgmr.msra.gmra.mxu1 %vm915_vm2, %v2736_v59 }
 0xed0   :  { %6391 = vmatprep.mubr.msk.bf16.mxu1 %vm7383_vm1, %v7382_v13 }
 0xf10   :  { %v2826_v26 = vpop.f32.mrf.mxu1 }
 0xf11   :  { %v2974_v39 = vsel %vm1499_vm4, %v2826_v26, -inf }
 0xf12   :  { %2975 = vmax.xlane.f32.xlu0 %v2974_v39  ;;  %v6363_v47 = vpop.f32.mrf.mxu1 }
 0xf14   :  { %v2829_v3 = vpop.f32.mrf.mxu1 }
 0xf15   :  { %v2977_v53 = vsel %vm1499_vm4, %v2829_v3, -inf }
 0xf16   :  { %2978 = vmax.xlane.f32.xlu1 %v2977_v53  ;;  %v6364_v8 = vpop.f32.mrf.mxu1 }
 0xf87   :  { %v2873_v48 = vpop.f32.mrf.mxu1  ;;  %v2920_v24 = vpop.f32.mrf.mxu0 }
 0xf88   :  { %v2980_v42 = vsel %vm1499_vm4, %v2873_v48, -inf  ;;  %v2986_v56 = vsel %vm1499_vm4, %v2920_v24, -inf }
 0xf89   :  { %v6375_v44 = vpop.f32.mrf.mxu0  ;;  %2981 = vmax.xlane.f32.xlu0 %v2980_v42  ;;  %v6369_v25 = vpop.f32.mrf.mxu1 }
 0xf8b   :  { %v2876_v29 = vpop.f32.mrf.mxu1  ;;  %v2923_v2 = vpop.f32.mrf.mxu0 }
 0xf8c   :  { %v2989_v54 = vsel %vm1499_vm4, %v2923_v2, -inf  ;;  %v2983_v49 = vsel %vm1499_vm4, %v2876_v29, -inf }
 0xf8d   :  { %v6376_v17 = vpop.f32.mrf.mxu0  ;;  %2990 = vmax.xlane.f32.xlu1 %v2989_v54  ;;  %2984 = vmax.xlane.f32.xlu0 %v2983_v49  ;;  %v6370_v22 = vpop.f32.mrf.mxu1 }
 0xf8f   :  { %v2967_v30 = vpop.f32.mrf.mxu1 }
 0xf90   :  { %v2992_v1 = vsel %vm1499_vm4, %v2967_v30, -inf }
 0xf91   :  { %2987 = vmax.xlane.f32.xlu0 %v2986_v56  ;;  %v6381_v12 = vpop.f32.mrf.mxu1 }
 0xf93   :  { %v8545_v23 = vpop.f32.mrf.mxu1 }
 0xf94   :  { %v2995_v15 = vsel %vm1499_vm4, %v8545_v23, -inf }
 0xf95   :  { %2993 = vmax.xlane.f32.xlu0 %v2992_v1  ;;  %v6382_v55 = vpop.f32.mrf.mxu1 }
 0xf9b   :  { %v2976_v57 = vpop.xlane.xlu0 %2975 }
 0xf9c   :  { %v2998_v61 = vsub.f32 %v2826_v26, %v2976_v57 }
 0xf9e   :  { %3115 = vrot.lane.b32.xlu1 %v2780_v43, %s7387_s15  ;;  %v3006_v10 = vmul.f32 1.442695, %v2998_v61 }
 0xf9f   :  { %v2979_v43 = vpop.xlane.xlu1 %2978 }
 0xfa0   :  { %7170 = vpow2.f32 %v3006_v10 }
 0xfa2   :  { %3163 = vrot.lane.b32.xlu1 %v2782_v9, %s7387_s15  ;;  %v2999_v9 = vsub.f32 %v2829_v3, %v2979_v43 }
 0xfa4   :  { %v3008_v32 = vmul.f32 1.442695, %v2999_v9 }
 0xfa6   :  { %7172 = vpow2.f32 %v3008_v32 }
 0xfab   :  { %3067 = vrot.lane.b32.xlu0 %v8511_v36, %s7387_s15 }
 0xfad   :  { %v8554_v20 = vpop.eup %7170 }
 0xfae   :  { %v3022_v52 = vsel %vm1499_vm4, %v8554_v20, 0.0 }
 0xfb3   :  { %v8559_v36 = vpop.eup %7172 }
 0xfb4   :  { %v3025_v50 = vsel %vm1499_vm4, %v8559_v36, 0.0 }
 0xfc6   :  { %2996 = vmax.xlane.f32.xlu1 %v2995_v15 }
 0xfca   :  { %3023 = vadd.xlane.f32.xlu0 %v3022_v52 }
 0xfd7   :  { %3211 = vrot.lane.b32.xlu1 %v2784_v18, %s7387_s15 }
 0xffb   :  { %3026 = vadd.xlane.f32.xlu1 %v3025_v50 }
0x1012   :  { %v2982_v14 = vpop.xlane.xlu0 %2981 }
0x1013   :  { %v3000_v45 = vsub.f32 %v2873_v48, %v2982_v14 }
0x1015   :  { %v3010_v16 = vmul.f32 1.442695, %v3000_v45 }
0x1016   :  { %v2991_v27 = vpop.xlane.xlu1 %2990  ;;  %v2985_v0 = vpop.xlane.xlu0 %2984 }
0x1017   :  { %7174 = vpow2.f32 %v3010_v16  ;;  %v3003_v59 = vsub.f32 %v2923_v2, %v2991_v27  ;;  %v3001_v26 = vsub.f32 %v2876_v29, %v2985_v0 }
0x1019   :  { %v3012_v39 = vmul.f32 1.442695, %v3001_v26  ;;  %v3016_v18 = vmul.f32 1.442695, %v3003_v59 }
0x101a   :  { %v3116_v47 = vpop.permute.xlu1 %3115  ;;  %v2988_v3 = vpop.xlane.xlu0 %2987 }
0x101b   :  { %v3002_v53 = vsub.f32 %v2920_v24, %v2988_v3  ;;  %6390 = vmatpush3.bf16.msra.mxu1 %v3116_v47  ;;  %7176 = vpow2.f32 %v3012_v39 }
0x101c   :  { %6401 = vmatprep.subr.bf16.mxu1 %v7382_v13  ;;  %7178 = vpow2.f32 %v3016_v18 }
0x101d   :  { %v3014_v8 = vmul.f32 1.442695, %v3002_v53 }
0x101e   :  { %v2994_v42 = vpop.xlane.xlu0 %2993  ;;  %v3164_v1 = vpop.permute.xlu1 %3163 }
0x101f   :  { %7180 = vpow2.f32 %v3014_v8  ;;  %v3004_v48 = vsub.f32 %v2967_v30, %v2994_v42 }
0x1021   :  { %v3018_v44 = vmul.f32 1.442695, %v3004_v48 }
0x1022   :  { %v3068_v25 = vpop.permute.xlu0 %3067 }
0x1023   :  { %7182 = vpow2.f32 %v3018_v44  ;;  %6384 = vmatpush3.bf16.msra.mxu0 %v3068_v25 }
0x1024   :  { %v7175_v2 = vpop.eup %7174  ;;  %6395 = vmatprep.subr.bf16.mxu0 %v7382_v13 }
0x1025   :  { %v3028_v29 = vsel %vm1499_vm4, %v7175_v2, 0.0 }
0x1026   :  { %3029 = vadd.xlane.f32.xlu0 %v3028_v29 }
0x1028   :  { %v7177_v24 = vpop.eup %7176 }
0x1029   :  { %v3031_v54 = vsel %vm1499_vm4, %v7177_v24, 0.0  ;;  %v7179_v49 = vpop.eup %7178 }
0x102a   :  { %3032 = vadd.xlane.f32.xlu1 %v3031_v54  ;;  %v3037_v30 = vsel %vm1499_vm4, %v7179_v49, 0.0 }
0x102c   :  { %v7181_v17 = vpop.eup %7180 }
0x102d   :  { %v3034_v22 = vsel %vm1499_vm4, %v7181_v17, 0.0 }
0x102e   :  { %3035 = vadd.xlane.f32.xlu0 %v3034_v22  ;;  %3038 = vadd.xlane.f32.xlu1 %v3037_v30 }
0x1030   :  { %v8569_v56 = vpop.eup %7182 }
0x1031   :  { %v3040_v12 = vsel %vm1499_vm4, %v8569_v56, 0.0 }
0x1032   :  { %3041 = vadd.xlane.f32.xlu0 %v3040_v12 }
0x103f   :  { %6866 = vrot.lane.b32.xlu1 %v8507_v5, %s7385_s29 }
0x1048   :  { %6861 = vrot.lane.b32.xlu0 %v8507_v5, %s7384_s28 }
0x104c   :  { %6871 = vrot.lane.b32.xlu0 %v8496_v19, %s7384_s28 }
0x104f   :  { %v2997_v55 = vpop.xlane.xlu1 %2996 }
0x1050   :  { %v3005_v57 = vsub.f32 %v8545_v23, %v2997_v55  ;;  %6881 = vrot.lane.b32.xlu0 %v8496_v19, %s7385_s29 }
0x1052   :  { %v3020_v61 = vmul.f32 1.442695, %v3005_v57 }
0x1053   :  { %v3024_v52 = vpop.xlane.xlu0 %3023  ;;  %v3212_v43 = vpop.permute.xlu1 %3211 }
0x1054   :  { %7184 = vpow2.f32 %v3020_v61 }
0x1055   :  { %7186 = vrcp.f32 %v3024_v52 }
0x1061   :  { %v8582_v10 = vpop.eup %7184 }
0x1062   :  { %v3043_v15 = vsel %vm1499_vm4, %v8582_v10, 0.0  ;;  %v7187_v9 = vpop.eup %7186 }
0x1063   :  { %3044 = vadd.xlane.f32.xlu1 %v3043_v15  ;;  %v3054_v50 = vmul.f32 %v7187_v9, %v8554_v20 }
0x1074   :  { %6876 = vrot.lane.b32.xlu1 %v8507_v5, %s7386_s30 }
0x1078   :  { %6886 = vrot.lane.b32.xlu1 %v8496_v19, %s7386_s30 }
0x1084   :  { %v3027_v23 = vpop.xlane.xlu1 %3026 }
0x1085   :  { %7188 = vrcp.f32 %v3027_v23 }
0x1092   :  { %v7189_v32 = vpop.eup %7188 }
0x1093   :  { %v3055_v14 = vmul.f32 %v7189_v32, %v8559_v36 }
0x1095   :  { %v3062_v45 = vpack.c.bf16 %v3055_v14, %v3054_v50 }
0x1097   :  { %6386 = vmatmul.mubr.msk.bf16.vlgmr.msra.gmra.mxu0 %vm1499_vm4, %v3062_v45 }
0x1098   :  { %6396 = vmatpush3.bf16.msra.mxu0 %v3164_v1  ;;  %6397 = vmatprep.mubr.msk.bf16.mxu0 %vm7383_vm1, %v7382_v13 }
0x1099   :  { %6407 = vmatprep.subr.bf16.mxu0 %v7382_v13 }
0x10af   :  { %v3030_v19 = vpop.xlane.xlu0 %3029 }
0x10b0   :  { %7190 = vrcp.f32 %v3030_v19 }
0x10b3   :  { %v3033_v5 = vpop.xlane.xlu1 %3032 }
0x10b4   :  { %7192 = vrcp.f32 %v3033_v5 }
0x10b7   :  { %v3036_v16 = vpop.xlane.xlu0 %3035  ;;  %v3039_v27 = vpop.xlane.xlu1 %3038 }
0x10b8   :  { %7194 = vrcp.f32 %v3036_v16 }
0x10b9   :  { %7196 = vrcp.f32 %v3039_v27 }
0x10bb   :  { %v3042_v0 = vpop.xlane.xlu0 %3041  ;;  %v6867_v42 = vpop.permute.xlu1 %6866 }
0x10bc   :  { %v6869_v44 = vunpack.i.h.bf16 %v6867_v42  ;;  %v6868_v25 = vunpack.i.l.bf16 %v6867_v42  ;;  %7198 = vrcp.f32 %v3042_v0 }
0x10bd   :  { %v7191_v20 = vpop.eup %7190 }
0x10be   :  { %v3056_v59 = vmul.f32 %v7191_v20, %v7175_v2  ;;  %v3292_v2 = vsel %vm915_vm2, %v8509_v33, 0 }
0x10bf   :  { %v6862_v3 = vpop.permute.xlu0 %6861 }
0x10c0   :  { %v6864_v31 = vunpack.i.h.bf16 %v6862_v3 }
0x10c1   :  { %v7193_v36 = vpop.eup %7192 }
0x10c2   :  { %v3057_v26 = vmul.f32 %v7193_v36, %v7177_v24  ;;  %v8606_v24 = vpack.c.bf16 %v6869_v44, %v6868_v25 }
0x10c3   :  { %v6872_v29 = vpop.permute.xlu0 %6871 }
0x10c4   :  { %v3063_v18 = vpack.c.bf16 %v3057_v26, %v3056_v59  ;;  %v6874_v32 = vunpack.i.h.bf16 %v6872_v29  ;;  %v6873_v50 = vunpack.i.l.bf16 %v6872_v29 }
0x10c5   :  { %v7195_v39 = vpop.eup %7194 }
0x10c6   :  { %v7197_v47 = vpop.eup %7196  ;;  %v3058_v53 = vmul.f32 %v7195_v39, %v7181_v17  ;;  %6392 = vmatmul.mubr.msk.bf16.vlgmr.msra.gmra.mxu1 %vm1499_vm4, %v3063_v18 }
0x10c7   :  { %v3059_v8 = vmul.f32 %v7197_v47, %v7179_v49  ;;  %6402 = vmatpush3.bf16.msra.mxu1 %v3212_v43  ;;  %6403 = vmatprep.mubr.msk.bf16.mxu1 %vm7383_vm1, %v7382_v13  ;;  %v6882_v54 = vpop.permute.xlu0 %6881  ;;  %v3386_v49 = vsel %vm915_vm2, %v8606_v24, 0 }
0x10c8   :  { %6413 = vmatprep.subr.bf16.mxu1 %v7382_v13  ;;  %v6884_v17 = vunpack.i.h.bf16 %v6882_v54  ;;  %v6883_v22 = vunpack.i.l.bf16 %v6882_v54 }
0x10c9   :  { %v3064_v48 = vpack.c.bf16 %v3059_v8, %v3058_v53  ;;  %v7199_v12 = vpop.eup %7198 }
0x10ca   :  { %v2735_v30 = vpack.c.bf16 %v6884_v17, %v6883_v22  ;;  %v3060_v55 = vmul.f32 %v7199_v12, %v8569_v56 }
0x10cb   :  { %6398 = vmatmul.mubr.msk.bf16.vlgmr.msra.gmra.mxu0 %vm1499_vm4, %v3064_v48 }
0x10cc   :  { %6408 = vmatpush3.bf16.xpose.msra.mxu0 %v3292_v2  ;;  %6409 = vmatprep.mubr.msk.bf16.mxu0 %vm7383_vm1, %v7382_v13 }
0x10cd   :  { %6419 = vmatprep.subr.bf16.mxu0 %v7382_v13 }
0x10d3   :  { %6410 = vmatmul.mubr.msk.bf16.vlgmr.msra.gmra.mxu0 %vm915_vm2, %v2731_v11  ;;  %v6863_v11 = vunpack.i.l.bf16 %v6862_v3 }
0x10d4   :  { %6420 = vmatpush3.bf16.xpose.msra.mxu0 %v3386_v49  ;;  %6421 = vmatprep.mubr.msk.bf16.mxu0 %vm7383_vm1, %v7382_v13 }
0x10d5   :  { %6431 = vmatprep.subr.bf16.mxu0 %v7382_v13  ;;  %v8622_v61 = vpack.c.bf16 %v6864_v31, %v6863_v11 }
0x10d7   :  { %v3339_v9 = vsel %vm915_vm2, %v8622_v61, 0 }
0x10db   :  { %6422 = vmatmul.mubr.msk.bf16.vlgmr.msra.gmra.mxu0 %vm915_vm2, %v2735_v30 }
0x10dc   :  { %6433 = vmatprep.mubr.msk.bf16.mxu0 %vm7383_vm1, %v7382_v13 }
0x10ec   :  { %v3045_v46 = vpop.xlane.xlu1 %3044 }
0x10ed   :  { %7200 = vrcp.f32 %v3045_v46 }
0x10f0   :  { %v6877_v15 = vpop.permute.xlu1 %6876 }
0x10f1   :  { %v6879_v43 = vunpack.i.h.bf16 %v6877_v15  ;;  %v6878_v23 = vunpack.i.l.bf16 %v6877_v15 }
0x10f3   :  { %v8630_v56 = vpack.c.bf16 %v6879_v43, %v6878_v23 }
0x10f4   :  { %v6887_v14 = vpop.permute.xlu1 %6886 }
0x10f5   :  { %v3433_v45 = vsel %vm915_vm2, %v8630_v56, 0  ;;  %v6889_v19 = vunpack.i.h.bf16 %v6887_v14  ;;  %v6888_v5 = vunpack.i.l.bf16 %v6887_v14 }
0x10f7   :  { %v2737_v16 = vpack.c.bf16 %v6889_v19, %v6888_v5 }
0x10fa   :  { %v7201_v1 = vpop.eup %7200 }
0x10fb   :  { %v3061_v57 = vmul.f32 %v7201_v1, %v8582_v10  ;;  %v2733_v10 = vpack.c.bf16 %v6874_v32, %v6873_v50 }
0x10fd   :  { %v3065_v52 = vpack.c.bf16 %v3061_v57, %v3060_v55 }
0x10ff   :  { %6404 = vmatmul.mubr.msk.bf16.vlgmr.msra.gmra.mxu1 %vm1499_vm4, %v3065_v52 }
0x1100   :  { %6414 = vmatpush3.bf16.xpose.msra.mxu1 %v3339_v9  ;;  %6415 = vmatprep.mubr.msk.bf16.mxu1 %vm7383_vm1, %v7382_v13 }
0x1101   :  { %6425 = vmatprep.subr.bf16.mxu1 %v7382_v13 }
0x1107   :  { %6416 = vmatmul.mubr.msk.bf16.vlgmr.msra.gmra.mxu1 %vm915_vm2, %v2733_v10 }
0x1108   :  { %6426 = vmatpush3.bf16.xpose.msra.mxu1 %v3433_v45  ;;  %6427 = vmatprep.mubr.msk.bf16.mxu1 %vm7383_vm1, %v7382_v13 }
0x1109   :  { %6437 = vmatprep.subr.bf16.mxu1 %v7382_v13 }
0x110f   :  { %6428 = vmatmul.mubr.msk.bf16.vlgmr.msra.gmra.mxu1 %vm915_vm2, %v2737_v16 }
0x1110   :  { %6439 = vmatprep.mubr.msk.bf16.mxu1 %vm7383_vm1, %v7382_v13 }
0x1157   :  { %v8641_v27 = vpop.f32.mrf.mxu0 }
0x1159   :  { %v6387_v20 = vpop.f32.mrf.mxu0 }
0x115b   :  { %v8643_v0 = vpop.f32.mrf.mxu0 }
0x115d   :  { %v6388_v36 = vpop.f32.mrf.mxu0 }
0x1186   :  { %v8645_v59 = vpop.f32.mrf.mxu1 }
0x1188   :  { %v6393_v26 = vpop.f32.mrf.mxu1 }
0x118a   :  { %v8647_v39 = vpop.f32.mrf.mxu1 }
0x118b   :  { %v8649_v18 = vpop.f32.mrf.mxu0  ;;  %v6890_v47 = vpack.i.bf16 %v8647_v39, %v8645_v59 }
0x118c   :  { %v6394_v3 = vpop.f32.mrf.mxu1 }
0x118d   :  { %v6399_v53 = vpop.f32.mrf.mxu0 }
0x118f   :  { %v8653_v8 = vpop.f32.mrf.mxu0 }
0x1190   :  { %v6895_v42 = vpack.i.bf16 %v8653_v8, %v8649_v18 }
0x1191   :  { %v6400_v48 = vpop.f32.mrf.mxu0 }
0x1193   :  { %v3328_v44 = vpop.f32.mrf.mxu0 }
0x1194   :  { %v3476_v25 = vsel %vm1499_vm4, %v3328_v44, -inf }
0x1195   :  { %3477 = vmax.xlane.f32.xlu0 %v3476_v25  ;;  %v6411_v2 = vpop.f32.mrf.mxu0 }
0x1197   :  { %v3331_v29 = vpop.f32.mrf.mxu0 }
0x1198   :  { %v3479_v54 = vsel %vm1499_vm4, %v3331_v29, -inf }
0x1199   :  { %3480 = vmax.xlane.f32.xlu1 %v3479_v54  ;;  %v6412_v49 = vpop.f32.mrf.mxu0 }
0x119b   :  { %v3422_v17 = vpop.f32.mrf.mxu0 }
0x119c   :  { %v3488_v10 = vsel %vm1499_vm4, %v3422_v17, -inf }
0x119d   :  { %v6423_v22 = vpop.f32.mrf.mxu0 }
0x119f   :  { %v3425_v30 = vpop.f32.mrf.mxu0 }
0x11a0   :  { %v3491_v46 = vsel %vm1499_vm4, %v3425_v30, -inf }
0x11a1   :  { %3492 = vmax.xlane.f32.xlu1 %v3491_v46  ;;  %v6424_v31 = vpop.f32.mrf.mxu0 }
0x11bf   :  { %v8660_v11 = vpop.f32.mrf.mxu1 }
0x11c1   :  { %v6405_v12 = vpop.f32.mrf.mxu1 }
0x11c3   :  { %v8662_v1 = vpop.f32.mrf.mxu1 }
0x11c4   :  { %v6900_v55 = vpack.i.bf16 %v8662_v1, %v8660_v11 }
0x11c5   :  { %v6406_v57 = vpop.f32.mrf.mxu1 }
0x11c7   :  { %v3375_v15 = vpop.f32.mrf.mxu1 }
0x11c8   :  { %v3482_v52 = vsel %vm1499_vm4, %v3375_v15, -inf }
0x11c9   :  { %3483 = vmax.xlane.f32.xlu0 %v3482_v52  ;;  %v6417_v43 = vpop.f32.mrf.mxu1 }
0x11cb   :  { %v3378_v23 = vpop.f32.mrf.mxu1 }
0x11cc   :  { %v3485_v9 = vsel %vm1499_vm4, %v3378_v23, -inf }
0x11cd   :  { %3486 = vmax.xlane.f32.xlu0 %v3485_v9  ;;  %v6418_v32 = vpop.f32.mrf.mxu1 }
0x11cf   :  { %v3469_v50 = vpop.f32.mrf.mxu1 }
0x11d0   :  { %v3494_v19 = vsel %vm1499_vm4, %v3469_v50, -inf }
0x11d1   :  { %3489 = vmax.xlane.f32.xlu0 %v3488_v10  ;;  %v6429_v14 = vpop.f32.mrf.mxu1 }
0x11d3   :  { %v3472_v45 = vpop.f32.mrf.mxu1 }
0x11d4   :  { %v3497_v5 = vsel %vm1499_vm4, %v3472_v45, -inf }
0x11d5   :  { %3495 = vmax.xlane.f32.xlu0 %v3494_v19  ;;  %3498 = vmax.xlane.f32.xlu1 %v3497_v5  ;;  %v6430_v16 = vpop.f32.mrf.mxu1 }
0x121e   :  { %v3478_v20 = vpop.xlane.xlu0 %3477 }
0x121f   :  { %v3500_v36 = vsub.f32 %v3328_v44, %v3478_v20 }
0x1221   :  { %v3508_v26 = vmul.f32 1.442695, %v3500_v36 }
0x1222   :  { %v3481_v3 = vpop.xlane.xlu1 %3480 }
0x1223   :  { %7202 = vpow2.f32 %v3508_v26  ;;  %v3501_v53 = vsub.f32 %v3331_v29, %v3481_v3 }
0x1225   :  { %v3510_v48 = vmul.f32 1.442695, %v3501_v53 }
0x1227   :  { %7204 = vpow2.f32 %v3510_v48 }
0x122a   :  { %v3493_v22 = vpop.xlane.xlu1 %3492 }
0x122b   :  { %v3505_v31 = vsub.f32 %v3425_v30, %v3493_v22 }
0x122d   :  { %v3518_v52 = vmul.f32 1.442695, %v3505_v31 }
0x1230   :  { %v8671_v25 = vpop.eup %7202 }
0x1231   :  { %v3524_v2 = vsel %vm1499_vm4, %v8671_v25, 0.0 }
0x1232   :  { %3525 = vadd.xlane.f32.xlu0 %v3524_v2 }
0x1234   :  { %v8675_v54 = vpop.eup %7204 }
0x1235   :  { %v3527_v49 = vsel %vm1499_vm4, %v8675_v54, 0.0 }
0x1236   :  { %3528 = vadd.xlane.f32.xlu1 %v3527_v49 }
0x1252   :  { %v3484_v44 = vpop.xlane.xlu0 %3483 }
0x1253   :  { %v3502_v46 = vsub.f32 %v3375_v15, %v3484_v44 }
0x1255   :  { %v3512_v12 = vmul.f32 1.442695, %v3502_v46 }
0x1256   :  { %v3487_v29 = vpop.xlane.xlu0 %3486 }
0x1257   :  { %7206 = vpow2.f32 %v3512_v12  ;;  %v3503_v57 = vsub.f32 %v3378_v23, %v3487_v29 }
0x1259   :  { %v3514_v43 = vmul.f32 1.442695, %v3503_v57 }
0x125a   :  { %v3490_v9 = vpop.xlane.xlu0 %3489 }
0x125b   :  { %7208 = vpow2.f32 %v3514_v43  ;;  %v3504_v32 = vsub.f32 %v3422_v17, %v3490_v9 }
0x125c   :  { %7210 = vpow2.f32 %v3518_v52 }
0x125d   :  { %v3516_v10 = vmul.f32 1.442695, %v3504_v32 }
0x125e   :  { %v3496_v14 = vpop.xlane.xlu0 %3495  ;;  %v3499_v53 = vpop.xlane.xlu1 %3498 }
0x125f   :  { %7212 = vpow2.f32 %v3516_v10  ;;  %v3506_v19 = vsub.f32 %v3469_v50, %v3496_v14  ;;  %v3507_v48 = vsub.f32 %v3472_v45, %v3499_v53 }
0x1261   :  { %v3520_v5 = vmul.f32 1.442695, %v3506_v19  ;;  %v3522_v2 = vmul.f32 1.442695, %v3507_v48 }
0x1263   :  { %7214 = vpow2.f32 %v3520_v5 }
0x1264   :  { %v7207_v16 = vpop.eup %7206  ;;  %7216 = vpow2.f32 %v3522_v2 }
0x1265   :  { %v3530_v15 = vsel %vm1499_vm4, %v7207_v16, 0.0 }
0x1266   :  { %3531 = vadd.xlane.f32.xlu0 %v3530_v15 }
0x1268   :  { %v7209_v30 = vpop.eup %7208 }
0x1269   :  { %v3533_v20 = vsel %vm1499_vm4, %v7209_v30, 0.0  ;;  %v7211_v23 = vpop.eup %7210 }
0x126a   :  { %3534 = vadd.xlane.f32.xlu1 %v3533_v20  ;;  %v3539_v17 = vsel %vm1499_vm4, %v7211_v23, 0.0 }
0x126c   :  { %v7213_v36 = vpop.eup %7212 }
0x126d   :  { %v3536_v26 = vsel %vm1499_vm4, %v7213_v36, 0.0 }
0x126e   :  { %3537 = vadd.xlane.f32.xlu0 %v3536_v26  ;;  %3540 = vadd.xlane.f32.xlu1 %v3539_v17 }
0x1270   :  { %v8683_v3 = vpop.eup %7214 }
0x1271   :  { %v3542_v50 = vsel %vm1499_vm4, %v8683_v3, 0.0  ;;  %v8697_v49 = vpop.eup %7216 }
0x1272   :  { %3543 = vadd.xlane.f32.xlu0 %v3542_v50 }
0x127f   :  { %3617 = vrot.lane.b32.xlu1 %v8622_v61, %s7387_s15  ;;  %v3545_v61 = vsel %vm1499_vm4, %v8697_v49, 0.0 }
0x1283   :  { %3665 = vrot.lane.b32.xlu1 %v8606_v24, %s7387_s15 }
0x1288   :  { %3569 = vrot.lane.b32.xlu0 %v8509_v33, %s7387_s15 }
0x128c   :  { %6891 = vrot.lane.b32.xlu0 %v6890_v47, %s7388_s16 }
0x12a7   :  { %3546 = vadd.xlane.f32.xlu1 %v3545_v61 }
0x12b8   :  { %3713 = vrot.lane.b32.xlu1 %v8630_v56, %s7387_s15 }
0x12bb   :  { %v3526_v24 = vpop.xlane.xlu0 %3525 }
0x12bc   :  { %6896 = vrot.lane.b32.xlu1 %v6895_v42, %s7389_s17 }
0x12bf   :  { %v3529_v33 = vpop.xlane.xlu1 %3528 }
0x12c0   :  { %6901 = vrot.lane.b32.xlu1 %v6900_v55, %s7390_s18  ;;  %7218 = vrcp.f32 %v3529_v33 }
0x12c1   :  { %7220 = vrcp.f32 %v3526_v24 }
0x12cd   :  { %v7219_v45 = vpop.eup %7218 }
0x12ce   :  { %v7221_v42 = vpop.eup %7220  ;;  %v3557_v11 = vmul.f32 %v7219_v45, %v8675_v54 }
0x12cf   :  { %v3556_v22 = vmul.f32 %v7221_v42, %v8671_v25 }
0x12d1   :  { %v3564_v46 = vpack.c.bf16 %v3557_v11, %v3556_v22 }
0x12ef   :  { %v3532_v59 = vpop.xlane.xlu0 %3531 }
0x12f0   :  { %7222 = vrcp.f32 %v3532_v59 }
0x12f3   :  { %v3535_v39 = vpop.xlane.xlu1 %3534 }
0x12f4   :  { %7224 = vrcp.f32 %v3535_v39 }
0x12f7   :  { %v3538_v47 = vpop.xlane.xlu0 %3537  ;;  %v3541_v56 = vpop.xlane.xlu1 %3540 }
0x12f8   :  { %7226 = vrcp.f32 %v3538_v47 }
0x12f9   :  { %7228 = vrcp.f32 %v3541_v56 }
0x12fb   :  { %v3544_v18 = vpop.xlane.xlu0 %3543  ;;  %v3618_v8 = vpop.permute.xlu1 %3617 }
0x12fc   :  { %6438 = vmatpush3.bf16.msra.mxu1 %v3618_v8  ;;  %7230 = vrcp.f32 %v3544_v18  ;;  %v7030_v18 = vld [vmem:[%s9305_s11 + $0x8] sm:$0xff]  }
0x12fd   :  { %6449 = vmatprep.subr.bf16.mxu1 %v7382_v13  ;;  %v7223_v1 = vpop.eup %7222 }
0x12fe   :  { %v3558_v31 = vmul.f32 %v7223_v1, %v7207_v16 }
0x12ff   :  { %v3570_v55 = vpop.permute.xlu0 %3569  ;;  %v3666_v29 = vpop.permute.xlu1 %3665 }
0x1300   :  { %6432 = vmatpush3.bf16.msra.mxu0 %v3570_v55 }
0x1301   :  { %v7225_v44 = vpop.eup %7224  ;;  %6443 = vmatprep.subr.bf16.mxu0 %v7382_v13 }
0x1302   :  { %v3559_v12 = vmul.f32 %v7225_v44, %v7209_v30 }
0x1303   :  { %6434 = vmatmul.mubr.msk.bf16.vlgmr.msra.gmra.mxu0 %vm1499_vm4, %v3564_v46  ;;  %v6892_v14 = vpop.permute.xlu0 %6891 }
0x1304   :  { %6444 = vmatpush3.bf16.msra.mxu0 %v3666_v29  ;;  %v3565_v57 = vpack.c.bf16 %v3559_v12, %v3558_v31  ;;  %6445 = vmatprep.mubr.msk.bf16.mxu0 %vm7383_vm1, %v7382_v13  ;;  %v6894_v5 = vunpack.i.h.bf16 %v6892_v14  ;;  %v6893_v16 = vunpack.i.l.bf16 %v6892_v14  ;;  %v7031_v31 = vld [vmem:[%s9305_s11] sm:$0xff]  }
0x1305   :  { %v7227_v54 = vpop.eup %7226  ;;  %6455 = vmatprep.subr.bf16.mxu0 %v7030_v18 }
0x1306   :  { %v7229_v52 = vpop.eup %7228  ;;  %6440 = vmatmul.mubr.msk.bf16.vlgmr.msra.gmra.mxu1 %vm1499_vm4, %v3565_v57  ;;  %v3560_v25 = vmul.f32 %v7227_v54, %v7213_v36  ;;  %v3282_v26 = vsel %vm915_vm2, %v8641_v27, %v6893_v16 }
0x1307   :  { %v3561_v43 = vmul.f32 %v7229_v52, %v7211_v23  ;;  %6451 = vmatprep.mubr.msk.bf16.mxu1 %vm7383_vm1, %v7382_v13  ;;  %v3283_v23 = vsel %vm915_vm2, %v8643_v0, %v6894_v5 }
0x1309   :  { %v3566_v9 = vpack.c.bf16 %v3561_v43, %v3560_v25  ;;  %v7231_v20 = vpop.eup %7230 }
0x130a   :  { %v3562_v24 = vmul.f32 %v7231_v20, %v8683_v3 }
0x130b   :  { %6446 = vmatmul.mubr.msk.bf16.vlgmr.msra.gmra.mxu0 %vm1499_vm4, %v3566_v9 }
0x130c   :  { %6456 = vmatpush3.bf16.msra.mxu0 %v7030_v18 }
0x130d   :  { %6457 = vmatprep.subr.bf16.mxu0 %v7031_v31 }
0x1310   :  { %6458 = vmatpush3.bf16.msra.mxu0 %v7031_v31 }
0x1330   :  { %v3547_v32 = vpop.xlane.xlu1 %3546 }
0x1331   :  { %7232 = vrcp.f32 %v3547_v32 }
0x1334   :  { %v3714_v10 = vpop.permute.xlu1 %3713 }
0x1335   :  { %6450 = vmatpush3.bf16.msra.mxu1 %v3714_v10 }
0x1338   :  { %v6897_v19 = vpop.permute.xlu1 %6896 }
0x1339   :  { %v6899_v15 = vunpack.i.h.bf16 %v6897_v19  ;;  %v6898_v30 = vunpack.i.l.bf16 %v6897_v19 }
0x133b   :  { %v3285_v48 = vsel %vm1499_vm4, %v3283_v23, %v6899_v15  ;;  %v3284_v2 = vsel %vm1499_vm4, %v3282_v26, %v6898_v30 }
0x133c   :  { %v6902_v36 = vpop.permute.xlu1 %6901 }
0x133d   :  { %v6904_v17 = vunpack.i.h.bf16 %v6902_v36  ;;  %v6903_v50 = vunpack.i.l.bf16 %v6902_v36 }
0x133e   :  { %v7233_v53 = vpop.eup %7232 }
0x133f   :  { %v3286_v61 = vsel %vm1502_vm5, %v3284_v2, %v6903_v50  ;;  %v3287_v33 = vsel %vm1502_vm5, %v3285_v48, %v6904_v17  ;;  %v3563_v59 = vmul.f32 %v7233_v53, %v8697_v49  ;;  %v8753_v48 = vld [vmem:[%s9302_s8] sm:$0xff] }
0x1340   :  { %v3790_v39 = vpack.c.bf16 %v3287_v33, %v3286_v61  ;;  %v8758_v2 = vrot.slane %v8753_v48, %v2166_v60 }
0x1341   :  { %v3567_v0 = vpack.c.bf16 %v3563_v59, %v3562_v24 }
0x1342   :  { %6459 = vmatprep.mubr.msk.bf16.mxu0 %vm139_vm0, %v3790_v39 }
0x1343   :  { %6452 = vmatmul.mubr.msk.bf16.vlgmr.msra.gmra.mxu1 %vm1499_vm4, %v3567_v0 }
0x13c3   :  { %v3609_v27 = vpop.f32.mrf.mxu0 }
0x13c5   :  { %v6435_v47 = vpop.f32.mrf.mxu0 }
0x13c6   :  { %v3657_v56 = vpop.f32.mrf.mxu1 }
0x13c7   :  { %v3612_v45 = vpop.f32.mrf.mxu0 }
0x13c8   :  { %v6441_v8 = vpop.f32.mrf.mxu1 }
0x13c9   :  { %v6436_v42 = vpop.f32.mrf.mxu0 }
0x13ca   :  { %v3660_v3 = vpop.f32.mrf.mxu1 }
0x13cb   :  { %v6905_v49 = vpack.i.bf16 %v3660_v3, %v3657_v56  ;;  %v3705_v11 = vpop.f32.mrf.mxu0 }
0x13cc   :  { %v6442_v1 = vpop.f32.mrf.mxu1 }
0x13cd   :  { %v6447_v55 = vpop.f32.mrf.mxu0  ;;  %6906 = vrot.lane.b32.xlu0 %v6905_v49, %s7388_s16 }
0x13cf   :  { %v3708_v22 = vpop.f32.mrf.mxu0 }
0x13d0   :  { %v6910_v44 = vpack.i.bf16 %v3708_v22, %v3705_v11 }
0x13d1   :  { %v6448_v46 = vpop.f32.mrf.mxu0 }
0x13d2   :  { %6911 = vrot.lane.b32.xlu0 %v6910_v44, %s7389_s17 }
0x1403   :  { %v3753_v12 = vpop.f32.mrf.mxu1 }
0x1405   :  { %v6453_v29 = vpop.f32.mrf.mxu1 }
0x1407   :  { %v3756_v57 = vpop.f32.mrf.mxu1 }
0x1408   :  { %v6915_v54 = vpack.i.bf16 %v3756_v57, %v3753_v12 }
0x1409   :  { %v6454_v52 = vpop.f32.mrf.mxu1 }
0x140a   :  { %6916 = vrot.lane.b32.xlu1 %v6915_v54, %s7390_s18 }
0x143f   :  { %v6907_v25 = vpop.permute.xlu0 %6906 }
0x1440   :  { %v6909_v9 = vunpack.i.h.bf16 %v6907_v25  ;;  %v6908_v32 = vunpack.i.l.bf16 %v6907_v25 }
0x1442   :  { %v3785_v5 = vsel %vm915_vm2, %v3612_v45, %v6909_v9  ;;  %v3784_v16 = vsel %vm915_vm2, %v3609_v27, %v6908_v32  ;;  %v7032_v9 = vld [vmem:[%s9306_s12 + $0x8] sm:$0xff]   ;;  %v7033_v32 = vld [vmem:[%s9306_s12] sm:$0xff]  }
0x1443   :  { %6463 = vmatprep.subr.bf16.mxu1 %v7032_v9 }
0x1444   :  { %v6912_v43 = vpop.permute.xlu0 %6911  ;;  %6464 = vmatpush3.bf16.msra.mxu1 %v7032_v9 }
0x1445   :  { %v6914_v10 = vunpack.i.h.bf16 %v6912_v43  ;;  %v6913_v14 = vunpack.i.l.bf16 %v6912_v43  ;;  %6465 = vmatprep.subr.bf16.mxu1 %v7033_v32 }
0x1447   :  { %v3786_v20 = vsel %vm1499_vm4, %v3784_v16, %v6913_v14  ;;  %v3787_v36 = vsel %vm1499_vm4, %v3785_v5, %v6914_v10  ;;  %v7344_v10 = vld [vmem:[%s9303_s9 + $0x8] sm:$0xff]  }
0x1448   :  { %6466 = vmatpush3.bf16.msra.mxu1 %v7033_v32 }
0x1449   :  { %6491 = vmatprep.subr.bf16.mxu1 %v7344_v10 }
0x147c   :  { %v6917_v19 = vpop.permute.xlu1 %6916 }
0x147d   :  { %v6919_v15 = vunpack.i.h.bf16 %v6917_v19  ;;  %v6918_v30 = vunpack.i.l.bf16 %v6917_v19 }
0x147f   :  { %v3789_v23 = vsel %vm1502_vm5, %v3787_v36, %v6919_v15  ;;  %v3788_v26 = vsel %vm1502_vm5, %v3786_v20, %v6918_v30 }
0x1480   :  { %v3791_v17 = vpack.c.bf16 %v3789_v23, %v3788_v26 }
0x1482   :  { %6460 = vmatmul.mubr.msk.bf16.vlgmr.msra.gmra.mxu0 %vm139_vm0, %v3791_v17 }
0x1542   :  { %v6461_v50 = vpop.f32.mrf.mxu0 }
0x1543   :  { %v3861_v61 = vadd.f32 %v6461_v50, %v8405_v41 }
0x1544   :  { %v3844_v53 = vpop.f32.mrf.mxu0 }
0x1545   :  { %v3859_v33 = vadd.f32 %v3844_v53, %v8403_v38  ;;  %v8766_v0 = vadd.f32 %v8758_v2, %v3861_v61  ;;  %v8804_v61 = vrot.slane %v8753_v48, %v2226_v63 }
0x1546   :  { %v6462_v24 = vpop.f32.mrf.mxu0 }
0x1547   :  { %v8763_v59 = vadd.f32 %v8758_v2, %v3859_v33  ;;  %v3862_v27 = vadd.f32 %v6462_v24, %v8413_v21  ;;  %v3877_v56 = vsel %vm139_vm0, %v8766_v0, 0.0  ;;  %v8809_v24 = vld [vmem:[%s9302_s8 + $0x8] sm:$0xff] }
0x1548   :  { %v3847_v39 = vpop.f32.mrf.mxu0 }
0x1549   :  { %v3860_v47 = vadd.f32 %v3847_v39, %v8411_v6  ;;  %v3871_v60 = vsel %vm139_vm0, %v8763_v59, 0.0  ;;  %v8776_v38 = vadd.f32 %v8758_v2, %v3862_v27 }
0x154a   :  { %3872 = vadd.xlane.f32.xlu0 %v3871_v60  ;;  %v8813_v60 = vrot.slane %v8809_v24, %v7688_v58 }
0x154b   :  { %v8773_v41 = vadd.f32 %v8758_v2, %v3860_v47  ;;  %v3880_v6 = vsel %vm139_vm0, %v8776_v38, 0.0 }
0x154d   :  { %v3874_v45 = vsel %vm139_vm0, %v8773_v41, 0.0 }
0x154e   :  { %3878 = vadd.xlane.f32.xlu0 %v3877_v56  ;;  %3875 = vadd.xlane.f32.xlu1 %v3874_v45 }
0x1552   :  { %3881 = vadd.xlane.f32.xlu0 %v3880_v6 }
0x15d3   :  { %v3873_v21 = vpop.xlane.xlu0 %3872 }
0x15d4   :  { %v3883_v18 = vmul.f32 0.03125, %v3873_v21 }
0x15d6   :  { %v3887_v8 = vsub.f32 %v8763_v59, %v3883_v18 }
0x15d7   :  { %v3879_v42 = vpop.xlane.xlu0 %3878  ;;  %v3876_v3 = vpop.xlane.xlu1 %3875 }
0x15d8   :  { %v3885_v49 = vmul.f32 0.03125, %v3879_v42  ;;  %v3884_v11 = vmul.f32 0.03125, %v3876_v3  ;;  %v3891_v1 = vmul.f32 %v3887_v8, %v3887_v8 }
0x15da   :  { %v3889_v55 = vsub.f32 %v8766_v0, %v3885_v49  ;;  %v3888_v22 = vsub.f32 %v8773_v41, %v3884_v11  ;;  %v3895_v44 = vsel %vm139_vm0, %v3891_v1, 0.0  ;;  %v7345_v11 = vld [vmem:[%s9303_s9] sm:$0xff]   ;;  %v8831_v1 = vld [vmem:[%s9304_s10 + $0x8] sm:$0xff]  }
0x15db   :  { %3896 = vadd.xlane.f32.xlu0 %v3895_v44  ;;  %v3882_v46 = vpop.xlane.xlu0 %3881  ;;  %v7036_v44 = vld [vmem:[%s9307_s13 + $0x28] sm:$0xff]  }
0x15dc   :  { %v3886_v31 = vmul.f32 0.03125, %v3882_v46  ;;  %v3893_v12 = vmul.f32 %v3889_v55, %v3889_v55  ;;  %v3892_v29 = vmul.f32 %v3888_v22, %v3888_v22  ;;  %v7037_v46 = vld [vmem:[%s9307_s13 + $0x20] sm:$0xff]  }
0x15de   :  { %v3890_v57 = vsub.f32 %v8776_v38, %v3886_v31  ;;  %v3901_v54 = vsel %vm139_vm0, %v3893_v12, 0.0  ;;  %v3898_v52 = vsel %vm139_vm0, %v3892_v29, 0.0  ;;  %v7038_v31 = vld [vmem:[%s9307_s13 + $0x18] sm:$0xff]   ;;  %v7039_v12 = vld [vmem:[%s9307_s13 + $0x10] sm:$0xff]   ;;  %v7040_v29 = vld [vmem:[%s9307_s13 + $0x8] sm:$0xff]  }
0x15df   :  { %3902 = vadd.xlane.f32.xlu0 %v3901_v54  ;;  %3899 = vadd.xlane.f32.xlu1 %v3898_v52  ;;  %v8861_v54 = vrot.slane %v8809_v24, %v7717_v34 }
0x15e0   :  { %v3894_v25 = vmul.f32 %v3890_v57, %v3890_v57 }
0x15e2   :  { %v3904_v43 = vsel %vm139_vm0, %v3894_v25, 0.0 }
0x15e3   :  { %3905 = vadd.xlane.f32.xlu1 %v3904_v43 }
0x1664   :  { %v3897_v14 = vpop.xlane.xlu0 %3896 }
0x1665   :  { %v3907_v19 = vmul.f32 0.03125, %v3897_v14 }
0x1667   :  { %v3911_v5 = vadd.f32 1e-05, %v3907_v19 }
0x1668   :  { %v3903_v16 = vpop.xlane.xlu0 %3902  ;;  %v3900_v15 = vpop.xlane.xlu1 %3899 }
0x1669   :  { %7234 = vrsqrt.f32 %v3911_v5  ;;  %v3909_v30 = vmul.f32 0.03125, %v3903_v16  ;;  %v3908_v20 = vmul.f32 0.03125, %v3900_v15 }
0x166b   :  { %v3913_v36 = vadd.f32 1e-05, %v3909_v30  ;;  %v3912_v23 = vadd.f32 1e-05, %v3908_v20 }
0x166c   :  { %v3906_v26 = vpop.xlane.xlu1 %3905 }
0x166d   :  { %7236 = vrsqrt.f32 %v3913_v36  ;;  %v3910_v17 = vmul.f32 0.03125, %v3906_v26 }
0x166e   :  { %7238 = vrsqrt.f32 %v3912_v23 }
0x166f   :  { %v3914_v50 = vadd.f32 1e-05, %v3910_v17 }
0x1671   :  { %7240 = vrsqrt.f32 %v3914_v50 }
0x1676   :  { %v7235_v53 = vpop.eup %7234 }
0x1677   :  { %v3919_v33 = vmul.f32 %v7235_v53, %v3887_v8 }
0x1679   :  { %v3927_v45 = vmul.f32 %v8804_v61, %v3919_v33 }
0x167a   :  { %v7237_v39 = vpop.eup %7236 }
0x167b   :  { %v7239_v27 = vpop.eup %7238  ;;  %v3921_v47 = vmul.f32 %v7237_v39, %v3889_v55  ;;  %v3935_v21 = vadd.f32 %v8813_v60, %v3927_v45  ;;  %v7034_v55 = vld [vmem:[%s9307_s13 + $0x38] sm:$0xff]  }
0x167c   :  { %v3920_v56 = vmul.f32 %v7239_v27, %v3888_v22  ;;  %6471 = vmatprep.subr.bf16.mxu0 %v7034_v55  ;;  %v7035_v22 = vld [vmem:[%s9307_s13 + $0x30] sm:$0xff]  }
0x167d   :  { %v3929_v6 = vmul.f32 %v8804_v61, %v3921_v47  ;;  %6472 = vmatpush3.bf16.msra.mxu0 %v7034_v55 }
0x167e   :  { %v7241_v62 = vpop.eup %7240  ;;  %v3928_v63 = vmul.f32 %v8804_v61, %v3920_v56  ;;  %6473 = vmatprep.subr.bf16.mxu0 %v7035_v22 }
0x167f   :  { %v3922_v48 = vmul.f32 %v7241_v62, %v3890_v57  ;;  %v3937_v3 = vadd.f32 %v8813_v60, %v3929_v6  ;;  %v7041_v57 = vld [vmem:[%s9307_s13] sm:$0xff]  }
0x1680   :  { %v3936_v18 = vadd.f32 %v8813_v60, %v3928_v63 }
0x1681   :  { %v3930_v8 = vmul.f32 %v8804_v61, %v3922_v48  ;;  %6474 = vmatpush3.bf16.msra.mxu0 %v7035_v22 }
0x1682   :  { %v3939_v42 = vpack.c.bf16 %v3936_v18, %v3935_v21  ;;  %6475 = vmatprep.subr.bf16.mxu0 %v7036_v44 }
0x1683   :  { %v3938_v58 = vadd.f32 %v8813_v60, %v3930_v8 }
0x1684   :  { %6467 = vmatprep.mubr.msk.bf16.mxu1 %vm139_vm0, %v3939_v42 }
0x1685   :  { %v3940_v49 = vpack.c.bf16 %v3938_v58, %v3937_v3  ;;  %6476 = vmatpush3.bf16.msra.mxu0 %v7036_v44 }
0x1686   :  { %6477 = vmatprep.subr.bf16.mxu0 %v7037_v46 }
0x1687   :  { %6468 = vmatmul.mubr.msk.bf16.vlgmr.msra.gmra.mxu1 %vm139_vm0, %v3940_v49 }
0x1688   :  { %6492 = vmatpush3.bf16.msra.mxu1 %v7344_v10 }
0x1689   :  { %6493 = vmatprep.subr.bf16.mxu1 %v7345_v11  ;;  %6478 = vmatpush3.bf16.msra.mxu0 %v7037_v46 }
0x168a   :  { %6479 = vmatprep.subr.bf16.mxu0 %v7038_v31 }
0x168c   :  { %6494 = vmatpush3.bf16.msra.mxu1 %v7345_v11 }
0x168d   :  { %6499 = vmatprep.subr.bf16.mxu1 %v8831_v1  ;;  %6480 = vmatpush3.bf16.msra.mxu0 %v7038_v31 }
0x168e   :  { %6481 = vmatprep.subr.bf16.mxu0 %v7039_v12 }
0x1691   :  { %6482 = vmatpush3.bf16.msra.mxu0 %v7039_v12 }
0x1692   :  { %6483 = vmatprep.subr.bf16.mxu0 %v7040_v29 }
0x1695   :  { %6484 = vmatpush3.bf16.msra.mxu0 %v7040_v29 }
0x1696   :  { %6485 = vmatprep.subr.bf16.mxu0 %v7041_v57 }
0x1699   :  { %6486 = vmatpush3.bf16.msra.mxu0 %v7041_v57 }
0x169a   :  { %6519 = vmatprep.subr.bf16.mxu0 %v7382_v13 }
0x1747   :  { %v6469_v52 = vpop.f32.mrf.mxu1 }
0x1748   :  { %v4006_v25 = vadd.f32 %v6469_v52, %v8861_v54 }
0x1749   :  { %v3997_v43 = vpop.f32.mrf.mxu1 }
0x174a   :  { %v4018_v9 = vmul.f32 0.044715, %v4006_v25  ;;  %v3998_v32 = vadd.f32 %v3997_v43, %v8861_v54  ;;  %v4014_v22 = vmul.f32 0.5, %v4006_v25 }
0x174b   :  { %v6470_v10 = vpop.f32.mrf.mxu1 }
0x174c   :  { %v4022_v14 = vmul.f32 %v4018_v9, %v4006_v25  ;;  %v4016_v19 = vmul.f32 0.044715, %v3998_v32  ;;  %v4009_v5 = vadd.f32 %v6470_v10, %v8861_v54  ;;  %v4012_v49 = vmul.f32 0.5, %v3998_v32 }
0x174d   :  { %v4000_v16 = vpop.f32.mrf.mxu1  ;;  %v8871_v9 = vrot.slane %v8809_v24, %v7663_v7 }
0x174e   :  { %v4026_v15 = vmul.f32 %v4022_v14, %v4006_v25  ;;  %v4020_v30 = vmul.f32 %v4016_v19, %v3998_v32  ;;  %v4019_v20 = vmul.f32 0.044715, %v4009_v5  ;;  %v4001_v36 = vadd.f32 %v4000_v16, %v8861_v54 }
0x174f   :  { %v4015_v3 = vmul.f32 0.5, %v4009_v5 }
0x1750   :  { %v4030_v34 = vadd.f32 %v4026_v15, %v4006_v25  ;;  %v4024_v23 = vmul.f32 %v4020_v30, %v3998_v32  ;;  %v4023_v26 = vmul.f32 %v4019_v20, %v4009_v5  ;;  %v4017_v17 = vmul.f32 0.044715, %v4001_v36 }
0x1751   :  { %v4013_v11 = vmul.f32 0.5, %v4001_v36 }
0x1752   :  { %v4027_v50 = vmul.f32 %v4023_v26, %v4009_v5  ;;  %v4021_v53 = vmul.f32 %v4017_v17, %v4001_v36  ;;  %v4028_v33 = vadd.f32 %v4024_v23, %v3998_v32  ;;  %v4034_v39 = vmul.f32 0.7978846, %v4030_v34 }
0x1754   :  { %v4031_v27 = vadd.f32 %v4027_v50, %v4009_v5  ;;  %v4025_v47 = vmul.f32 %v4021_v53, %v4001_v36  ;;  %v4032_v56 = vmul.f32 0.7978846, %v4028_v33 }
0x1756   :  { %v4035_v45 = vmul.f32 0.7978846, %v4031_v27  ;;  %v4029_v62 = vadd.f32 %v4025_v47, %v4001_v36  ;;  %7242 = vtanh.f32 %v4032_v56 }
0x1757   :  { %7244 = vtanh.f32 %v4034_v39 }
0x1758   :  { %7246 = vtanh.f32 %v4035_v45  ;;  %v4033_v63 = vmul.f32 0.7978846, %v4029_v62 }
0x175a   :  { %7248 = vtanh.f32 %v4033_v63 }
0x1763   :  { %v7243_v48 = vpop.eup %7242 }
0x1764   :  { %v7245_v6 = vpop.eup %7244  ;;  %v4040_v18 = vadd.f32 1.0, %v7243_v48 }
0x1765   :  { %v7247_v21 = vpop.eup %7246  ;;  %v4042_v58 = vadd.f32 1.0, %v7245_v6 }
0x1766   :  { %v4043_v8 = vadd.f32 1.0, %v7247_v21  ;;  %v4044_v46 = vmul.f32 %v4040_v18, %v4012_v49 }
0x1767   :  { %v7249_v42 = vpop.eup %7248  ;;  %v4046_v12 = vmul.f32 %v4042_v58, %v4014_v22 }
0x1768   :  { %v4041_v55 = vadd.f32 1.0, %v7249_v42  ;;  %v4047_v44 = vmul.f32 %v4043_v8, %v4015_v3 }
0x176a   :  { %v4045_v31 = vmul.f32 %v4041_v55, %v4013_v11  ;;  %v4049_v57 = vpack.c.bf16 %v4047_v44, %v4046_v12 }
0x176c   :  { %v4048_v29 = vpack.c.bf16 %v4045_v31, %v4044_v46 }
0x176e   :  { %6487 = vmatprep.mubr.bf16.mxu0 %v4048_v29 }
0x176f   :  { %6488 = vmatmul.mubr.bf16.vlgmr.msra.gmra.mxu0 %v4049_v57 }
0x1770   :  { %6521 = vmatprep.mubr.msk.bf16.mxu0 %vm7383_vm1, %v7382_v13 }
0x182f   :  { %v6489_v52 = vpop.f32.mrf.mxu0 }
0x1830   :  { %v4149_v32 = vadd.f32 %v6489_v52, %v8766_v0 }
0x1831   :  { %v4132_v43 = vpop.f32.mrf.mxu0 }
0x1832   :  { %v4147_v25 = vadd.f32 %v4132_v43, %v8763_v59  ;;  %v8879_v5 = vadd.f32 %v8871_v9, %v4149_v32 }
0x1833   :  { %v6490_v10 = vpop.f32.mrf.mxu0 }
0x1834   :  { %v8876_v14 = vadd.f32 %v8871_v9, %v4147_v25  ;;  %v4150_v16 = vadd.f32 %v6490_v10, %v8776_v38  ;;  %v4165_v24 = vsel %vm139_vm0, %v8879_v5, 0.0 }
0x1835   :  { %v4135_v19 = vpop.f32.mrf.mxu0 }
0x1836   :  { %v4148_v15 = vadd.f32 %v4135_v19, %v8773_v41  ;;  %v4159_v7 = vsel %vm139_vm0, %v8876_v14, 0.0  ;;  %v8889_v59 = vadd.f32 %v8871_v9, %v4150_v16 }
0x1837   :  { %4160 = vadd.xlane.f32.xlu0 %v4159_v7 }
0x1838   :  { %v8886_v0 = vadd.f32 %v8871_v9, %v4148_v15  ;;  %v4168_v41 = vsel %vm139_vm0, %v8889_v59, 0.0 }
0x183a   :  { %v4162_v30 = vsel %vm139_vm0, %v8886_v0, 0.0 }
0x183b   :  { %4166 = vadd.xlane.f32.xlu0 %v4165_v24  ;;  %4163 = vadd.xlane.f32.xlu1 %v4162_v30 }
0x183f   :  { %4169 = vadd.xlane.f32.xlu1 %v4168_v41 }
0x18c0   :  { %v4161_v38 = vpop.xlane.xlu0 %4160 }
0x18c1   :  { %v4171_v20 = vmul.f32 0.03125, %v4161_v38 }
0x18c3   :  { %v4175_v36 = vsub.f32 %v8876_v14, %v4171_v20 }
0x18c4   :  { %v4167_v34 = vpop.xlane.xlu0 %4166  ;;  %v4164_v23 = vpop.xlane.xlu1 %4163 }
0x18c5   :  { %v4173_v26 = vmul.f32 0.03125, %v4167_v34  ;;  %v4172_v17 = vmul.f32 0.03125, %v4164_v23  ;;  %v4179_v50 = vmul.f32 %v4175_v36, %v4175_v36 }
0x18c7   :  { %v4177_v53 = vsub.f32 %v8879_v5, %v4173_v26  ;;  %v4176_v33 = vsub.f32 %v8886_v0, %v4172_v17  ;;  %v4183_v39 = vsel %vm139_vm0, %v4179_v50, 0.0 }
0x18c8   :  { %4184 = vadd.xlane.f32.xlu0 %v4183_v39  ;;  %v4170_v27 = vpop.xlane.xlu1 %4169 }
0x18c9   :  { %v4174_v47 = vmul.f32 0.03125, %v4170_v27  ;;  %v4181_v56 = vmul.f32 %v4177_v53, %v4177_v53  ;;  %v4180_v45 = vmul.f32 %v4176_v33, %v4176_v33 }
0x18cb   :  { %v4178_v62 = vsub.f32 %v8889_v59, %v4174_v47  ;;  %v4189_v63 = vsel %vm139_vm0, %v4181_v56, 0.0  ;;  %v4186_v48 = vsel %vm139_vm0, %v4180_v45, 0.0 }
0x18cc   :  { %4190 = vadd.xlane.f32.xlu0 %v4189_v63  ;;  %4187 = vadd.xlane.f32.xlu1 %v4186_v48 }
0x18cd   :  { %v4182_v6 = vmul.f32 %v4178_v62, %v4178_v62 }
0x18cf   :  { %v4192_v21 = vsel %vm139_vm0, %v4182_v6, 0.0 }
0x18d0   :  { %4193 = vadd.xlane.f32.xlu1 %v4192_v21 }
0x1951   :  { %v4185_v18 = vpop.xlane.xlu0 %4184 }
0x1952   :  { %v4195_v8 = vmul.f32 0.03125, %v4185_v18 }
0x1954   :  { %v4199_v42 = vadd.f32 1e-05, %v4195_v8 }
0x1955   :  { %v4191_v3 = vpop.xlane.xlu0 %4190  ;;  %v4188_v58 = vpop.xlane.xlu1 %4187 }
0x1956   :  { %7250 = vrsqrt.f32 %v4199_v42  ;;  %v4197_v49 = vmul.f32 0.03125, %v4191_v3  ;;  %v4196_v11 = vmul.f32 0.03125, %v4188_v58 }
0x1958   :  { %v4201_v55 = vadd.f32 1e-05, %v4197_v49  ;;  %v4200_v22 = vadd.f32 1e-05, %v4196_v11 }
0x1959   :  { %v4194_v44 = vpop.xlane.xlu1 %4193 }
0x195a   :  { %7252 = vrsqrt.f32 %v4201_v55  ;;  %v4198_v46 = vmul.f32 0.03125, %v4194_v44 }
0x195b   :  { %7254 = vrsqrt.f32 %v4200_v22 }
0x195c   :  { %v4202_v31 = vadd.f32 1e-05, %v4198_v46 }
0x195e   :  { %7256 = vrsqrt.f32 %v4202_v31 }
0x1963   :  { %v7251_v12 = vpop.eup %7250 }
0x1964   :  { %v4207_v29 = vmul.f32 %v7251_v12, %v4175_v36 }
0x1966   :  { %v4211_v25 = vmul.f32 %v4207_v29, %v8442_v51  ;;  %v4221_v41 = vmul.f32 %v4207_v29, %v8449_v35 }
0x1967   :  { %v7253_v57 = vpop.eup %7252 }
0x1968   :  { %v7255_v52 = vpop.eup %7254  ;;  %v4209_v43 = vmul.f32 %v7253_v57, %v4177_v53  ;;  %v4215_v24 = vadd.f32 %v4211_v25, %v8445_v28  ;;  %v4225_v26 = vadd.f32 %v4221_v41, %v8459_v4 }
0x1969   :  { %v4208_v32 = vmul.f32 %v7255_v52, %v4176_v33 }
0x196a   :  { %v4213_v7 = vmul.f32 %v4209_v43, %v8442_v51  ;;  %v4223_v33 = vmul.f32 %v4209_v43, %v8449_v35 }
0x196b   :  { %v7257_v10 = vpop.eup %7256  ;;  %v4212_v19 = vmul.f32 %v4208_v32, %v8442_v51  ;;  %v4222_v16 = vmul.f32 %v4208_v32, %v8449_v35 }
0x196c   :  { %v4210_v15 = vmul.f32 %v7257_v10, %v4178_v62  ;;  %v4217_v34 = vadd.f32 %v4213_v7, %v8445_v28  ;;  %v4227_v39 = vadd.f32 %v4223_v33, %v8459_v4 }
0x196d   :  { %v4216_v30 = vadd.f32 %v4212_v19, %v8445_v28  ;;  %v4226_v36 = vadd.f32 %v4222_v16, %v8459_v4 }
0x196e   :  { %v4214_v38 = vmul.f32 %v4210_v15, %v8442_v51  ;;  %v4224_v50 = vmul.f32 %v4210_v15, %v8449_v35  ;;  %v7347_v51 = vld [vmem:[%s9304_s10] sm:$0xff]  }
0x196f   :  { %v4219_v20 = vpack.c.bf16 %v4216_v30, %v4215_v24  ;;  %v4229_v53 = vpack.c.bf16 %v4226_v36, %v4225_v26 }
0x1970   :  { %v4218_v23 = vadd.f32 %v4214_v38, %v8445_v28  ;;  %v4228_v28 = vadd.f32 %v4224_v50, %v8459_v4 }
0x1971   :  { %6495 = vmatprep.mubr.msk.bf16.mxu1 %vm139_vm0, %v4219_v20 }
0x1972   :  { %v4220_v17 = vpack.c.bf16 %v4218_v23, %v4217_v34  ;;  %v4230_v27 = vpack.c.bf16 %v4228_v28, %v4227_v39 }
0x1974   :  { %6496 = vmatmul.mubr.msk.bf16.vlgmr.msra.gmra.mxu1 %vm139_vm0, %v4220_v17 }
0x1975   :  { %6500 = vmatpush3.bf16.msra.mxu1 %v8831_v1  ;;  %6503 = vmatprep.mubr.msk.bf16.mxu1 %vm139_vm0, %v4229_v53 }
0x1976   :  { %6501 = vmatprep.subr.bf16.mxu1 %v7347_v51 }
0x1979   :  { %6502 = vmatpush3.bf16.msra.mxu1 %v7347_v51 }
0x197a   :  { %6507 = vmatprep.subr.bf16.mxu1 %v7382_v13 }
0x197c   :  { %6504 = vmatmul.mubr.msk.bf16.vlgmr.msra.gmra.mxu1 %vm139_vm0, %v4230_v27 }
0x197d   :  { %6509 = vmatprep.mubr.msk.bf16.mxu1 %vm7383_vm1, %v7382_v13 }
0x1a34   :  { %v6497_v35 = vpop.f32.mrf.mxu1 }
0x1a35   :  { %v8933_v56 = vadd.f32 %v6497_v35, %v8482_v37 }
0x1a36   :  { %v4271_v1 = vpop.f32.mrf.mxu1 }
0x1a37   :  { %v4272_v4 = vadd.f32 %v4271_v1, %v8482_v37 }
0x1a38   :  { %v6498_v47 = vpop.f32.mrf.mxu1 }
0x1a39   :  { %v8936_v45 = vadd.f32 %v6498_v47, %v8482_v37 }
0x1a3a   :  { %v4274_v62 = vpop.f32.mrf.mxu1 }
0x1a3b   :  { %v4382_v63 = vpack.c.bf16 %v8936_v45, %v8933_v56  ;;  %v4275_v48 = vadd.f32 %v4274_v62, %v8482_v37  ;;  %v8944_v6 = vpack.i.bf16 %v8936_v45, %v8933_v56 }
0x1a3c   :  { %v6505_v21 = vpop.f32.mrf.mxu1 }
0x1a3d   :  { %v6925_v18 = vpack.i.bf16 %v4275_v48, %v4272_v4  ;;  %v4335_v3 = vadd.f32 %v6505_v21, %v8500_v40 }
0x1a3e   :  { %v4326_v8 = vpop.f32.mrf.mxu1 }
0x1a3f   :  { %6926 = vrot.lane.b32.xlu1 %v6925_v18, %s7384_s28  ;;  %v4327_v49 = vadd.f32 %v4326_v8, %v8500_v40 }
0x1a40   :  { %v6506_v42 = vpop.f32.mrf.mxu1 }
0x1a41   :  { %v4338_v58 = vadd.f32 %v6506_v42, %v8500_v40 }
0x1a42   :  { %v4329_v11 = vpop.f32.mrf.mxu1 }
0x1a43   :  { %v4330_v55 = vadd.f32 %v4329_v11, %v8500_v40  ;;  %v8951_v37 = vpack.i.bf16 %v4338_v58, %v4335_v3  ;;  %v8953_v22 = vpack.c.bf16 %v4338_v58, %v4335_v3  ;;  %v4381_v40 = vpack.c.bf16 %v4275_v48, %v4272_v4 }
0x1a45   :  { %v6920_v44 = vpack.i.bf16 %v4330_v55, %v4327_v49  ;;  %v8955_v46 = vpack.c.bf16 %v4330_v55, %v4327_v49 }
0x1a47   :  { %6921 = vrot.lane.b32.xlu0 %v6920_v44, %s7384_s28  ;;  %6931 = vrot.lane.b32.xlu1 %v6920_v44, %s7385_s29  ;;  %v4441_v31 = vsel %vm915_vm2, %v8955_v46, 0 }
0x1a48   :  { %6508 = vmatpush3.bf16.xpose.msra.mxu1 %v4441_v31 }
0x1a49   :  { %6513 = vmatprep.subr.bf16.mxu1 %v7382_v13 }
0x1a4b   :  { %6941 = vrot.lane.b32.xlu0 %v6925_v18, %s7385_s29  ;;  %6936 = vrot.lane.b32.xlu1 %v6920_v44, %s7386_s30 }
0x1a4f   :  { %6946 = vrot.lane.b32.xlu1 %v6925_v18, %s7386_s30  ;;  %6510 = vmatmul.mubr.msk.bf16.vlgmr.msra.gmra.mxu1 %vm915_vm2, %v4381_v40 }
0x1a50   :  { %6515 = vmatprep.mubr.msk.bf16.mxu1 %vm7383_vm1, %v7382_v13 }
0x1ab1   :  { %v6927_v12 = vpop.permute.xlu1 %6926 }
0x1ab2   :  { %v6929_v38 = vunpack.i.h.bf16 %v6927_v12  ;;  %v6928_v20 = vunpack.i.l.bf16 %v6927_v12 }
0x1ab4   :  { %v4383_v26 = vpack.c.bf16 %v6929_v38, %v6928_v20 }
0x1ab9   :  { %v6922_v29 = vpop.permute.xlu0 %6921  ;;  %v6932_v57 = vpop.permute.xlu1 %6931 }
0x1aba   :  { %v6924_v52 = vunpack.i.h.bf16 %v6922_v29  ;;  %v6923_v43 = vunpack.i.l.bf16 %v6922_v29  ;;  %v6934_v32 = vunpack.i.h.bf16 %v6932_v57  ;;  %v6933_v25 = vunpack.i.l.bf16 %v6932_v57 }
0x1abc   :  { %v4431_v10 = vpack.c.bf16 %v6924_v52, %v6923_v43  ;;  %v4433_v19 = vpack.c.bf16 %v6934_v32, %v6933_v25 }
0x1abd   :  { %v6937_v16 = vpop.permute.xlu1 %6936  ;;  %v6942_v15 = vpop.permute.xlu0 %6941 }
0x1abe   :  { %v6939_v7 = vunpack.i.h.bf16 %v6937_v16  ;;  %v6938_v24 = vunpack.i.l.bf16 %v6937_v16  ;;  %v4488_v30 = vsel %vm915_vm2, %v4431_v10, 0  ;;  %v4535_v41 = vsel %vm915_vm2, %v4433_v19, 0 }
0x1abf   :  { %6514 = vmatpush3.bf16.xpose.msra.mxu1 %v4488_v30  ;;  %6520 = vmatpush3.bf16.xpose.msra.mxu0 %v4535_v41  ;;  %v6944_v36 = vunpack.i.h.bf16 %v6942_v15  ;;  %v6943_v34 = vunpack.i.l.bf16 %v6942_v15 }
0x1ac0   :  { %6525 = vmatprep.subr.bf16.mxu1 %v7382_v13  ;;  %6531 = vmatprep.subr.bf16.mxu0 %v7382_v13  ;;  %v4435_v23 = vpack.c.bf16 %v6939_v7, %v6938_v24 }
0x1ac1   :  { %v4385_v17 = vpack.c.bf16 %v6944_v36, %v6943_v34  ;;  %v6947_v50 = vpop.permute.xlu1 %6946 }
0x1ac2   :  { %v4582_v53 = vsel %vm915_vm2, %v4435_v23, 0  ;;  %v6949_v33 = vunpack.i.h.bf16 %v6947_v50  ;;  %v6948_v51 = vunpack.i.l.bf16 %v6947_v50 }
0x1ac4   :  { %v4387_v28 = vpack.c.bf16 %v6949_v33, %v6948_v51 }
0x1ac6   :  { %6516 = vmatmul.mubr.msk.bf16.vlgmr.msra.gmra.mxu1 %vm915_vm2, %v4383_v26  ;;  %6522 = vmatmul.mubr.msk.bf16.vlgmr.msra.gmra.mxu0 %vm915_vm2, %v4385_v17 }
0x1ac7   :  { %6526 = vmatpush3.bf16.xpose.msra.mxu1 %v4582_v53  ;;  %6527 = vmatprep.mubr.msk.bf16.mxu1 %vm7383_vm1, %v7382_v13 }
0x1ac8   :  { %6537 = vmatprep.subr.bf16.mxu1 %v7382_v13  ;;  %6533 = vmatprep.mubr.msk.bf16.mxu0 %vm7383_vm1, %v7382_v13 }
0x1ace   :  { %6528 = vmatmul.mubr.msk.bf16.vlgmr.msra.gmra.mxu1 %vm915_vm2, %v4387_v28 }
0x1acf   :  { %6539 = vmatprep.mubr.msk.bf16.mxu1 %vm7383_vm1, %v7382_v13 }
0x1b0f   :  { %v4477_v39 = vpop.f32.mrf.mxu1 }
0x1b10   :  { %v4625_v27 = vsel %vm1499_vm4, %v4477_v39, -inf }
0x1b11   :  { %4626 = vmax.xlane.f32.xlu0 %v4625_v27  ;;  %v6511_v35 = vpop.f32.mrf.mxu1 }
0x1b13   :  { %v4480_v1 = vpop.f32.mrf.mxu1 }
0x1b14   :  { %v4628_v47 = vsel %vm1499_vm4, %v4480_v1, -inf }
0x1b15   :  { %4629 = vmax.xlane.f32.xlu1 %v4628_v47  ;;  %v6512_v4 = vpop.f32.mrf.mxu1 }
0x1b86   :  { %v4524_v62 = vpop.f32.mrf.mxu1  ;;  %v4571_v48 = vpop.f32.mrf.mxu0 }
0x1b87   :  { %v4631_v21 = vsel %vm1499_vm4, %v4524_v62, -inf  ;;  %v4637_v31 = vsel %vm1499_vm4, %v4571_v48, -inf }
0x1b88   :  { %v6523_v18 = vpop.f32.mrf.mxu0  ;;  %4632 = vmax.xlane.f32.xlu0 %v4631_v21  ;;  %v6517_v8 = vpop.f32.mrf.mxu1 }
0x1b8a   :  { %v4527_v42 = vpop.f32.mrf.mxu1  ;;  %v4574_v3 = vpop.f32.mrf.mxu0 }
0x1b8b   :  { %v4640_v58 = vsel %vm1499_vm4, %v4574_v3, -inf  ;;  %v4634_v49 = vsel %vm1499_vm4, %v4527_v42, -inf }
0x1b8c   :  { %v6524_v11 = vpop.f32.mrf.mxu0  ;;  %4641 = vmax.xlane.f32.xlu1 %v4640_v58  ;;  %4635 = vmax.xlane.f32.xlu0 %v4634_v49  ;;  %v6518_v55 = vpop.f32.mrf.mxu1 }
0x1b8e   :  { %v4618_v44 = vpop.f32.mrf.mxu1 }
0x1b8f   :  { %v4643_v29 = vsel %vm1499_vm4, %v4618_v44, -inf }
0x1b90   :  { %4638 = vmax.xlane.f32.xlu0 %v4637_v31  ;;  %v6529_v40 = vpop.f32.mrf.mxu1 }
0x1b92   :  { %v8989_v12 = vpop.f32.mrf.mxu1 }
0x1b93   :  { %v4646_v25 = vsel %vm1499_vm4, %v8989_v12, -inf }
0x1b94   :  { %4644 = vmax.xlane.f32.xlu0 %v4643_v29  ;;  %v6530_v57 = vpop.f32.mrf.mxu1 }
0x1b9a   :  { %v4627_v52 = vpop.xlane.xlu0 %4626 }
0x1b9b   :  { %v4649_v43 = vsub.f32 %v4477_v39, %v4627_v52 }
0x1b9d   :  { %4766 = vrot.lane.b32.xlu1 %v4431_v10, %s7387_s15  ;;  %v4657_v32 = vmul.f32 1.442695, %v4649_v43 }
0x1b9e   :  { %v4630_v10 = vpop.xlane.xlu1 %4629 }
0x1b9f   :  { %7258 = vpow2.f32 %v4657_v32 }
0x1ba1   :  { %4814 = vrot.lane.b32.xlu1 %v4433_v19, %s7387_s15  ;;  %v4650_v19 = vsub.f32 %v4480_v1, %v4630_v10 }
0x1ba3   :  { %v4659_v7 = vmul.f32 1.442695, %v4650_v19 }
0x1ba5   :  { %7260 = vpow2.f32 %v4659_v7 }
0x1baa   :  { %4718 = vrot.lane.b32.xlu0 %v8955_v46, %s7387_s15 }
0x1bac   :  { %v8998_v16 = vpop.eup %7258 }
0x1bad   :  { %v4673_v15 = vsel %vm1499_vm4, %v8998_v16, 0.0 }
0x1bb2   :  { %v9003_v46 = vpop.eup %7260 }
0x1bb3   :  { %v4676_v24 = vsel %vm1499_vm4, %v9003_v46, 0.0 }
0x1bc5   :  { %4647 = vmax.xlane.f32.xlu1 %v4646_v25 }
0x1bc9   :  { %4674 = vadd.xlane.f32.xlu0 %v4673_v15 }
0x1bd6   :  { %4862 = vrot.lane.b32.xlu1 %v4435_v23, %s7387_s15 }
0x1bfa   :  { %4677 = vadd.xlane.f32.xlu1 %v4676_v24 }
0x1c11   :  { %v4633_v30 = vpop.xlane.xlu0 %4632 }
0x1c12   :  { %v4651_v41 = vsub.f32 %v4524_v62, %v4633_v30 }
0x1c14   :  { %v4661_v38 = vmul.f32 1.442695, %v4651_v41 }
0x1c15   :  { %v4642_v20 = vpop.xlane.xlu1 %4641  ;;  %v4636_v36 = vpop.xlane.xlu0 %4635 }
0x1c16   :  { %7262 = vpow2.f32 %v4661_v38  ;;  %v4654_v34 = vsub.f32 %v4574_v3, %v4642_v20  ;;  %v4652_v26 = vsub.f32 %v4527_v42, %v4636_v36 }
0x1c18   :  { %v4663_v17 = vmul.f32 1.442695, %v4652_v26  ;;  %v4667_v23 = vmul.f32 1.442695, %v4654_v34 }
0x1c19   :  { %v4767_v50 = vpop.permute.xlu1 %4766  ;;  %v4639_v53 = vpop.xlane.xlu0 %4638 }
0x1c1a   :  { %v4653_v33 = vsub.f32 %v4571_v48, %v4639_v53  ;;  %6538 = vmatpush3.bf16.msra.mxu1 %v4767_v50  ;;  %7264 = vpow2.f32 %v4663_v17  ;;  %v4943_v53 = vsel %vm915_vm2, %v8953_v22, 0 }
0x1c1b   :  { %6549 = vmatprep.subr.bf16.mxu1 %v7382_v13  ;;  %7266 = vpow2.f32 %v4667_v23 }
0x1c1c   :  { %v4665_v51 = vmul.f32 1.442695, %v4653_v33 }
0x1c1d   :  { %v4645_v28 = vpop.xlane.xlu0 %4644  ;;  %v4815_v58 = vpop.permute.xlu1 %4814 }
0x1c1e   :  { %7268 = vpow2.f32 %v4665_v51  ;;  %v4655_v39 = vsub.f32 %v4618_v44, %v4645_v28 }
0x1c20   :  { %v4669_v27 = vmul.f32 1.442695, %v4655_v39 }
0x1c21   :  { %v4719_v35 = vpop.permute.xlu0 %4718 }
0x1c22   :  { %7270 = vpow2.f32 %v4669_v27  ;;  %6532 = vmatpush3.bf16.msra.mxu0 %v4719_v35 }
0x1c23   :  { %v7263_v1 = vpop.eup %7262  ;;  %6543 = vmatprep.subr.bf16.mxu0 %v7382_v13 }
0x1c24   :  { %v4679_v47 = vsel %vm1499_vm4, %v7263_v1, 0.0 }
0x1c25   :  { %4680 = vadd.xlane.f32.xlu0 %v4679_v47 }
0x1c27   :  { %v7265_v4 = vpop.eup %7264 }
0x1c28   :  { %v4682_v62 = vsel %vm1499_vm4, %v7265_v4, 0.0  ;;  %v7267_v48 = vpop.eup %7266 }
0x1c29   :  { %4683 = vadd.xlane.f32.xlu1 %v4682_v62  ;;  %v4688_v8 = vsel %vm1499_vm4, %v7267_v48, 0.0 }
0x1c2b   :  { %v7269_v21 = vpop.eup %7268 }
0x1c2c   :  { %v4685_v18 = vsel %vm1499_vm4, %v7269_v21, 0.0 }
0x1c2d   :  { %4686 = vadd.xlane.f32.xlu0 %v4685_v18  ;;  %4689 = vadd.xlane.f32.xlu1 %v4688_v8 }
0x1c2f   :  { %v9013_v42 = vpop.eup %7270 }
0x1c30   :  { %v4691_v3 = vsel %vm1499_vm4, %v9013_v42, 0.0 }
0x1c31   :  { %4692 = vadd.xlane.f32.xlu0 %v4691_v3 }
0x1c3e   :  { %6956 = vrot.lane.b32.xlu1 %v8951_v37, %s7385_s29 }
0x1c47   :  { %6951 = vrot.lane.b32.xlu0 %v8951_v37, %s7384_s28 }
0x1c4b   :  { %6961 = vrot.lane.b32.xlu0 %v8944_v6, %s7384_s28 }
0x1c4e   :  { %v4648_v49 = vpop.xlane.xlu1 %4647 }
0x1c4f   :  { %v4656_v11 = vsub.f32 %v8989_v12, %v4648_v49  ;;  %6971 = vrot.lane.b32.xlu0 %v8944_v6, %s7385_s29 }
0x1c51   :  { %v4671_v55 = vmul.f32 1.442695, %v4656_v11 }
0x1c52   :  { %v4675_v40 = vpop.xlane.xlu0 %4674  ;;  %v4863_v29 = vpop.permute.xlu1 %4862 }
0x1c53   :  { %7272 = vpow2.f32 %v4671_v55 }
0x1c54   :  { %7274 = vrcp.f32 %v4675_v40 }
0x1c60   :  { %v9026_v44 = vpop.eup %7272 }
0x1c61   :  { %v4694_v31 = vsel %vm1499_vm4, %v9026_v44, 0.0  ;;  %v7275_v57 = vpop.eup %7274 }
0x1c62   :  { %4695 = vadd.xlane.f32.xlu1 %v4694_v31  ;;  %v4705_v43 = vmul.f32 %v7275_v57, %v8998_v16 }
0x1c73   :  { %6966 = vrot.lane.b32.xlu1 %v8951_v37, %s7386_s30 }
0x1c77   :  { %6976 = vrot.lane.b32.xlu1 %v8944_v6, %s7386_s30 }
0x1c83   :  { %v4678_v12 = vpop.xlane.xlu1 %4677 }
0x1c84   :  { %7276 = vrcp.f32 %v4678_v12 }
0x1c91   :  { %v7277_v52 = vpop.eup %7276 }
0x1c92   :  { %v4706_v32 = vmul.f32 %v7277_v52, %v9003_v46 }
0x1c94   :  { %v4713_v25 = vpack.c.bf16 %v4706_v32, %v4705_v43 }
0x1c96   :  { %6534 = vmatmul.mubr.msk.bf16.vlgmr.msra.gmra.mxu0 %vm1499_vm4, %v4713_v25 }
0x1c97   :  { %6544 = vmatpush3.bf16.msra.mxu0 %v4815_v58  ;;  %6545 = vmatprep.mubr.msk.bf16.mxu0 %vm7383_vm1, %v7382_v13 }
0x1c98   :  { %6555 = vmatprep.subr.bf16.mxu0 %v7382_v13 }
0x1cae   :  { %v4681_v6 = vpop.xlane.xlu0 %4680 }
0x1caf   :  { %7278 = vrcp.f32 %v4681_v6 }
0x1cb2   :  { %v4684_v37 = vpop.xlane.xlu1 %4683 }
0x1cb3   :  { %7280 = vrcp.f32 %v4684_v37 }
0x1cb6   :  { %v4687_v15 = vpop.xlane.xlu0 %4686  ;;  %v4690_v10 = vpop.xlane.xlu1 %4689 }
0x1cb7   :  { %7282 = vrcp.f32 %v4687_v15 }
0x1cb8   :  { %7284 = vrcp.f32 %v4690_v10 }
0x1cba   :  { %v4693_v19 = vpop.xlane.xlu0 %4692  ;;  %v6957_v26 = vpop.permute.xlu1 %6956 }
0x1cbb   :  { %v6959_v23 = vunpack.i.h.bf16 %v6957_v26  ;;  %v6958_v50 = vunpack.i.l.bf16 %v6957_v26  ;;  %7286 = vrcp.f32 %v4693_v19 }
0x1cbc   :  { %v7279_v16 = vpop.eup %7278 }
0x1cbd   :  { %v4707_v46 = vmul.f32 %v7279_v16, %v7263_v1  ;;  %v9050_v51 = vpack.c.bf16 %v6959_v23, %v6958_v50 }
0x1cbe   :  { %v6952_v20 = vpop.permute.xlu0 %6951 }
0x1cbf   :  { %v5037_v39 = vsel %vm915_vm2, %v9050_v51, 0  ;;  %v6954_v45 = vunpack.i.h.bf16 %v6952_v20 }
0x1cc0   :  { %v7281_v7 = vpop.eup %7280 }
0x1cc1   :  { %v4708_v24 = vmul.f32 %v7281_v7, %v7265_v4 }
0x1cc2   :  { %v6962_v33 = vpop.permute.xlu0 %6961 }
0x1cc3   :  { %v4714_v41 = vpack.c.bf16 %v4708_v24, %v4707_v46  ;;  %v6964_v11 = vunpack.i.h.bf16 %v6962_v33  ;;  %v6963_v55 = vunpack.i.l.bf16 %v6962_v33 }
0x1cc4   :  { %v7283_v30 = vpop.eup %7282 }
0x1cc5   :  { %v7285_v38 = vpop.eup %7284  ;;  %v4709_v36 = vmul.f32 %v7283_v30, %v7269_v21  ;;  %6540 = vmatmul.mubr.msk.bf16.vlgmr.msra.gmra.mxu1 %vm1499_vm4, %v4714_v41 }
0x1cc6   :  { %v4710_v34 = vmul.f32 %v7285_v38, %v7267_v48  ;;  %6550 = vmatpush3.bf16.msra.mxu1 %v4863_v29  ;;  %6551 = vmatprep.mubr.msk.bf16.mxu1 %vm7383_vm1, %v7382_v13  ;;  %v6972_v28 = vpop.permute.xlu0 %6971 }
0x1cc7   :  { %6561 = vmatprep.subr.bf16.mxu1 %v7382_v13  ;;  %v6974_v27 = vunpack.i.h.bf16 %v6972_v28  ;;  %v6973_v35 = vunpack.i.l.bf16 %v6972_v28 }
0x1cc8   :  { %v4715_v17 = vpack.c.bf16 %v4710_v34, %v4709_v36  ;;  %v7287_v47 = vpop.eup %7286 }
0x1cc9   :  { %v4386_v1 = vpack.c.bf16 %v6974_v27, %v6973_v35  ;;  %v4711_v62 = vmul.f32 %v7287_v47, %v9013_v42 }
0x1cca   :  { %6546 = vmatmul.mubr.msk.bf16.vlgmr.msra.gmra.mxu0 %vm1499_vm4, %v4715_v17 }
0x1ccb   :  { %6556 = vmatpush3.bf16.xpose.msra.mxu0 %v4943_v53  ;;  %6557 = vmatprep.mubr.msk.bf16.mxu0 %vm7383_vm1, %v7382_v13 }
0x1ccc   :  { %6567 = vmatprep.subr.bf16.mxu0 %v7382_v13 }
0x1cd2   :  { %6558 = vmatmul.mubr.msk.bf16.vlgmr.msra.gmra.mxu0 %vm915_vm2, %v4382_v63  ;;  %v6953_v63 = vunpack.i.l.bf16 %v6952_v20 }
0x1cd3   :  { %6568 = vmatpush3.bf16.xpose.msra.mxu0 %v5037_v39  ;;  %6569 = vmatprep.mubr.msk.bf16.mxu0 %vm7383_vm1, %v7382_v13 }
0x1cd4   :  { %6579 = vmatprep.subr.bf16.mxu0 %v7382_v13  ;;  %v9065_v48 = vpack.c.bf16 %v6954_v45, %v6953_v63 }
0x1cd6   :  { %v4990_v49 = vsel %vm915_vm2, %v9065_v48, 0 }
0x1cda   :  { %6570 = vmatmul.mubr.msk.bf16.vlgmr.msra.gmra.mxu0 %vm915_vm2, %v4386_v1 }
0x1cdb   :  { %6581 = vmatprep.mubr.msk.bf16.mxu0 %vm7383_vm1, %v7382_v13 }
0x1ceb   :  { %v4696_v56 = vpop.xlane.xlu1 %4695 }
0x1cec   :  { %7288 = vrcp.f32 %v4696_v56 }
0x1cef   :  { %v6967_v18 = vpop.permute.xlu1 %6966 }
0x1cf0   :  { %v6969_v3 = vunpack.i.h.bf16 %v6967_v18  ;;  %v6968_v58 = vunpack.i.l.bf16 %v6967_v18 }
0x1cf2   :  { %v9074_v42 = vpack.c.bf16 %v6969_v3, %v6968_v58 }
0x1cf3   :  { %v6977_v31 = vpop.permute.xlu1 %6976 }
0x1cf4   :  { %v5084_v40 = vsel %vm915_vm2, %v9074_v42, 0  ;;  %v6979_v29 = vunpack.i.h.bf16 %v6977_v31  ;;  %v6978_v12 = vunpack.i.l.bf16 %v6977_v31 }
0x1cf6   :  { %v4388_v57 = vpack.c.bf16 %v6979_v29, %v6978_v12 }
0x1cf9   :  { %v7289_v4 = vpop.eup %7288 }
0x1cfa   :  { %v4712_v21 = vmul.f32 %v7289_v4, %v9026_v44  ;;  %v4384_v44 = vpack.c.bf16 %v6964_v11, %v6963_v55 }
0x1cfc   :  { %v4716_v8 = vpack.c.bf16 %v4712_v21, %v4711_v62 }
0x1cfe   :  { %6552 = vmatmul.mubr.msk.bf16.vlgmr.msra.gmra.mxu1 %vm1499_vm4, %v4716_v8 }
0x1cff   :  { %6562 = vmatpush3.bf16.xpose.msra.mxu1 %v4990_v49  ;;  %6563 = vmatprep.mubr.msk.bf16.mxu1 %vm7383_vm1, %v7382_v13 }
0x1d00   :  { %6573 = vmatprep.subr.bf16.mxu1 %v7382_v13 }
0x1d06   :  { %6564 = vmatmul.mubr.msk.bf16.vlgmr.msra.gmra.mxu1 %vm915_vm2, %v4384_v44 }
0x1d07   :  { %6574 = vmatpush3.bf16.xpose.msra.mxu1 %v5084_v40  ;;  %6575 = vmatprep.mubr.msk.bf16.mxu1 %vm7383_vm1, %v7382_v13 }
0x1d08   :  { %6585 = vmatprep.subr.bf16.mxu1 %v7382_v13 }
0x1d0e   :  { %6576 = vmatmul.mubr.msk.bf16.vlgmr.msra.gmra.mxu1 %vm915_vm2, %v4388_v57 }
0x1d0f   :  { %6587 = vmatprep.mubr.msk.bf16.mxu1 %vm7383_vm1, %v7382_v13 }
0x1d56   :  { %v9085_v52 = vpop.f32.mrf.mxu0 }
0x1d58   :  { %v6535_v43 = vpop.f32.mrf.mxu0 }
0x1d5a   :  { %v9087_v32 = vpop.f32.mrf.mxu0 }
0x1d5c   :  { %v6536_v25 = vpop.f32.mrf.mxu0 }
0x1d85   :  { %v9089_v6 = vpop.f32.mrf.mxu1 }
0x1d87   :  { %v6541_v37 = vpop.f32.mrf.mxu1 }
0x1d89   :  { %v9091_v15 = vpop.f32.mrf.mxu1 }
0x1d8a   :  { %v9093_v10 = vpop.f32.mrf.mxu0  ;;  %v6980_v16 = vpack.i.bf16 %v9091_v15, %v9089_v6 }
0x1d8b   :  { %v6542_v19 = vpop.f32.mrf.mxu1 }
0x1d8c   :  { %v6547_v7 = vpop.f32.mrf.mxu0 }
0x1d8e   :  { %v9097_v46 = vpop.f32.mrf.mxu0 }
0x1d8f   :  { %v6985_v24 = vpack.i.bf16 %v9097_v46, %v9093_v10 }
0x1d90   :  { %v6548_v30 = vpop.f32.mrf.mxu0 }
0x1d92   :  { %v4979_v41 = vpop.f32.mrf.mxu0 }
0x1d93   :  { %v5127_v38 = vsel %vm1499_vm4, %v4979_v41, -inf }
0x1d94   :  { %5128 = vmax.xlane.f32.xlu0 %v5127_v38  ;;  %v6559_v20 = vpop.f32.mrf.mxu0 }
0x1d96   :  { %v4982_v36 = vpop.f32.mrf.mxu0 }
0x1d97   :  { %v5130_v34 = vsel %vm1499_vm4, %v4982_v36, -inf }
0x1d98   :  { %5131 = vmax.xlane.f32.xlu1 %v5130_v34  ;;  %v6560_v26 = vpop.f32.mrf.mxu0 }
0x1d9a   :  { %v5073_v17 = vpop.f32.mrf.mxu0 }
0x1d9b   :  { %v5139_v18 = vsel %vm1499_vm4, %v5073_v17, -inf }
0x1d9c   :  { %v6571_v23 = vpop.f32.mrf.mxu0 }
0x1d9e   :  { %v5076_v50 = vpop.f32.mrf.mxu0 }
0x1d9f   :  { %v5142_v53 = vsel %vm1499_vm4, %v5076_v50, -inf }
0x1da0   :  { %5143 = vmax.xlane.f32.xlu1 %v5142_v53  ;;  %v6572_v33 = vpop.f32.mrf.mxu0 }
0x1dbe   :  { %v9104_v28 = vpop.f32.mrf.mxu1 }
0x1dc0   :  { %v6553_v39 = vpop.f32.mrf.mxu1 }
0x1dc2   :  { %v9106_v27 = vpop.f32.mrf.mxu1 }
0x1dc3   :  { %v6990_v35 = vpack.i.bf16 %v9106_v27, %v9104_v28 }
0x1dc4   :  { %v6554_v1 = vpop.f32.mrf.mxu1 }
0x1dc6   :  { %v5026_v56 = vpop.f32.mrf.mxu1 }
0x1dc7   :  { %v5133_v45 = vsel %vm1499_vm4, %v5026_v56, -inf }
0x1dc8   :  { %5134 = vmax.xlane.f32.xlu0 %v5133_v45  ;;  %v6565_v63 = vpop.f32.mrf.mxu1 }
0x1dca   :  { %v5029_v47 = vpop.f32.mrf.mxu1 }
0x1dcb   :  { %v5136_v4 = vsel %vm1499_vm4, %v5029_v47, -inf }
0x1dcc   :  { %5137 = vmax.xlane.f32.xlu0 %v5136_v4  ;;  %v6566_v62 = vpop.f32.mrf.mxu1 }
0x1dce   :  { %v5120_v21 = vpop.f32.mrf.mxu1 }
0x1dcf   :  { %v5145_v58 = vsel %vm1499_vm4, %v5120_v21, -inf }
0x1dd0   :  { %5140 = vmax.xlane.f32.xlu0 %v5139_v18  ;;  %v6577_v8 = vpop.f32.mrf.mxu1 }
0x1dd2   :  { %v5123_v3 = vpop.f32.mrf.mxu1 }
0x1dd3   :  { %v5148_v49 = vsel %vm1499_vm4, %v5123_v3, -inf }
0x1dd4   :  { %5146 = vmax.xlane.f32.xlu0 %v5145_v58  ;;  %5149 = vmax.xlane.f32.xlu1 %v5148_v49  ;;  %v6578_v11 = vpop.f32.mrf.mxu1 }
0x1e1d   :  { %v5129_v55 = vpop.xlane.xlu0 %5128 }
0x1e1e   :  { %v5151_v44 = vsub.f32 %v4979_v41, %v5129_v55 }
0x1e20   :  { %v5159_v31 = vmul.f32 1.442695, %v5151_v44 }
0x1e21   :  { %v5132_v40 = vpop.xlane.xlu1 %5131 }
0x1e22   :  { %7290 = vpow2.f32 %v5159_v31  ;;  %v5152_v29 = vsub.f32 %v4982_v36, %v5132_v40 }
0x1e24   :  { %v5161_v12 = vmul.f32 1.442695, %v5152_v29 }
0x1e26   :  { %7292 = vpow2.f32 %v5161_v12 }
0x1e29   :  { %v5144_v19 = vpop.xlane.xlu1 %5143 }
0x1e2a   :  { %v5156_v41 = vsub.f32 %v5076_v50, %v5144_v19 }
0x1e2c   :  { %v5169_v34 = vmul.f32 1.442695, %v5156_v41 }
0x1e2f   :  { %v9115_v57 = vpop.eup %7290 }
0x1e30   :  { %v5175_v43 = vsel %vm1499_vm4, %v9115_v57, 0.0 }
0x1e31   :  { %5176 = vadd.xlane.f32.xlu0 %v5175_v43 }
0x1e33   :  { %v9119_v25 = vpop.eup %7292 }
0x1e34   :  { %v5178_v37 = vsel %vm1499_vm4, %v9119_v25, 0.0 }
0x1e35   :  { %5179 = vadd.xlane.f32.xlu1 %v5178_v37 }
0x1e51   :  { %v5135_v7 = vpop.xlane.xlu0 %5134 }
0x1e52   :  { %v5153_v30 = vsub.f32 %v5026_v56, %v5135_v7 }
0x1e54   :  { %v5163_v38 = vmul.f32 1.442695, %v5153_v30 }
0x1e55   :  { %v5138_v20 = vpop.xlane.xlu0 %5137 }
0x1e56   :  { %7294 = vpow2.f32 %v5163_v38  ;;  %v5154_v36 = vsub.f32 %v5029_v47, %v5138_v20  ;;  %v7349_v38 = vld [vmem:[%s9305_s11] sm:$0xff]   ;;  %v9179_v20 = vld [vmem:[%s9307_s13 + $0x38] sm:$0xff]  }
0x1e58   :  { %v5165_v26 = vmul.f32 1.442695, %v5154_v36 }
0x1e59   :  { %v5141_v23 = vpop.xlane.xlu0 %5140 }
0x1e5a   :  { %7296 = vpow2.f32 %v5165_v26  ;;  %v5155_v53 = vsub.f32 %v5073_v17, %v5141_v23  ;;  %v7351_v26 = vld [vmem:[%s9306_s12 + $0x8] sm:$0xff]  }
0x1e5b   :  { %7298 = vpow2.f32 %v5169_v34 }
0x1e5c   :  { %v5167_v33 = vmul.f32 1.442695, %v5155_v53 }
0x1e5d   :  { %v5147_v39 = vpop.xlane.xlu0 %5146  ;;  %v5150_v58 = vpop.xlane.xlu1 %5149 }
0x1e5e   :  { %7300 = vpow2.f32 %v5167_v33  ;;  %v5157_v1 = vsub.f32 %v5120_v21, %v5147_v39  ;;  %v5158_v49 = vsub.f32 %v5123_v3, %v5150_v58 }
0x1e60   :  { %v5171_v45 = vmul.f32 1.442695, %v5157_v1  ;;  %v5173_v11 = vmul.f32 1.442695, %v5158_v49 }
0x1e62   :  { %7302 = vpow2.f32 %v5171_v45 }
0x1e63   :  { %v7295_v63 = vpop.eup %7294  ;;  %7304 = vpow2.f32 %v5173_v11 }
0x1e64   :  { %v5181_v56 = vsel %vm1499_vm4, %v7295_v63, 0.0 }
0x1e65   :  { %5182 = vadd.xlane.f32.xlu0 %v5181_v56 }
0x1e67   :  { %v7297_v50 = vpop.eup %7296 }
0x1e68   :  { %v5184_v4 = vsel %vm1499_vm4, %v7297_v50, 0.0  ;;  %v9125_v47 = vpop.eup %7298 }
0x1e69   :  { %5185 = vadd.xlane.f32.xlu1 %v5184_v4  ;;  %v5190_v18 = vsel %vm1499_vm4, %v9125_v47, 0.0 }
0x1e6b   :  { %v7301_v62 = vpop.eup %7300 }
0x1e6c   :  { %v5187_v17 = vsel %vm1499_vm4, %v7301_v62, 0.0 }
0x1e6d   :  { %5188 = vadd.xlane.f32.xlu0 %v5187_v17  ;;  %5191 = vadd.xlane.f32.xlu1 %v5190_v18 }
0x1e6f   :  { %v9130_v21 = vpop.eup %7302 }
0x1e70   :  { %v5193_v8 = vsel %vm1499_vm4, %v9130_v21, 0.0  ;;  %v9144_v55 = vpop.eup %7304 }
0x1e71   :  { %5194 = vadd.xlane.f32.xlu0 %v5193_v8 }
0x1e7e   :  { %5268 = vrot.lane.b32.xlu1 %v9065_v48, %s7387_s15  ;;  %v5196_v48 = vsel %vm1499_vm4, %v9144_v55, 0.0 }
0x1e82   :  { %5316 = vrot.lane.b32.xlu1 %v9050_v51, %s7387_s15 }
0x1e87   :  { %5220 = vrot.lane.b32.xlu0 %v8953_v22, %s7387_s15 }
0x1e8b   :  { %6981 = vrot.lane.b32.xlu0 %v6980_v16, %s7388_s16 }
0x1ea6   :  { %5197 = vadd.xlane.f32.xlu1 %v5196_v48 }
0x1eb7   :  { %5364 = vrot.lane.b32.xlu1 %v9074_v42, %s7387_s15 }
0x1eba   :  { %v5177_v51 = vpop.xlane.xlu0 %5176 }
0x1ebb   :  { %6986 = vrot.lane.b32.xlu1 %v6985_v24, %s7389_s17 }
0x1ebe   :  { %v5180_v22 = vpop.xlane.xlu1 %5179 }
0x1ebf   :  { %6991 = vrot.lane.b32.xlu1 %v6990_v35, %s7390_s18  ;;  %7306 = vrcp.f32 %v5180_v22 }
0x1ec0   :  { %7308 = vrcp.f32 %v5177_v51 }
0x1ecc   :  { %v7307_v3 = vpop.eup %7306 }
0x1ecd   :  { %v7309_v24 = vpop.eup %7308  ;;  %v5208_v28 = vmul.f32 %v7307_v3, %v9119_v25 }
0x1ece   :  { %v5207_v44 = vmul.f32 %v7309_v24, %v9115_v57  ;;  %v7348_v57 = vld [vmem:[%s9305_s11 + $0x8] sm:$0xff]  }
0x1ed0   :  { %v5215_v40 = vpack.c.bf16 %v5208_v28, %v5207_v44 }
0x1eee   :  { %v5183_v6 = vpop.xlane.xlu0 %5182 }
0x1eef   :  { %7310 = vrcp.f32 %v5183_v6 }
0x1ef2   :  { %v5186_v15 = vpop.xlane.xlu1 %5185 }
0x1ef3   :  { %7312 = vrcp.f32 %v5186_v15 }
0x1ef6   :  { %v5189_v16 = vpop.xlane.xlu0 %5188  ;;  %v5192_v42 = vpop.xlane.xlu1 %5191 }
0x1ef7   :  { %7314 = vrcp.f32 %v5189_v16 }
0x1ef8   :  { %7316 = vrcp.f32 %v5192_v42 }
0x1efa   :  { %v5195_v10 = vpop.xlane.xlu0 %5194  ;;  %v5269_v46 = vpop.permute.xlu1 %5268 }
0x1efb   :  { %6586 = vmatpush3.bf16.msra.mxu1 %v5269_v46  ;;  %7318 = vrcp.f32 %v5195_v10 }
0x1efc   :  { %6597 = vmatprep.subr.bf16.mxu1 %v7382_v13  ;;  %v7311_v27 = vpop.eup %7310 }
0x1efd   :  { %v5209_v29 = vmul.f32 %v7311_v27, %v7295_v63 }
0x1efe   :  { %v5221_v35 = vpop.permute.xlu0 %5220  ;;  %v5317_v43 = vpop.permute.xlu1 %5316 }
0x1eff   :  { %6580 = vmatpush3.bf16.msra.mxu0 %v5221_v35 }
0x1f00   :  { %v7313_v31 = vpop.eup %7312  ;;  %6591 = vmatprep.subr.bf16.mxu0 %v7382_v13 }
0x1f01   :  { %v5210_v12 = vmul.f32 %v7313_v31, %v7297_v50 }
0x1f02   :  { %6582 = vmatmul.mubr.msk.bf16.vlgmr.msra.gmra.mxu0 %vm1499_vm4, %v5215_v40  ;;  %v6982_v34 = vpop.permute.xlu0 %6981 }
0x1f03   :  { %v5216_v37 = vpack.c.bf16 %v5210_v12, %v5209_v29  ;;  %6592 = vmatpush3.bf16.msra.mxu0 %v5317_v43  ;;  %6593 = vmatprep.mubr.msk.bf16.mxu0 %vm7383_vm1, %v7382_v13  ;;  %v6984_v53 = vunpack.i.h.bf16 %v6982_v34  ;;  %v6983_v33 = vunpack.i.l.bf16 %v6982_v34 }
0x1f04   :  { %v7315_v25 = vpop.eup %7314  ;;  %6603 = vmatprep.subr.bf16.mxu0 %v7348_v57 }
0x1f05   :  { %v7317_v19 = vpop.eup %7316  ;;  %6588 = vmatmul.mubr.msk.bf16.vlgmr.msra.gmra.mxu1 %vm1499_vm4, %v5216_v37  ;;  %v5211_v7 = vmul.f32 %v7315_v25, %v7301_v62  ;;  %v4934_v56 = vsel %vm915_vm2, %v9087_v32, %v6984_v53  ;;  %v4933_v50 = vsel %vm915_vm2, %v9085_v52, %v6983_v33  ;;  %v7352_v52 = vld [vmem:[%s9306_s12] sm:$0xff]   ;;  %v7353_v33 = vld [vmem:[%s9307_s13 + $0x30] sm:$0xff]  }
0x1f06   :  { %v5212_v30 = vmul.f32 %v7317_v19, %v9125_v47  ;;  %6599 = vmatprep.mubr.msk.bf16.mxu1 %vm7383_vm1, %v7382_v13 }
0x1f08   :  { %v5217_v41 = vpack.c.bf16 %v5212_v30, %v5211_v7  ;;  %v7319_v45 = vpop.eup %7318 }
0x1f09   :  { %v5213_v8 = vmul.f32 %v7319_v45, %v9130_v21  ;;  %v7357_v45 = vld [vmem:[%s9307_s13 + $0x10] sm:$0xff]  }
0x1f0a   :  { %6594 = vmatmul.mubr.msk.bf16.vlgmr.msra.gmra.mxu0 %vm1499_vm4, %v5217_v41 }
0x1f0b   :  { %6604 = vmatpush3.bf16.msra.mxu0 %v7348_v57 }
0x1f0c   :  { %6605 = vmatprep.subr.bf16.mxu0 %v7349_v38 }
0x1f0f   :  { %6606 = vmatpush3.bf16.msra.mxu0 %v7349_v38 }
0x1f10   :  { %6619 = vmatprep.subr.bf16.mxu0 %v9179_v20 }
0x1f2f   :  { %v5198_v36 = vpop.xlane.xlu1 %5197 }
0x1f30   :  { %7320 = vrcp.f32 %v5198_v36 }
0x1f33   :  { %v5365_v13 = vpop.permute.xlu1 %5364 }
0x1f34   :  { %6598 = vmatpush3.bf16.msra.mxu1 %v5365_v13 }
0x1f35   :  { %6611 = vmatprep.subr.bf16.mxu1 %v7351_v26 }
0x1f37   :  { %v6987_v23 = vpop.permute.xlu1 %6986 }
0x1f38   :  { %v6989_v39 = vunpack.i.h.bf16 %v6987_v23  ;;  %v6988_v1 = vunpack.i.l.bf16 %v6987_v23 }
0x1f3a   :  { %v4936_v17 = vsel %vm1499_vm4, %v4934_v56, %v6989_v39  ;;  %v4935_v18 = vsel %vm1499_vm4, %v4933_v50, %v6988_v1  ;;  %v7354_v39 = vld [vmem:[%s9307_s13 + $0x28] sm:$0xff]   ;;  %v7355_v1 = vld [vmem:[%s9307_s13 + $0x20] sm:$0xff]  }
0x1f3b   :  { %v6992_v63 = vpop.permute.xlu1 %6991  ;;  %v7359_v56 = vld [vmem:[%s9307_s13] sm:$0xff]  }
0x1f3c   :  { %v6994_v4 = vunpack.i.h.bf16 %v6992_v63  ;;  %v6993_v47 = vunpack.i.l.bf16 %v6992_v63  ;;  %v7358_v63 = vld [vmem:[%s9307_s13 + $0x8] sm:$0xff]  }
0x1f3d   :  { %v7321_v62 = vpop.eup %7320 }
0x1f3e   :  { %v5214_v58 = vmul.f32 %v7321_v62, %v9144_v55  ;;  %v4937_v49 = vsel %vm1502_vm5, %v4935_v18, %v6993_v47  ;;  %v4938_v11 = vsel %vm1502_vm5, %v4936_v17, %v6994_v4 }
0x1f3f   :  { %v5441_v48 = vpack.c.bf16 %v4938_v11, %v4937_v49 }
0x1f40   :  { %v5218_v32 = vpack.c.bf16 %v5214_v58, %v5213_v8 }
0x1f41   :  { %6607 = vmatprep.mubr.msk.bf16.mxu0 %vm139_vm0, %v5441_v48 }
0x1f42   :  { %6600 = vmatmul.mubr.msk.bf16.vlgmr.msra.gmra.mxu1 %vm1499_vm4, %v5218_v32 }
0x1f43   :  { %6612 = vmatpush3.bf16.msra.mxu1 %v7351_v26 }
0x1f44   :  { %6613 = vmatprep.subr.bf16.mxu1 %v7352_v52 }
0x1f47   :  { %6614 = vmatpush3.bf16.msra.mxu1 %v7352_v52 }
0x1fc2   :  { %v5260_v21 = vpop.f32.mrf.mxu0 }
0x1fc4   :  { %v6583_v22 = vpop.f32.mrf.mxu0 }
0x1fc5   :  { %v5308_v55 = vpop.f32.mrf.mxu1 }
0x1fc6   :  { %v5263_v51 = vpop.f32.mrf.mxu0 }
0x1fc7   :  { %v6589_v6 = vpop.f32.mrf.mxu1 }
0x1fc8   :  { %v6584_v15 = vpop.f32.mrf.mxu0 }
0x1fc9   :  { %v5311_v16 = vpop.f32.mrf.mxu1 }
0x1fca   :  { %v6995_v42 = vpack.i.bf16 %v5311_v16, %v5308_v55  ;;  %v5356_v3 = vpop.f32.mrf.mxu0 }
0x1fcb   :  { %v6590_v10 = vpop.f32.mrf.mxu1 }
0x1fcc   :  { %v6595_v46 = vpop.f32.mrf.mxu0  ;;  %6996 = vrot.lane.b32.xlu0 %v6995_v42, %s7388_s16 }
0x1fce   :  { %v5359_v24 = vpop.f32.mrf.mxu0 }
0x1fcf   :  { %v7000_v28 = vpack.i.bf16 %v5359_v24, %v5356_v3 }
0x1fd0   :  { %v6596_v27 = vpop.f32.mrf.mxu0 }
0x1fd1   :  { %7001 = vrot.lane.b32.xlu0 %v7000_v28, %s7389_s17 }
0x2002   :  { %v5404_v35 = vpop.f32.mrf.mxu1 }
0x2004   :  { %v6601_v44 = vpop.f32.mrf.mxu1 }
0x2006   :  { %v5407_v31 = vpop.f32.mrf.mxu1 }
0x2007   :  { %v7005_v40 = vpack.i.bf16 %v5407_v31, %v5404_v35 }
0x2008   :  { %v6602_v29 = vpop.f32.mrf.mxu1 }
0x2009   :  { %7006 = vrot.lane.b32.xlu1 %v7005_v40, %s7390_s18 }
0x203e   :  { %v6997_v12 = vpop.permute.xlu0 %6996 }
0x203f   :  { %v6999_v37 = vunpack.i.h.bf16 %v6997_v12  ;;  %v6998_v25 = vunpack.i.l.bf16 %v6997_v12 }
0x2041   :  { %v5436_v30 = vsel %vm915_vm2, %v5263_v51, %v6999_v37  ;;  %v5435_v41 = vsel %vm915_vm2, %v5260_v21, %v6998_v25 }
0x2043   :  { %v7002_v43 = vpop.permute.xlu0 %7001 }
0x2044   :  { %v7004_v57 = vunpack.i.h.bf16 %v7002_v43  ;;  %v7003_v19 = vunpack.i.l.bf16 %v7002_v43 }
0x2046   :  { %v5437_v13 = vsel %vm1499_vm4, %v5435_v41, %v7003_v19  ;;  %v5438_v34 = vsel %vm1499_vm4, %v5436_v30, %v7004_v57 }
0x207b   :  { %v7007_v7 = vpop.permute.xlu1 %7006 }
0x207c   :  { %v7009_v38 = vunpack.i.h.bf16 %v7007_v7  ;;  %v7008_v36 = vunpack.i.l.bf16 %v7007_v7 }
0x207e   :  { %v5440_v26 = vsel %vm1502_vm5, %v5438_v34, %v7009_v38  ;;  %v5439_v23 = vsel %vm1502_vm5, %v5437_v13, %v7008_v36 }
0x207f   :  { %v5442_v53 = vpack.c.bf16 %v5440_v26, %v5439_v23 }
0x2081   :  { %6608 = vmatmul.mubr.msk.bf16.vlgmr.msra.gmra.mxu0 %vm139_vm0, %v5442_v53 }
0x2082   :  { %6620 = vmatpush3.bf16.msra.mxu0 %v9179_v20  ;;  %v7356_v20 = vld [vmem:[%s9307_s13 + $0x18] sm:$0xff]   ;;  %s7391_s13 = smov [#allocation2]  }
0x2083   :  { %6621 = vmatprep.subr.bf16.mxu0 %v7353_v33  ;;  %s5728_s26 = sshll.u32 %s7391_s13, 4  ;;  %s5729_s26 = int_to_ptr.vmem [resolvable:$true] %s5728_s26 }
0x2084   :  { %s7360_s8 = scalar_lea.vmem %s5729_s26, 512  ;;  %p7365_p1 = scmp.lt.s32.totalorder %s5729_s26, %s5729_s26 }
0x2085   :  { %p7361_p0 = scmp.ne.s32.totalorder %s5729_s26, %s7360_s8  ;;  %p7366_p2 = scmp.lt.s32.totalorder %s7360_s8, %s7360_s8 }
0x2086   :  { %6622 = vmatpush3.bf16.msra.mxu0 %v7353_v33 }
0x2087   :  { %6623 = vmatprep.subr.bf16.mxu0 %v7354_v39  ;;  %p7367_p3 = por %p7366_p2, %p7365_p1 }
0x2089   :  { %p7368_p4 = pnand %p7367_p3, %p7361_p0 }
0x208a   :  { %6624 = vmatpush3.bf16.msra.mxu0 %v7354_v39 }
0x208b   :  { %6625 = vmatprep.subr.bf16.mxu0 %v7355_v1 }
0x208e   :  { %6626 = vmatpush3.bf16.msra.mxu0 %v7355_v1 }
0x208f   :  { %6627 = vmatprep.subr.bf16.mxu0 %v7356_v20 }
0x2092   :  { %6628 = vmatpush3.bf16.msra.mxu0 %v7356_v20 }
0x2093   :  { %6629 = vmatprep.subr.bf16.mxu0 %v7357_v45 }
0x2096   :  { %6630 = vmatpush3.bf16.msra.mxu0 %v7357_v45 }
0x2097   :  { %6631 = vmatprep.subr.bf16.mxu0 %v7358_v63 }
0x209a   :  { %6632 = vmatpush3.bf16.msra.mxu0 %v7358_v63 }
0x209b   :  { %6633 = vmatprep.subr.bf16.mxu0 %v7359_v56 }
0x209e   :  { %6634 = vmatpush3.bf16.msra.mxu0 %v7359_v56 }
0x2141   :  { %v6609_v50 = vpop.f32.mrf.mxu0 }
0x2142   :  { %v5500_v47 = vadd.f32 %v6609_v50, %v8879_v5 }
0x2143   :  { %v5483_v4 = vpop.f32.mrf.mxu0 }
0x2144   :  { %v5498_v62 = vadd.f32 %v5483_v4, %v8876_v14  ;;  %v9238_v58 = vadd.f32 %v5500_v47, %v8758_v2 }
0x2145   :  { %v6610_v17 = vpop.f32.mrf.mxu0 }
0x2146   :  { %v9235_v18 = vadd.f32 %v5498_v62, %v8758_v2  ;;  %v5501_v49 = vadd.f32 %v6610_v17, %v8889_v59  ;;  %v5512_v32 = vsel %vm139_vm0, %v9238_v58, 0.0 }
0x2147   :  { %v5486_v8 = vpop.f32.mrf.mxu0 }
0x2148   :  { %v5499_v11 = vadd.f32 %v5486_v8, %v8886_v0  ;;  %v5506_v48 = vsel %vm139_vm0, %v9235_v18, 0.0  ;;  %v9248_v14 = vadd.f32 %v5501_v49, %v8758_v2 }
0x2149   :  { %5507 = vadd.xlane.f32.xlu0 %v5506_v48 }
0x214a   :  { %v9245_v5 = vadd.f32 %v5499_v11, %v8758_v2  ;;  %v5515_v0 = vsel %vm139_vm0, %v9248_v14, 0.0 }
0x214c   :  { %v5509_v52 = vsel %vm139_vm0, %v9245_v5, 0.0 }
0x214d   :  { %5513 = vadd.xlane.f32.xlu0 %v5512_v32  ;;  %5510 = vadd.xlane.f32.xlu1 %v5509_v52 }
0x2151   :  { %5516 = vadd.xlane.f32.xlu0 %v5515_v0 }
0x21d2   :  { %v5508_v59 = vpop.xlane.xlu0 %5507 }
0x21d3   :  { %v5518_v21 = vmul.f32 0.03125, %v5508_v59 }
0x21d5   :  { %v5522_v22 = vsub.f32 %v9235_v18, %v5518_v21 }
0x21d6   :  { %v5514_v55 = vpop.xlane.xlu0 %5513  ;;  %v5511_v51 = vpop.xlane.xlu1 %5510 }
0x21d7   :  { %v5520_v2 = vmul.f32 0.03125, %v5514_v55  ;;  %v5519_v6 = vmul.f32 0.03125, %v5511_v51  ;;  %v5526_v15 = vmul.f32 %v5522_v22, %v5522_v22 }
0x21d9   :  { %v5524_v16 = vsub.f32 %v9238_v58, %v5520_v2  ;;  %v5523_v42 = vsub.f32 %v9245_v5, %v5519_v6  ;;  %v5530_v3 = vsel %vm139_vm0, %v5526_v15, 0.0 }
0x21da   :  { %5531 = vadd.xlane.f32.xlu0 %v5530_v3  ;;  %v5517_v10 = vpop.xlane.xlu0 %5516 }
0x21db   :  { %v5521_v46 = vmul.f32 0.03125, %v5517_v10  ;;  %v5528_v24 = vmul.f32 %v5524_v16, %v5524_v16  ;;  %v5527_v28 = vmul.f32 %v5523_v42, %v5523_v42 }
0x21dd   :  { %v5525_v27 = vsub.f32 %v9248_v14, %v5521_v46  ;;  %v5536_v35 = vsel %vm139_vm0, %v5528_v24, 0.0  ;;  %v5533_v44 = vsel %vm139_vm0, %v5527_v28, 0.0 }
0x21de   :  { %5537 = vadd.xlane.f32.xlu0 %v5536_v35  ;;  %5534 = vadd.xlane.f32.xlu1 %v5533_v44 }
0x21df   :  { %v5529_v31 = vmul.f32 %v5525_v27, %v5525_v27 }
0x21e1   :  { %v5539_v40 = vsel %vm139_vm0, %v5529_v31, 0.0 }
0x21e2   :  { %5540 = vadd.xlane.f32.xlu1 %v5539_v40 }
0x2263   :  { %v5532_v29 = vpop.xlane.xlu0 %5531 }
0x2264   :  { %v5542_v12 = vmul.f32 0.03125, %v5532_v29 }
0x2266   :  { %v5546_v43 = vadd.f32 1e-05, %v5542_v12 }
0x2267   :  { %v5538_v37 = vpop.xlane.xlu0 %5537  ;;  %v5535_v25 = vpop.xlane.xlu1 %5534 }
0x2268   :  { %7322 = vrsqrt.f32 %v5546_v43  ;;  %v5544_v57 = vmul.f32 0.03125, %v5538_v37  ;;  %v5543_v19 = vmul.f32 0.03125, %v5535_v25 }
0x226a   :  { %v5548_v7 = vadd.f32 1e-05, %v5544_v57  ;;  %v5547_v30 = vadd.f32 1e-05, %v5543_v19 }
0x226b   :  { %v5541_v41 = vpop.xlane.xlu1 %5540 }
0x226c   :  { %7324 = vrsqrt.f32 %v5548_v7  ;;  %v5545_v38 = vmul.f32 0.03125, %v5541_v41 }
0x226d   :  { %7326 = vrsqrt.f32 %v5547_v30 }
0x226e   :  { %v5549_v36 = vadd.f32 1e-05, %v5545_v38 }
0x2270   :  { %7328 = vrsqrt.f32 %v5549_v36 }
0x2275   :  { %v7323_v13 = vpop.eup %7322 }
0x2276   :  { %v5554_v34 = vmul.f32 %v7323_v13, %v5522_v22 }
0x2278   :  { %v5558_v39 = vmul.f32 %v5554_v34, %v8804_v61 }
0x2279   :  { %v7325_v26 = vpop.eup %7324 }
0x227a   :  { %v7327_v23 = vpop.eup %7326  ;;  %v5556_v53 = vmul.f32 %v7325_v26, %v5524_v16  ;;  %v5562_v56 = vadd.f32 %v5558_v39, %v8813_v60 }
0x227b   :  { %v5555_v33 = vmul.f32 %v7327_v23, %v5523_v42 }
0x227c   :  { %v5560_v45 = vmul.f32 %v5556_v53, %v8804_v61 }
0x227d   :  { %v7329_v1 = vpop.eup %7328  ;;  %v5559_v20 = vmul.f32 %v5555_v33, %v8804_v61 }
0x227e   :  { %v5557_v63 = vmul.f32 %v7329_v1, %v5525_v27  ;;  %v5564_v62 = vadd.f32 %v5560_v45, %v8813_v60 }
0x227f   :  { %v5563_v50 = vadd.f32 %v5559_v20, %v8813_v60 }
0x2280   :  { %v5561_v4 = vmul.f32 %v5557_v63, %v8804_v61 }
0x2281   :  { %v5566_v47 = vpack.c.bf16 %v5563_v50, %v5562_v56 }
0x2282   :  { %v5565_v17 = vadd.f32 %v5561_v4, %v8813_v60 }
0x2283   :  { %6615 = vmatprep.mubr.msk.bf16.mxu1 %vm139_vm0, %v5566_v47 }
0x2284   :  { %v5567_v8 = vpack.c.bf16 %v5565_v17, %v5564_v62 }
0x2286   :  { %6616 = vmatmul.mubr.msk.bf16.vlgmr.msra.gmra.mxu1 %vm139_vm0, %v5567_v8 }
0x2346   :  { %v6617_v49 = vpop.f32.mrf.mxu1 }
0x2347   :  { %v5617_v11 = vadd.f32 %v6617_v49, %v8861_v54 }
0x2348   :  { %v5608_v48 = vpop.f32.mrf.mxu1 }
0x2349   :  { %v5629_v32 = vmul.f32 0.044715, %v5617_v11  ;;  %v5609_v52 = vadd.f32 %v5608_v48, %v8861_v54  ;;  %v5625_v38 = vmul.f32 0.5, %v5617_v11 }
0x234a   :  { %v6618_v0 = vpop.f32.mrf.mxu1 }
0x234b   :  { %v5633_v59 = vmul.f32 %v5629_v32, %v5617_v11  ;;  %v5627_v61 = vmul.f32 0.044715, %v5609_v52  ;;  %v5620_v21 = vadd.f32 %v6618_v0, %v8861_v54  ;;  %v5623_v7 = vmul.f32 0.5, %v5609_v52 }
0x234c   :  { %v5611_v22 = vpop.f32.mrf.mxu1 }
0x234d   :  { %v5637_v55 = vmul.f32 %v5633_v59, %v5617_v11  ;;  %v5631_v60 = vmul.f32 %v5627_v61, %v5609_v52  ;;  %v5630_v51 = vmul.f32 0.044715, %v5620_v21  ;;  %v5612_v2 = vadd.f32 %v5611_v22, %v8861_v54 }
0x234e   :  { %v5626_v57 = vmul.f32 0.5, %v5620_v21 }
0x234f   :  { %v5641_v6 = vadd.f32 %v5637_v55, %v5617_v11  ;;  %v5635_v15 = vmul.f32 %v5631_v60, %v5609_v52  ;;  %v5634_v16 = vmul.f32 %v5630_v51, %v5620_v21  ;;  %v5628_v42 = vmul.f32 0.044715, %v5612_v2 }
0x2350   :  { %v5624_v30 = vmul.f32 0.5, %v5612_v2 }
0x2351   :  { %v5638_v3 = vmul.f32 %v5634_v16, %v5620_v21  ;;  %v5632_v10 = vmul.f32 %v5628_v42, %v5612_v2  ;;  %v5639_v46 = vadd.f32 %v5635_v15, %v5609_v52  ;;  %v5645_v24 = vmul.f32 0.7978846, %v5641_v6 }
0x2353   :  { %v5642_v28 = vadd.f32 %v5638_v3, %v5620_v21  ;;  %v5636_v27 = vmul.f32 %v5632_v10, %v5612_v2  ;;  %v5643_v35 = vmul.f32 0.7978846, %v5639_v46 }
0x2355   :  { %v5646_v44 = vmul.f32 0.7978846, %v5642_v28  ;;  %v5640_v31 = vadd.f32 %v5636_v27, %v5612_v2  ;;  %7330 = vtanh.f32 %v5643_v35 }
0x2356   :  { %7332 = vtanh.f32 %v5645_v24 }
0x2357   :  { %7334 = vtanh.f32 %v5646_v44  ;;  %v5644_v40 = vmul.f32 0.7978846, %v5640_v31 }
0x2359   :  { %7336 = vtanh.f32 %v5644_v40 }
0x2362   :  { %v7331_v29 = vpop.eup %7330 }
0x2363   :  { %v7333_v54 = vpop.eup %7332  ;;  %v5651_v43 = vadd.f32 1.0, %v7331_v29 }
0x2364   :  { %v7335_v12 = vpop.eup %7334  ;;  %v5653_v19 = vadd.f32 1.0, %v7333_v54 }
0x2365   :  { %v5654_v37 = vadd.f32 1.0, %v7335_v12  ;;  %v5655_v13 = vmul.f32 %v5651_v43, %v5623_v7 }
0x2366   :  { %v7337_v25 = vpop.eup %7336  ;;  %v5657_v26 = vmul.f32 %v5653_v19, %v5625_v38 }
0x2367   :  { %v5652_v41 = vadd.f32 1.0, %v7337_v25  ;;  %v5658_v36 = vmul.f32 %v5654_v37, %v5626_v57 }
0x2369   :  { %v5656_v34 = vmul.f32 %v5652_v41, %v5624_v30  ;;  %v5660_v53 = vpack.c.bf16 %v5658_v36, %v5657_v26 }
0x236b   :  { %v5659_v23 = vpack.c.bf16 %v5656_v34, %v5655_v13 }
0x236d   :  { %6635 = vmatprep.mubr.bf16.mxu0 %v5659_v23 }
0x236e   :  { %6636 = vmatmul.mubr.bf16.vlgmr.msra.gmra.mxu0 %v5660_v53 }
0x242e   :  { %v6637_v33 = vpop.f32.mrf.mxu0 }
0x242f   :  { %v5712_v39 = vadd.f32 %v6637_v33, %v9238_v58 }
0x2430   :  { %v5695_v1 = vpop.f32.mrf.mxu0 }
0x2431   :  { %v5716_v20 = vadd.f32 %v5712_v39, %v8871_v9  ;;  %v5710_v45 = vadd.f32 %v5695_v1, %v9235_v18 }
0x2432   :  { %v6638_v63 = vpop.f32.mrf.mxu0 }
0x2433   :  { %5721 = vst.msk [vmem:[#allocation2 + $0x10] sm:$0xff] %vm139_vm0, %v5716_v20  ;;  %v5714_v56 = vadd.f32 %v5710_v45, %v8871_v9  ;;  %v5713_v50 = vadd.f32 %v6638_v63, %v9248_v14 }
0x2434   :  { %v5698_v4 = vpop.f32.mrf.mxu0 }
0x2435   :  { %5718 = vst.msk [vmem:[#allocation2] sm:$0xff] %vm139_vm0, %v5714_v56  ;;  %v5717_v47 = vadd.f32 %v5713_v50, %v8871_v9  ;;  %v5711_v58 = vadd.f32 %v5698_v4, %v9245_v5 }
0x2437   :  { %5722 = vst.msk [vmem:[#allocation2 + $0x18] sm:$0xff] %vm139_vm0, %v5717_v47  ;;  %v5715_v18 = vadd.f32 %v5711_v58, %v8871_v9 }
0x2439   :  { %5719 = vst.msk [vmem:[#allocation2 + $0x8] sm:$0xff] %vm139_vm0, %v5715_v18 }
0x243a   :  { %7371 = shalt.err (!%p7368_p4)
}
0x243b   :  { %s7392_s27 = smov 128  }
0x243c   :  { %5734 = dma.vmem_to_hbm [thread:$0]  %s5729_s26, 512, %s9308_s14, [#allocation3], %s7392_s27, %s7392_s27, %s7388_s16  }
0x243d   :  { %7380 = dma.done.wait [#allocation3], 512  }
0x243e   :  { %7381 = vsyncadd [#allocation3], 4294966784 }
0x243f   :  { %5738 = vsyncpa [#allocation3], 1 }

</bundles_post_ra>
